<compile_context>
chip_gen: v5e
topology: v5e:2x2
jax: 0.10.0
libtpu: 0.0.40
codegen_flags: <defaults>
</compile_context>

<pallas_src>
import functools

import jax
import jax.numpy as jnp
from jax.experimental import pallas as pl
from jax.experimental.pallas import tpu as pltpu

F32 = jnp.float32
BF16 = jnp.bfloat16
LN_EPS = 1e-5                       # PyTorch nn.LayerNorm default
VMEM_LIMIT = 48 * 1024 * 1024       # explicit scoped-VMEM budget (fits v7x 64 MiB)


def _round_up(x, m):
    return ((x + m - 1) // m) * m


# ----------------------------- Pallas kernels -------------------------------

def _linear_kernel(x_ref, w_ref, b_ref, o_ref):
    o_ref[...] = (jnp.dot(x_ref[...], w_ref[...],
                          preferred_element_type=F32) + b_ref[...])


def linear(x, w, b, *, tile_n=512):
    """y = x @ w + b, tiled over rows; weight VMEM-resident, bf16 MXU inputs."""
    N, K = x.shape
    M = w.shape[1]
    Kp = _round_up(K, 128)                  # lane-friendly contraction dim
    if Kp != K:
        x = jnp.pad(x, ((0, 0), (0, Kp - K)))
        w = jnp.pad(w, ((0, Kp - K), (0, 0)))
    tile = min(tile_n, _round_up(N, 16))    # 16: bf16 sublane packing
    Np = _round_up(N, tile)
    if Np != N:
        x = jnp.pad(x, ((0, Np - N), (0, 0)))
    out = pl.pallas_call(
        _linear_kernel,
        out_shape=jax.ShapeDtypeStruct((Np, M), F32),
        grid=(Np // tile,),
        in_specs=[pl.BlockSpec((tile, Kp), lambda i: (i, 0)),
                  pl.BlockSpec((Kp, M), lambda i: (0, 0)),
                  pl.BlockSpec((1, M), lambda i: (0, 0))],
        out_specs=pl.BlockSpec((tile, M), lambda i: (i, 0)),
        compiler_params=pltpu.CompilerParams(
            dimension_semantics=("parallel",),
            vmem_limit_bytes=VMEM_LIMIT),
    )(x.astype(BF16), w.astype(BF16), b.reshape(1, M).astype(F32))
    return out[:N]


def _layernorm(x, g, b):
    mu = jnp.mean(x, axis=-1, keepdims=True)
    var = jnp.mean((x - mu) ** 2, axis=-1, keepdims=True)
    return (x - mu) * jax.lax.rsqrt(var + LN_EPS) * g + b


def _encoder_tail_kernel(src_ref, ys_ref, yt_ref,
                         g1_ref, b1_ref, w1_ref, bb1_ref,
                         w2_ref, bb2_ref, g2_ref, b2_ref, o_ref):
    # TODO(synk): TransformerEncoderLayer.forward_post source was not provided;
    # reconstructed as the standard DETR-style post-norm block:
    #   x = norm1(src + attn); y = linear2(relu(linear1(x))); out = norm2(x + y)
    x = src_ref[...] + ys_ref[...] + yt_ref[...]        # fused ys+yt residual
    xn = _layernorm(x, g1_ref[...], b1_ref[...])
    h = jnp.dot(xn.astype(BF16), w1_ref[...],
                preferred_element_type=F32) + bb1_ref[...]
    h = jnp.maximum(h, 0.0)
    y = jnp.dot(h.astype(BF16), w2_ref[...],
                preferred_element_type=F32) + bb2_ref[...]
    o_ref[...] = _layernorm(xn + y, g2_ref[...], b2_ref[...])


def encoder_tail(src2d, ys2d, yt2d, lp, *, tile_n=512):
    """Residual + LN + FFN + LN, tiled over the token axis."""
    N, C = src2d.shape
    FF = lp["ffn_w1"].shape[1]
    tile = min(tile_n, _round_up(N, 8))
    Np = _round_up(N, tile)
    if Np != N:
        pad = ((0, Np - N), (0, 0))
        src2d = jnp.pad(src2d, pad)
        ys2d = jnp.pad(ys2d, pad)
        yt2d = jnp.pad(yt2d, pad)
    tok = pl.BlockSpec((tile, C), lambda i: (i, 0))
    cvec = pl.BlockSpec((1, C), lambda i: (0, 0))
    out = pl.pallas_call(
        _encoder_tail_kernel,
        out_shape=jax.ShapeDtypeStruct((Np, C), F32),
        grid=(Np // tile,),
        in_specs=[tok, tok, tok,
                  cvec, cvec,
                  pl.BlockSpec((C, FF), lambda i: (0, 0)),
                  pl.BlockSpec((1, FF), lambda i: (0, 0)),
                  pl.BlockSpec((FF, C), lambda i: (0, 0)),
                  cvec, cvec, cvec],
        out_specs=tok,
        compiler_params=pltpu.CompilerParams(
            dimension_semantics=("parallel",),
            vmem_limit_bytes=VMEM_LIMIT),
    )(src2d, ys2d, yt2d,
      lp["ln1_g"].reshape(1, C), lp["ln1_b"].reshape(1, C),
      lp["ffn_w1"].astype(BF16), lp["ffn_b1"].reshape(1, FF),
      lp["ffn_w2"].astype(BF16), lp["ffn_b2"].reshape(1, C),
      lp["ln2_g"].reshape(1, C), lp["ln2_b"].reshape(1, C))
    return out[:N]


def _make_mha_kernel(gb, lpad, lreal, hd):
    scale = 1.0 / float(hd) ** 0.5

    def kernel(qk_ref, v_ref, wq_ref, wk_ref, wv_ref, wo_ref,
               bq_ref, bk_ref, bv_ref, bo_ref, o_ref):
        h = pl.program_id(1)
        xqk = qk_ref[...]                                    # (gb*lpad, d) bf16
        xv = v_ref[...]
        # per-head projections (2-D MXU matmuls; head slice chosen by BlockSpec)
        q = jnp.dot(xqk, wq_ref[0], preferred_element_type=F32) + bq_ref[0]
        k = jnp.dot(xqk, wk_ref[0], preferred_element_type=F32) + bk_ref[0]
        v = jnp.dot(xv, wv_ref[0], preferred_element_type=F32) + bv_ref[0]
        q3 = (q * scale).reshape(gb, lpad, hd).astype(BF16)
        k3 = k.reshape(gb, lpad, hd).astype(BF16)
        v3 = v.reshape(gb, lpad, hd).astype(BF16)
        s = jnp.einsum('gld,gmd->glm', q3, k3, preferred_element_type=F32)
        if lpad != lreal:                                    # mask padded keys
            key_idx = jax.lax.broadcasted_iota(jnp.int32, s.shape, 2)
            s = jnp.where(key_idx < lreal, s, -1e30)
        s = s - jnp.max(s, axis=-1, keepdims=True)
        p = jnp.exp(s)
        p = p * pl.reciprocal(jnp.sum(p, axis=-1, keepdims=True), approx=True)
        ctx = jnp.einsum('glm,gmd->gld', p.astype(BF16), v3,
                         preferred_element_type=F32)
        out_h = jnp.dot(ctx.reshape(gb * lpad, hd).astype(BF16), wo_ref[0],
                        preferred_element_type=F32)

        @pl.when(h == 0)
        def _():
            o_ref[...] = out_h + bo_ref[...]

        @pl.when(h > 0)
        def _():
            o_ref[...] += out_h

    return kernel


def mha(qk, v, ap, nhead, *, target_rows=1024):
    """Per-group multi-head self-attention.

    qk, v: (G, L, d) float32 (q == k == qk).  Returns (G, L, d) float32.
    Grid is (group_blocks, heads); the head axis accumulates into a
    VMEM-resident output block and selects its weight slice via index_map.
    """
    G, L, d = qk.shape
    assert d % nhead == 0
    hd = d // nhead
    Lp = _round_up(L, 16)                    # bf16 packing + clean in-kernel reshape
    Gb = max(1, min(G, target_rows // Lp))   # groups batched per grid step
    Gp = _round_up(G, Gb)
    pad = ((0, Gp - G), (0, Lp - L), (0, 0))
    qk2 = jnp.pad(qk, pad).reshape(Gp * Lp, d).astype(BF16)
    v2 = jnp.pad(v, pad).reshape(Gp * Lp, d).astype(BF16)

    # per-head weight / bias slices exposed on a leading head axis
    wq = ap["wq"].reshape(d, nhead, hd).transpose(1, 0, 2).astype(BF16)
    wk = ap["wk"].reshape(d, nhead, hd).transpose(1, 0, 2).astype(BF16)
    wv = ap["wv"].reshape(d, nhead, hd).transpose(1, 0, 2).astype(BF16)
    wo = ap["wo"].reshape(nhead, hd, d).astype(BF16)
    bq = ap["bq"].reshape(nhead, 1, hd)
    bk = ap["bk"].reshape(nhead, 1, hd)
    bv = ap["bv"].reshape(nhead, 1, hd)
    bo = ap["bo"].reshape(1, d)

    rows = Gb * Lp
    row_spec = pl.BlockSpec((rows, d), lambda g, h: (g, 0))
    whd_spec = pl.BlockSpec((1, d, hd), lambda g, h: (h, 0, 0))
    bhd_spec = pl.BlockSpec((1, 1, hd), lambda g, h: (h, 0, 0))
    out = pl.pallas_call(
        _make_mha_kernel(Gb, Lp, L, hd),
        out_shape=jax.ShapeDtypeStruct((Gp * Lp, d), F32),
        grid=(Gp // Gb, nhead),
        in_specs=[row_spec, row_spec,
                  whd_spec, whd_spec, whd_spec,
                  pl.BlockSpec((1, hd, d), lambda g, h: (h, 0, 0)),
                  bhd_spec, bhd_spec, bhd_spec,
                  pl.BlockSpec((1, d), lambda g, h: (0, 0))],
        out_specs=pl.BlockSpec((rows, d), lambda g, h: (g, 0)),
        compiler_params=pltpu.CompilerParams(
            dimension_semantics=("parallel", "arbitrary"),
            vmem_limit_bytes=VMEM_LIMIT),
    )(qk2, v2, wq, wk, wv, wo, bq, bk, bv, bo)
    return out.reshape(Gp, Lp, d)[:G, :L]


# ------------------------------ model glue ----------------------------------

def encoder_layer(src, pos, lp, layer_index, cfg, Tp1, Sp1, B):
    d = cfg["d_model"]
    nhead = cfg["nhead"]
    # q = k = src (+pos at layer 0 / layer-wise), v = src (mirrors forward_pre rule)
    use_pos = (layer_index == 0) or cfg["pos_layer_wise"]
    qk = src + pos if use_pos else src
    v = src

    x4_q = qk.reshape(Tp1, Sp1, B, d)
    x4_v = v.reshape(Tp1, Sp1, B, d)

    # TODO(synk): MultiHeadSplitAttentionDualToken source is not provided; it is
    # approximated as the sum of an independent spatial MHA (attend over S+1 per
    # time step) and temporal MHA (attend over T+1 per spatial location), each
    # with its own projection weights.
    # spatial attention: groups over (T+1, B), sequence length S+1
    qs = x4_q.transpose(0, 2, 1, 3).reshape(Tp1 * B, Sp1, d)
    vs = x4_v.transpose(0, 2, 1, 3).reshape(Tp1 * B, Sp1, d)
    ys = mha(qs, vs, lp["spatial"], nhead)
    ys = ys.reshape(Tp1, B, Sp1, d).transpose(0, 2, 1, 3)

    # temporal attention: groups over (S+1, B), sequence length T+1
    qt = x4_q.transpose(1, 2, 0, 3).reshape(Sp1 * B, Tp1, d)
    vt = x4_v.transpose(1, 2, 0, 3).reshape(Sp1 * B, Tp1, d)
    yt = mha(qt, vt, lp["temporal"], nhead)
    yt = yt.reshape(Sp1, B, Tp1, d).transpose(2, 0, 1, 3)

    N = Tp1 * Sp1 * B
    out = encoder_tail(src.reshape(N, d), ys.reshape(N, d), yt.reshape(N, d), lp)
    return out.reshape(Tp1 * Sp1, B, d)


def vidtr_forward(x, params, cfg):
    """x: (B, Cin, T, H, W) float32 (PyTorch NCDHW convention)."""
    B, Cin, T, H, W = x.shape
    _, ph, pw = cfg["patch"]
    d = cfg["d_model"]
    Hp, Wp = H // ph, W // pw
    S = Hp * Wp

    # --- conv stem as a patch matmul (stride == kernel) ---
    xp = x.reshape(B, Cin, T, Hp, ph, Wp, pw)
    xp = xp.transpose(0, 2, 3, 5, 1, 4, 6)                 # (B,T,Hp,Wp,Cin,ph,pw)
    xp = xp.reshape(B * T * S, Cin * ph * pw)
    emb = linear(xp, params["conv_w"], params["conv_b"])   # (B*T*S, d)

    # --- token assembly: src.flatten(3).permute(2,3,0,1), cls tokens ---
    src = emb.reshape(B, T, S, d).transpose(1, 2, 0, 3)    # (T, S, B, d)
    cls_t = jnp.broadcast_to(params["cls_t"][:, :, None, :], (1, S + 1, B, d))
    cls_s = jnp.broadcast_to(params["cls_s"][:, :, None, :], (T, 1, B, d))
    src = jnp.concatenate([cls_s, src], axis=1)            # (T, S+1, B, d)
    src = jnp.concatenate([cls_t, src], axis=0)            # (T+1, S+1, B, d)
    L = (T + 1) * (S + 1)
    src = src.reshape(L, B, d)

    pos = jnp.broadcast_to(
        params["pos_embedding"].transpose(1, 0, 2), (L, B, d))

    # --- transformer encoder ---
    for li, lp in enumerate(params["layers"]):
        src = encoder_layer(src, pos, lp, li, cfg, T + 1, S + 1, B)

    # --- head: token [0, 0], dropout (identity), fc ---
    out = src.reshape(T + 1, S + 1, B, d)[0, 0]            # (B, d)
    out = linear(out, params["fc_w"], params["fc_b"])      # (B, activity_num)
    return out


def init_params(key, cfg, in_ch):
    d = cfg["d_model"]
    ff = cfg["dim_ff"]
    T = cfg["temporal_size"]
    _, ph, pw = cfg["patch"]
    S = cfg["n_spatial"]
    keys = iter(jax.random.split(key, 64))

    def w(shape, scale=0.05):
        return (scale * jax.random.normal(next(keys), shape)).astype(F32)

    params = {
        "conv_w": w((in_ch * ph * pw, d)),
        "conv_b": jnp.zeros((d,), F32),
        "cls_s": w((T, 1, d)),
        "cls_t": w((1, S + 1, d)),
        "pos_embedding": w((1, (T + 1) * (S + 1), d)),
        "fc_w": w((d, cfg["activity_num"])),
        "fc_b": jnp.zeros((cfg["activity_num"],), F32),
        "layers": [],
    }

    def attn_p():
        return {"wq": w((d, d)), "wk": w((d, d)),
                "wv": w((d, d)), "wo": w((d, d)),
                "bq": jnp.zeros((d,), F32), "bk": jnp.zeros((d,), F32),
                "bv": jnp.zeros((d,), F32), "bo": jnp.zeros((d,), F32)}

    for _ in range(cfg["num_layers"]):
        lp = {"spatial": attn_p(), "temporal": attn_p(),
              "ln1_g": jnp.ones((d,), F32), "ln1_b": jnp.zeros((d,), F32),
              "ln2_g": jnp.ones((d,), F32), "ln2_b": jnp.zeros((d,), F32),
              "ffn_w1": w((d, ff)), "ffn_b1": jnp.zeros((ff,), F32),
              "ffn_w2": w((ff, d)), "ffn_b2": jnp.zeros((d,), F32)}
        params["layers"].append(lp)
    return params


if __name__ == "__main__":
    # Small-shape config consistent with VidTr's forward structure.
    B, Cin, T, H, W = 2, 3, 4, 8, 8
    cfg = {
        "d_model": 128,       # lane-dense channel dim (multiple of 128)
        "nhead": 4,
        "num_layers": 2,
        "dim_ff": 256,
        "patch": (1, 4, 4),
        "activity_num": 10,
        "temporal_size": T,
    }
    cfg["pos_layer_wise"] = (cfg["temporal_size"] == 16)   # as in VidTr.__init__
    cfg["n_spatial"] = (H // cfg["patch"][1]) * (W // cfg["patch"][2])

    key = jax.random.PRNGKey(0)
    kx, kp = jax.random.split(key)
    x = jax.random.normal(kx, (B, Cin, T, H, W), dtype=F32)
    params = init_params(kp, cfg, Cin)

    fwd = jax.jit(functools.partial(vidtr_forward, cfg=cfg))
    out = fwd(x, params)
    out = jax.block_until_ready(out)
    assert out.shape == (B, cfg["activity_num"])
    assert bool(jnp.all(jnp.isfinite(out)))
    print("KERNEL_OK")
</pallas_src>

<mosaic_0001>
module attributes {stable_mosaic.version = 11 : i64} {
  func.func @_linear_kernel(%arg0: i32, %arg1: memref<32x128xbf16, #tpu.memory_space<vmem>>, %arg2: memref<128x128xbf16, #tpu.memory_space<vmem>>, %arg3: memref<1x128xf32, #tpu.memory_space<vmem>>, %arg4: memref<32x128xf32, #tpu.memory_space<vmem>>) attributes {dimension_semantics = [#tpu.dimension_semantics<parallel>], iteration_bounds = array<i64: 1>, scalar_prefetch = 0 : i64, scratch_operands = 0 : i64, tpu.core_type = #tpu.core_type<tc>, window_params = [{transform_indices = @transform_0, window_bounds = array<i64: 32, 128>}, {pipeline_mode = #tpu.pipeline_mode<synchronous>, transform_indices = @transform_1, window_bounds = array<i64: 128, 128>}, {pipeline_mode = #tpu.pipeline_mode<synchronous>, transform_indices = @transform_2, window_bounds = array<i64: 1, 128>}, {transform_indices = @transform_3, window_bounds = array<i64: 32, 128>}]} {
    %c0 = arith.constant 0 : index
    %c0_0 = arith.constant 0 : index
    %0 = vector.load %arg1[%c0, %c0_0] : memref<32x128xbf16, #tpu.memory_space<vmem>>, vector<32x128xbf16>
    %c0_1 = arith.constant 0 : index
    %c0_2 = arith.constant 0 : index
    %1 = vector.load %arg2[%c0_1, %c0_2] : memref<128x128xbf16, #tpu.memory_space<vmem>>, vector<128x128xbf16>
    %cst = arith.constant dense<0.000000e+00> : vector<32x128xf32>
    %2 = tpu.matmul %0, %1, %cst {dimension_numbers = #tpu.dot_dimension_numbers<[1], [0], [0], [1], [0, 0, 1, 1], [], []>} : vector<32x128xbf16>, vector<128x128xbf16>, vector<32x128xf32> -> vector<32x128xf32>
    %c0_3 = arith.constant 0 : index
    %c0_4 = arith.constant 0 : index
    %3 = vector.load %arg3[%c0_3, %c0_4] : memref<1x128xf32, #tpu.memory_space<vmem>>, vector<1x128xf32>
    %4 = vector.broadcast %3 : vector<1x128xf32> to vector<32x128xf32>
    %5 = arith.addf %2, %4 : vector<32x128xf32>
    %c0_5 = arith.constant 0 : index
    %c0_6 = arith.constant 0 : index
    %6 = vector.load %arg4[%c0_5, %c0_6] : memref<32x128xf32, #tpu.memory_space<vmem>>, vector<32x128xf32>
    tpu.vector_store %arg4[%c0_5, %c0_6], %5 {strides = array<i32>} : memref<32x128xf32, #tpu.memory_space<vmem>>, vector<32x128xf32>,
    return
  }
  func.func @transform_0(%arg0: i32) -> (i32, i32) {
    %c0_i32 = arith.constant 0 : i32
    %c0_i32_0 = arith.constant 0 : i32
    return %arg0, %c0_i32 : i32, i32
  }
  func.func @transform_1(%arg0: i32) -> (i32, i32) {
    %c0_i32 = arith.constant 0 : i32
    %c0_i32_0 = arith.constant 0 : i32
    %c0_i32_1 = arith.constant 0 : i32
    return %c0_i32, %c0_i32_0 : i32, i32
  }
  func.func @transform_2(%arg0: i32) -> (i32, i32) {
    %c0_i32 = arith.constant 0 : i32
    %c0_i32_0 = arith.constant 0 : i32
    %c0_i32_1 = arith.constant 0 : i32
    return %c0_i32, %c0_i32_0 : i32, i32
  }
  func.func @transform_3(%arg0: i32) -> (i32, i32) {
    %c0_i32 = arith.constant 0 : i32
    %c0_i32_0 = arith.constant 0 : i32
    return %arg0, %c0_i32 : i32, i32
  }
}

module attributes {stable_mosaic.version = 11 : i64} {
  func.func @kernel(%arg0: i32, %arg1: i32, %arg2: memref<160x128xbf16, #tpu.memory_space<vmem>>, %arg3: memref<160x128xbf16, #tpu.memory_space<vmem>>, %arg4: memref<1x128x32xbf16, #tpu.memory_space<vmem>>, %arg5: memref<1x128x32xbf16, #tpu.memory_space<vmem>>, %arg6: memref<1x128x32xbf16, #tpu.memory_space<vmem>>, %arg7: memref<1x32x128xbf16, #tpu.memory_space<vmem>>, %arg8: memref<1x1x32xf32, #tpu.memory_space<vmem>>, %arg9: memref<1x1x32xf32, #tpu.memory_space<vmem>>, %arg10: memref<1x1x32xf32, #tpu.memory_space<vmem>>, %arg11: memref<1x128xf32, #tpu.memory_space<vmem>>, %arg12: memref<160x128xf32, #tpu.memory_space<vmem>>) attributes {dimension_semantics = [#tpu.dimension_semantics<parallel>, #tpu.dimension_semantics<arbitrary>], iteration_bounds = array<i64: 1, 4>, scalar_prefetch = 0 : i64, scratch_operands = 0 : i64, tpu.core_type = #tpu.core_type<tc>, window_params = [{transform_indices = @transform_0, window_bounds = array<i64: 160, 128>}, {transform_indices = @transform_1, window_bounds = array<i64: 160, 128>}, {transform_indices = @transform_2, window_bounds = array<i64: 1, 128, 32>}, {transform_indices = @transform_3, window_bounds = array<i64: 1, 128, 32>}, {transform_indices = @transform_4, window_bounds = array<i64: 1, 128, 32>}, {transform_indices = @transform_5, window_bounds = array<i64: 1, 32, 128>}, {transform_indices = @transform_6, window_bounds = array<i64: 1, 1, 32>}, {transform_indices = @transform_7, window_bounds = array<i64: 1, 1, 32>}, {transform_indices = @transform_8, window_bounds = array<i64: 1, 1, 32>}, {pipeline_mode = #tpu.pipeline_mode<synchronous>, transform_indices = @transform_9, window_bounds = array<i64: 1, 128>}, {transform_indices = @transform_10, window_bounds = array<i64: 160, 128>}]} {
    %c0 = arith.constant 0 : index
    %c0_0 = arith.constant 0 : index
    %0 = vector.load %arg2[%c0, %c0_0] : memref<160x128xbf16, #tpu.memory_space<vmem>>, vector<160x128xbf16>
    %c0_1 = arith.constant 0 : index
    %c0_2 = arith.constant 0 : index
    %1 = vector.load %arg3[%c0_1, %c0_2] : memref<160x128xbf16, #tpu.memory_space<vmem>>, vector<160x128xbf16>
    %c0_3 = arith.constant 0 : index
    %c0_4 = arith.constant 0 : index
    %c0_5 = arith.constant 0 : index
    %2 = vector.load %arg4[%c0_3, %c0_4, %c0_5] : memref<1x128x32xbf16, #tpu.memory_space<vmem>>, vector<1x128x32xbf16>
    %3 = vector.shape_cast %2 : vector<1x128x32xbf16> to vector<128x32xbf16>
    %cst = arith.constant dense<0.000000e+00> : vector<160x32xf32>
    %4 = tpu.matmul %0, %3, %cst {dimension_numbers = #tpu.dot_dimension_numbers<[1], [0], [0], [1], [0, 0, 1, 1], [], []>} : vector<160x128xbf16>, vector<128x32xbf16>, vector<160x32xf32> -> vector<160x32xf32>
    %c0_6 = arith.constant 0 : index
    %c0_7 = arith.constant 0 : index
    %c0_8 = arith.constant 0 : index
    %5 = vector.load %arg8[%c0_6, %c0_7, %c0_8] : memref<1x1x32xf32, #tpu.memory_space<vmem>>, vector<1x1x32xf32>
    %6 = vector.shape_cast %5 : vector<1x1x32xf32> to vector<1x32xf32>
    %7 = vector.broadcast %6 : vector<1x32xf32> to vector<160x32xf32>
    %8 = arith.addf %4, %7 : vector<160x32xf32>
    %c0_9 = arith.constant 0 : index
    %c0_10 = arith.constant 0 : index
    %c0_11 = arith.constant 0 : index
    %9 = vector.load %arg5[%c0_9, %c0_10, %c0_11] : memref<1x128x32xbf16, #tpu.memory_space<vmem>>, vector<1x128x32xbf16>
    %10 = vector.shape_cast %9 : vector<1x128x32xbf16> to vector<128x32xbf16>
    %cst_12 = arith.constant dense<0.000000e+00> : vector<160x32xf32>
    %11 = tpu.matmul %0, %10, %cst_12 {dimension_numbers = #tpu.dot_dimension_numbers<[1], [0], [0], [1], [0, 0, 1, 1], [], []>} : vector<160x128xbf16>, vector<128x32xbf16>, vector<160x32xf32> -> vector<160x32xf32>
    %c0_13 = arith.constant 0 : index
    %c0_14 = arith.constant 0 : index
    %c0_15 = arith.constant 0 : index
    %12 = vector.load %arg9[%c0_13, %c0_14, %c0_15] : memref<1x1x32xf32, #tpu.memory_space<vmem>>, vector<1x1x32xf32>
    %13 = vector.shape_cast %12 : vector<1x1x32xf32> to vector<1x32xf32>
    %14 = vector.broadcast %13 : vector<1x32xf32> to vector<160x32xf32>
    %15 = arith.addf %11, %14 : vector<160x32xf32>
    %c0_16 = arith.constant 0 : index
    %c0_17 = arith.constant 0 : index
    %c0_18 = arith.constant 0 : index
    %16 = vector.load %arg6[%c0_16, %c0_17, %c0_18] : memref<1x128x32xbf16, #tpu.memory_space<vmem>>, vector<1x128x32xbf16>
    %17 = vector.shape_cast %16 : vector<1x128x32xbf16> to vector<128x32xbf16>
    %cst_19 = arith.constant dense<0.000000e+00> : vector<160x32xf32>
    %18 = tpu.matmul %1, %17, %cst_19 {dimension_numbers = #tpu.dot_dimension_numbers<[1], [0], [0], [1], [0, 0, 1, 1], [], []>} : vector<160x128xbf16>, vector<128x32xbf16>, vector<160x32xf32> -> vector<160x32xf32>
    %c0_20 = arith.constant 0 : index
    %c0_21 = arith.constant 0 : index
    %c0_22 = arith.constant 0 : index
    %19 = vector.load %arg10[%c0_20, %c0_21, %c0_22] : memref<1x1x32xf32, #tpu.memory_space<vmem>>, vector<1x1x32xf32>
    %20 = vector.shape_cast %19 : vector<1x1x32xf32> to vector<1x32xf32>
    %21 = vector.broadcast %20 : vector<1x32xf32> to vector<160x32xf32>
    %22 = arith.addf %18, %21 : vector<160x32xf32>
    %cst_23 = arith.constant 0.176776692 : f32
    %23 = vector.broadcast %cst_23 : f32 to vector<160x32xf32>
    %24 = arith.mulf %8, %23 : vector<160x32xf32>
    %25 = vector.shape_cast %24 : vector<160x32xf32> to vector<10x16x32xf32>
    %26 = arith.truncf %25 : vector<10x16x32xf32> to vector<10x16x32xbf16>
    %27 = vector.shape_cast %15 : vector<160x32xf32> to vector<10x16x32xf32>
    %28 = arith.truncf %27 : vector<10x16x32xf32> to vector<10x16x32xbf16>
    %29 = vector.shape_cast %22 : vector<160x32xf32> to vector<10x16x32xf32>
    %30 = arith.truncf %29 : vector<10x16x32xf32> to vector<10x16x32xbf16>
    "tpu.trace_start"() <{level = 10 : i32, message = "gld,gmd->glm"}> : () -> ()
    %cst_24 = arith.constant dense<0.000000e+00> : vector<10x16x16xf32>
    %31 = tpu.matmul %26, %28, %cst_24 {dimension_numbers = #tpu.dot_dimension_numbers<[2], [2], [1], [1], [0, 0, 0, 1, 1, 1], [0], [0]>} : vector<10x16x32xbf16>, vector<10x16x32xbf16>, vector<10x16x16xf32> -> vector<10x16x16xf32>
    "tpu.trace_stop"() : () -> ()
    %32 = tpu.iota {dimensions = array<i32: 2>} : vector<10x16x16xi32>
    %c5_i32 = arith.constant 5 : i32
    %33 = vector.broadcast %c5_i32 : i32 to vector<10x16x16xi32>
    %34 = arith.cmpi slt, %32, %33 : vector<10x16x16xi32>
    %cst_25 = arith.constant -1.000000e+30 : f32
    %35 = vector.broadcast %cst_25 : f32 to vector<10x16x16xf32>
    %36 = arith.select %34, %31, %35 : vector<10x16x16xi1>, vector<10x16x16xf32>
    %cst_26 = arith.constant dense<0xFF800000> : vector<10x16xf32>
    %37 = vector.multi_reduction <maximumf>, %36, %cst_26 [2] : vector<10x16x16xf32> to vector<10x16xf32>
    %38 = vector.shape_cast %37 : vector<10x16xf32> to vector<10x16x1xf32>
    %39 = vector.broadcast %38 : vector<10x16x1xf32> to vector<10x16x16xf32>
    %40 = arith.subf %36, %39 : vector<10x16x16xf32>
    %41 = math.exp %40 : vector<10x16x16xf32>
    %cst_27 = arith.constant dense<0.000000e+00> : vector<10x16xf32>
    %42 = vector.multi_reduction <add>, %41, %cst_27 [2] : vector<10x16x16xf32> to vector<10x16xf32>
    %43 = vector.shape_cast %42 : vector<10x16xf32> to vector<10x16x1xf32>
    %44 = tpu.reciprocal %43 {approx = true} : vector<10x16x1xf32> -> vector<10x16x1xf32>
    %45 = vector.broadcast %44 : vector<10x16x1xf32> to vector<10x16x16xf32>
    %46 = arith.mulf %41, %45 : vector<10x16x16xf32>
    %47 = arith.truncf %46 : vector<10x16x16xf32> to vector<10x16x16xbf16>
    "tpu.trace_start"() <{level = 10 : i32, message = "glm,gmd->gld"}> : () -> ()
    %cst_28 = arith.constant dense<0.000000e+00> : vector<10x16x32xf32>
    %48 = tpu.matmul %47, %30, %cst_28 {dimension_numbers = #tpu.dot_dimension_numbers<[2], [1], [1], [2], [0, 0, 0, 1, 1, 2], [0], [0]>} : vector<10x16x16xbf16>, vector<10x16x32xbf16>, vector<10x16x32xf32> -> vector<10x16x32xf32>
    "tpu.trace_stop"() : () -> ()
    %49 = vector.shape_cast %48 : vector<10x16x32xf32> to vector<160x32xf32>
    %50 = arith.truncf %49 : vector<160x32xf32> to vector<160x32xbf16>
    %c0_29 = arith.constant 0 : index
    %c0_30 = arith.constant 0 : index
    %c0_31 = arith.constant 0 : index
    %51 = vector.load %arg7[%c0_29, %c0_30, %c0_31] : memref<1x32x128xbf16, #tpu.memory_space<vmem>>, vector<1x32x128xbf16>
    %52 = vector.shape_cast %51 : vector<1x32x128xbf16> to vector<32x128xbf16>
    %cst_32 = arith.constant dense<0.000000e+00> : vector<160x128xf32>
    %53 = tpu.matmul %50, %52, %cst_32 {dimension_numbers = #tpu.dot_dimension_numbers<[1], [0], [0], [1], [0, 0, 1, 1], [], []>} : vector<160x32xbf16>, vector<32x128xbf16>, vector<160x128xf32> -> vector<160x128xf32>
    %c0_i32 = arith.constant 0 : i32
    %54 = arith.cmpi eq, %arg1, %c0_i32 : i32
    %55 = arith.extui %54 : i1 to i32
    %c0_i32_33 = arith.constant 0 : i32
    %56 = arith.cmpi ne, %55, %c0_i32_33 : i32
    scf.if %56 {
      %c0_36 = arith.constant 0 : index
      %c0_37 = arith.constant 0 : index
      %60 = vector.load %arg11[%c0_36, %c0_37] : memref<1x128xf32, #tpu.memory_space<vmem>>, vector<1x128xf32>
      %61 = vector.broadcast %60 : vector<1x128xf32> to vector<160x128xf32>
      %62 = arith.addf %53, %61 : vector<160x128xf32>
      %c0_38 = arith.constant 0 : index
      %c0_39 = arith.constant 0 : index
      %63 = vector.load %arg12[%c0_38, %c0_39] : memref<160x128xf32, #tpu.memory_space<vmem>>, vector<160x128xf32>
      tpu.vector_store %arg12[%c0_38, %c0_39], %62 {strides = array<i32>} : memref<160x128xf32, #tpu.memory_space<vmem>>, vector<160x128xf32>,
    } else {
    }
    %c0_i32_34 = arith.constant 0 : i32
    %57 = arith.cmpi sgt, %arg1, %c0_i32_34 : i32
    %58 = arith.extui %57 : i1 to i32
    %c0_i32_35 = arith.constant 0 : i32
    %59 = arith.cmpi ne, %58, %c0_i32_35 : i32
    scf.if %59 {
      %c0_36 = arith.constant 0 : index
      %c0_37 = arith.constant 0 : index
      %60 = vector.load %arg12[%c0_36, %c0_37] : memref<160x128xf32, #tpu.memory_space<vmem>>, vector<160x128xf32>
      %61 = arith.addf %60, %53 : vector<160x128xf32>
      %c0_38 = arith.constant 0 : index
      %c0_39 = arith.constant 0 : index
      %62 = vector.load %arg12[%c0_38, %c0_39] : memref<160x128xf32, #tpu.memory_space<vmem>>, vector<160x128xf32>
      tpu.vector_store %arg12[%c0_38, %c0_39], %61 {strides = array<i32>} : memref<160x128xf32, #tpu.memory_space<vmem>>, vector<160x128xf32>,
    } else {
    }
    return
  }
  func.func @transform_0(%arg0: i32, %arg1: i32) -> (i32, i32) {
    %c0_i32 = arith.constant 0 : i32
    %c0_i32_0 = arith.constant 0 : i32
    return %arg0, %c0_i32 : i32, i32
  }
  func.func @transform_1(%arg0: i32, %arg1: i32) -> (i32, i32) {
    %c0_i32 = arith.constant 0 : i32
    %c0_i32_0 = arith.constant 0 : i32
    return %arg0, %c0_i32 : i32, i32
  }
  func.func @transform_2(%arg0: i32, %arg1: i32) -> (i32, i32, i32) {
    %c0_i32 = arith.constant 0 : i32
    %c0_i32_0 = arith.constant 0 : i32
    %c0_i32_1 = arith.constant 0 : i32
    return %arg1, %c0_i32, %c0_i32_0 : i32, i32, i32
  }
  func.func @transform_3(%arg0: i32, %arg1: i32) -> (i32, i32, i32) {
    %c0_i32 = arith.constant 0 : i32
    %c0_i32_0 = arith.constant 0 : i32
    %c0_i32_1 = arith.constant 0 : i32
    return %arg1, %c0_i32, %c0_i32_0 : i32, i32, i32
  }
  func.func @transform_4(%arg0: i32, %arg1: i32) -> (i32, i32, i32) {
    %c0_i32 = arith.constant 0 : i32
    %c0_i32_0 = arith.constant 0 : i32
    %c0_i32_1 = arith.constant 0 : i32
    return %arg1, %c0_i32, %c0_i32_0 : i32, i32, i32
  }
  func.func @transform_5(%arg0: i32, %arg1: i32) -> (i32, i32, i32) {
    %c0_i32 = arith.constant 0 : i32
    %c0_i32_0 = arith.constant 0 : i32
    %c0_i32_1 = arith.constant 0 : i32
    return %arg1, %c0_i32, %c0_i32_0 : i32, i32, i32
  }
  func.func @transform_6(%arg0: i32, %arg1: i32) -> (i32, i32, i32) {
    %c0_i32 = arith.constant 0 : i32
    %c0_i32_0 = arith.constant 0 : i32
    %c0_i32_1 = arith.constant 0 : i32
    return %arg1, %c0_i32, %c0_i32_0 : i32, i32, i32
  }
  func.func @transform_7(%arg0: i32, %arg1: i32) -> (i32, i32, i32) {
    %c0_i32 = arith.constant 0 : i32
    %c0_i32_0 = arith.constant 0 : i32
    %c0_i32_1 = arith.constant 0 : i32
    return %arg1, %c0_i32, %c0_i32_0 : i32, i32, i32
  }
  func.func @transform_8(%arg0: i32, %arg1: i32) -> (i32, i32, i32) {
    %c0_i32 = arith.constant 0 : i32
    %c0_i32_0 = arith.constant 0 : i32
    %c0_i32_1 = arith.constant 0 : i32
    return %arg1, %c0_i32, %c0_i32_0 : i32, i32, i32
  }
  func.func @transform_9(%arg0: i32, %arg1: i32) -> (i32, i32) {
    %c0_i32 = arith.constant 0 : i32
    %c0_i32_0 = arith.constant 0 : i32
    %c0_i32_1 = arith.constant 0 : i32
    return %c0_i32, %c0_i32_0 : i32, i32
  }
  func.func @transform_10(%arg0: i32, %arg1: i32) -> (i32, i32) {
    %c0_i32 = arith.constant 0 : i32
    %c0_i32_0 = arith.constant 0 : i32
    return %arg0, %c0_i32 : i32, i32
  }
}

module attributes {stable_mosaic.version = 11 : i64} {
  func.func @_encoder_tail_kernel(%arg0: i32, %arg1: memref<56x128xf32, #tpu.memory_space<vmem>>, %arg2: memref<56x128xf32, #tpu.memory_space<vmem>>, %arg3: memref<56x128xf32, #tpu.memory_space<vmem>>, %arg4: memref<1x128xf32, #tpu.memory_space<vmem>>, %arg5: memref<1x128xf32, #tpu.memory_space<vmem>>, %arg6: memref<128x256xbf16, #tpu.memory_space<vmem>>, %arg7: memref<1x256xf32, #tpu.memory_space<vmem>>, %arg8: memref<256x128xbf16, #tpu.memory_space<vmem>>, %arg9: memref<1x128xf32, #tpu.memory_space<vmem>>, %arg10: memref<1x128xf32, #tpu.memory_space<vmem>>, %arg11: memref<1x128xf32, #tpu.memory_space<vmem>>, %arg12: memref<56x128xf32, #tpu.memory_space<vmem>>) attributes {dimension_semantics = [#tpu.dimension_semantics<parallel>], iteration_bounds = array<i64: 1>, scalar_prefetch = 0 : i64, scratch_operands = 0 : i64, tpu.core_type = #tpu.core_type<tc>, window_params = [{transform_indices = @transform_0, window_bounds = array<i64: 56, 128>}, {transform_indices = @transform_1, window_bounds = array<i64: 56, 128>}, {transform_indices = @transform_2, window_bounds = array<i64: 56, 128>}, {pipeline_mode = #tpu.pipeline_mode<synchronous>, transform_indices = @transform_3, window_bounds = array<i64: 1, 128>}, {pipeline_mode = #tpu.pipeline_mode<synchronous>, transform_indices = @transform_4, window_bounds = array<i64: 1, 128>}, {pipeline_mode = #tpu.pipeline_mode<synchronous>, transform_indices = @transform_5, window_bounds = array<i64: 128, 256>}, {pipeline_mode = #tpu.pipeline_mode<synchronous>, transform_indices = @transform_6, window_bounds = array<i64: 1, 256>}, {pipeline_mode = #tpu.pipeline_mode<synchronous>, transform_indices = @transform_7, window_bounds = array<i64: 256, 128>}, {pipeline_mode = #tpu.pipeline_mode<synchronous>, transform_indices = @transform_8, window_bounds = array<i64: 1, 128>}, {pipeline_mode = #tpu.pipeline_mode<synchronous>, transform_indices = @transform_9, window_bounds = array<i64: 1, 128>}, {pipeline_mode = #tpu.pipeline_mode<synchronous>, transform_indices = @transform_10, window_bounds = array<i64: 1, 128>}, {transform_indices = @transform_11, window_bounds = array<i64: 56, 128>}]} {
    %c0 = arith.constant 0 : index
    %c0_0 = arith.constant 0 : index
    %0 = vector.load %arg1[%c0, %c0_0] : memref<56x128xf32, #tpu.memory_space<vmem>>, vector<56x128xf32>
    %c0_1 = arith.constant 0 : index
    %c0_2 = arith.constant 0 : index
    %1 = vector.load %arg2[%c0_1, %c0_2] : memref<56x128xf32, #tpu.memory_space<vmem>>, vector<56x128xf32>
    %2 = arith.addf %0, %1 : vector<56x128xf32>
    %c0_3 = arith.constant 0 : index
    %c0_4 = arith.constant 0 : index
    %3 = vector.load %arg3[%c0_3, %c0_4] : memref<56x128xf32, #tpu.memory_space<vmem>>, vector<56x128xf32>
    %4 = arith.addf %2, %3 : vector<56x128xf32>
    %c0_5 = arith.constant 0 : index
    %c0_6 = arith.constant 0 : index
    %5 = vector.load %arg4[%c0_5, %c0_6] : memref<1x128xf32, #tpu.memory_space<vmem>>, vector<1x128xf32>
    %c0_7 = arith.constant 0 : index
    %c0_8 = arith.constant 0 : index
    %6 = vector.load %arg5[%c0_7, %c0_8] : memref<1x128xf32, #tpu.memory_space<vmem>>, vector<1x128xf32>
    %cst = arith.constant dense<0.000000e+00> : vector<56xf32>
    %7 = vector.multi_reduction <add>, %4, %cst [1] : vector<56x128xf32> to vector<56xf32>
    %8 = vector.shape_cast %7 : vector<56xf32> to vector<56x1xf32>
    %cst_9 = arith.constant 1.280000e+02 : f32
    %9 = vector.broadcast %cst_9 : f32 to vector<56x1xf32>
    %10 = arith.divf %8, %9 : vector<56x1xf32>
    %11 = vector.broadcast %10 : vector<56x1xf32> to vector<56x128xf32>
    %12 = arith.subf %4, %11 : vector<56x128xf32>
    %13 = arith.mulf %12, %12 : vector<56x128xf32>
    %cst_10 = arith.constant dense<0.000000e+00> : vector<56xf32>
    %14 = vector.multi_reduction <add>, %13, %cst_10 [1] : vector<56x128xf32> to vector<56xf32>
    %15 = vector.shape_cast %14 : vector<56xf32> to vector<56x1xf32>
    %cst_11 = arith.constant 1.280000e+02 : f32
    %16 = vector.broadcast %cst_11 : f32 to vector<56x1xf32>
    %17 = arith.divf %15, %16 : vector<56x1xf32>
    %18 = vector.broadcast %10 : vector<56x1xf32> to vector<56x128xf32>
    %19 = arith.subf %4, %18 : vector<56x128xf32>
    %cst_12 = arith.constant 9.99999974E-6 : f32
    %20 = vector.broadcast %cst_12 : f32 to vector<56x1xf32>
    %21 = arith.addf %17, %20 : vector<56x1xf32>
    %22 = math.rsqrt %21 : vector<56x1xf32>
    %23 = vector.broadcast %22 : vector<56x1xf32> to vector<56x128xf32>
    %24 = arith.mulf %19, %23 : vector<56x128xf32>
    %25 = vector.broadcast %5 : vector<1x128xf32> to vector<56x128xf32>
    %26 = arith.mulf %24, %25 : vector<56x128xf32>
    %27 = vector.broadcast %6 : vector<1x128xf32> to vector<56x128xf32>
    %28 = arith.addf %26, %27 : vector<56x128xf32>
    %29 = arith.truncf %28 : vector<56x128xf32> to vector<56x128xbf16>
    %c0_13 = arith.constant 0 : index
    %c0_14 = arith.constant 0 : index
    %30 = vector.load %arg6[%c0_13, %c0_14] : memref<128x256xbf16, #tpu.memory_space<vmem>>, vector<128x256xbf16>
    %cst_15 = arith.constant dense<0.000000e+00> : vector<56x256xf32>
    %31 = tpu.matmul %29, %30, %cst_15 {dimension_numbers = #tpu.dot_dimension_numbers<[1], [0], [0], [1], [0, 0, 1, 1], [], []>} : vector<56x128xbf16>, vector<128x256xbf16>, vector<56x256xf32> -> vector<56x256xf32>
    %c0_16 = arith.constant 0 : index
    %c0_17 = arith.constant 0 : index
    %32 = vector.load %arg7[%c0_16, %c0_17] : memref<1x256xf32, #tpu.memory_space<vmem>>, vector<1x256xf32>
    %33 = vector.broadcast %32 : vector<1x256xf32> to vector<56x256xf32>
    %34 = arith.addf %31, %33 : vector<56x256xf32>
    %cst_18 = arith.constant 0.000000e+00 : f32
    %35 = vector.broadcast %cst_18 : f32 to vector<56x256xf32>
    %36 = arith.maximumf %34, %35 : vector<56x256xf32>
    %37 = arith.truncf %36 : vector<56x256xf32> to vector<56x256xbf16>
    %c0_19 = arith.constant 0 : index
    %c0_20 = arith.constant 0 : index
    %38 = vector.load %arg8[%c0_19, %c0_20] : memref<256x128xbf16, #tpu.memory_space<vmem>>, vector<256x128xbf16>
    %cst_21 = arith.constant dense<0.000000e+00> : vector<56x128xf32>
    %39 = tpu.matmul %37, %38, %cst_21 {dimension_numbers = #tpu.dot_dimension_numbers<[1], [0], [0], [1], [0, 0, 1, 1], [], []>} : vector<56x256xbf16>, vector<256x128xbf16>, vector<56x128xf32> -> vector<56x128xf32>
    %c0_22 = arith.constant 0 : index
    %c0_23 = arith.constant 0 : index
    %40 = vector.load %arg9[%c0_22, %c0_23] : memref<1x128xf32, #tpu.memory_space<vmem>>, vector<1x128xf32>
    %41 = vector.broadcast %40 : vector<1x128xf32> to vector<56x128xf32>
    %42 = arith.addf %39, %41 : vector<56x128xf32>
    %43 = arith.addf %28, %42 : vector<56x128xf32>
    %c0_24 = arith.constant 0 : index
    %c0_25 = arith.constant 0 : index
    %44 = vector.load %arg10[%c0_24, %c0_25] : memref<1x128xf32, #tpu.memory_space<vmem>>, vector<1x128xf32>
    %c0_26 = arith.constant 0 : index
    %c0_27 = arith.constant 0 : index
    %45 = vector.load %arg11[%c0_26, %c0_27] : memref<1x128xf32, #tpu.memory_space<vmem>>, vector<1x128xf32>
    %cst_28 = arith.constant dense<0.000000e+00> : vector<56xf32>
    %46 = vector.multi_reduction <add>, %43, %cst_28 [1] : vector<56x128xf32> to vector<56xf32>
    %47 = vector.shape_cast %46 : vector<56xf32> to vector<56x1xf32>
    %cst_29 = arith.constant 1.280000e+02 : f32
    %48 = vector.broadcast %cst_29 : f32 to vector<56x1xf32>
    %49 = arith.divf %47, %48 : vector<56x1xf32>
    %50 = vector.broadcast %49 : vector<56x1xf32> to vector<56x128xf32>
    %51 = arith.subf %43, %50 : vector<56x128xf32>
    %52 = arith.mulf %51, %51 : vector<56x128xf32>
    %cst_30 = arith.constant dense<0.000000e+00> : vector<56xf32>
    %53 = vector.multi_reduction <add>, %52, %cst_30 [1] : vector<56x128xf32> to vector<56xf32>
    %54 = vector.shape_cast %53 : vector<56xf32> to vector<56x1xf32>
    %cst_31 = arith.constant 1.280000e+02 : f32
    %55 = vector.broadcast %cst_31 : f32 to vector<56x1xf32>
    %56 = arith.divf %54, %55 : vector<56x1xf32>
    %57 = vector.broadcast %49 : vector<56x1xf32> to vector<56x128xf32>
    %58 = arith.subf %43, %57 : vector<56x128xf32>
    %cst_32 = arith.constant 9.99999974E-6 : f32
    %59 = vector.broadcast %cst_32 : f32 to vector<56x1xf32>
    %60 = arith.addf %56, %59 : vector<56x1xf32>
    %61 = math.rsqrt %60 : vector<56x1xf32>
    %62 = vector.broadcast %61 : vector<56x1xf32> to vector<56x128xf32>
    %63 = arith.mulf %58, %62 : vector<56x128xf32>
    %64 = vector.broadcast %44 : vector<1x128xf32> to vector<56x128xf32>
    %65 = arith.mulf %63, %64 : vector<56x128xf32>
    %66 = vector.broadcast %45 : vector<1x128xf32> to vector<56x128xf32>
    %67 = arith.addf %65, %66 : vector<56x128xf32>
    %c0_33 = arith.constant 0 : index
    %c0_34 = arith.constant 0 : index
    %68 = vector.load %arg12[%c0_33, %c0_34] : memref<56x128xf32, #tpu.memory_space<vmem>>, vector<56x128xf32>
    tpu.vector_store %arg12[%c0_33, %c0_34], %67 {strides = array<i32>} : memref<56x128xf32, #tpu.memory_space<vmem>>, vector<56x128xf32>,
    return
  }
  func.func @transform_0(%arg0: i32) -> (i32, i32) {
    %c0_i32 = arith.constant 0 : i32
    %c0_i32_0 = arith.constant 0 : i32
    return %arg0, %c0_i32 : i32, i32
  }
  func.func @transform_1(%arg0: i32) -> (i32, i32) {
    %c0_i32 = arith.constant 0 : i32
    %c0_i32_0 = arith.constant 0 : i32
    return %arg0, %c0_i32 : i32, i32
  }
  func.func @transform_2(%arg0: i32) -> (i32, i32) {
    %c0_i32 = arith.constant 0 : i32
    %c0_i32_0 = arith.constant 0 : i32
    return %arg0, %c0_i32 : i32, i32
  }
  func.func @transform_3(%arg0: i32) -> (i32, i32) {
    %c0_i32 = arith.constant 0 : i32
    %c0_i32_0 = arith.constant 0 : i32
    %c0_i32_1 = arith.constant 0 : i32
    return %c0_i32, %c0_i32_0 : i32, i32
  }
  func.func @transform_4(%arg0: i32) -> (i32, i32) {
    %c0_i32 = arith.constant 0 : i32
    %c0_i32_0 = arith.constant 0 : i32
    %c0_i32_1 = arith.constant 0 : i32
    return %c0_i32, %c0_i32_0 : i32, i32
  }
  func.func @transform_5(%arg0: i32) -> (i32, i32) {
    %c0_i32 = arith.constant 0 : i32
    %c0_i32_0 = arith.constant 0 : i32
    %c0_i32_1 = arith.constant 0 : i32
    return %c0_i32, %c0_i32_0 : i32, i32
  }
  func.func @transform_6(%arg0: i32) -> (i32, i32) {
    %c0_i32 = arith.constant 0 : i32
    %c0_i32_0 = arith.constant 0 : i32
    %c0_i32_1 = arith.constant 0 : i32
    return %c0_i32, %c0_i32_0 : i32, i32
  }
  func.func @transform_7(%arg0: i32) -> (i32, i32) {
    %c0_i32 = arith.constant 0 : i32
    %c0_i32_0 = arith.constant 0 : i32
    %c0_i32_1 = arith.constant 0 : i32
    return %c0_i32, %c0_i32_0 : i32, i32
  }
  func.func @transform_8(%arg0: i32) -> (i32, i32) {
    %c0_i32 = arith.constant 0 : i32
    %c0_i32_0 = arith.constant 0 : i32
    %c0_i32_1 = arith.constant 0 : i32
    return %c0_i32, %c0_i32_0 : i32, i32
  }
  func.func @transform_9(%arg0: i32) -> (i32, i32) {
    %c0_i32 = arith.constant 0 : i32
    %c0_i32_0 = arith.constant 0 : i32
    %c0_i32_1 = arith.constant 0 : i32
    return %c0_i32, %c0_i32_0 : i32, i32
  }
  func.func @transform_10(%arg0: i32) -> (i32, i32) {
    %c0_i32 = arith.constant 0 : i32
    %c0_i32_0 = arith.constant 0 : i32
    %c0_i32_1 = arith.constant 0 : i32
    return %c0_i32, %c0_i32_0 : i32, i32
  }
  func.func @transform_11(%arg0: i32) -> (i32, i32) {
    %c0_i32 = arith.constant 0 : i32
    %c0_i32_0 = arith.constant 0 : i32
    return %arg0, %c0_i32 : i32, i32
  }
}

module attributes {stable_mosaic.version = 11 : i64} {
  func.func @_linear_kernel(%arg0: i32, %arg1: memref<16x128xbf16, #tpu.memory_space<vmem>>, %arg2: memref<128x10xbf16, #tpu.memory_space<vmem>>, %arg3: memref<1x10xf32, #tpu.memory_space<vmem>>, %arg4: memref<16x10xf32, #tpu.memory_space<vmem>>) attributes {dimension_semantics = [#tpu.dimension_semantics<parallel>], iteration_bounds = array<i64: 1>, scalar_prefetch = 0 : i64, scratch_operands = 0 : i64, tpu.core_type = #tpu.core_type<tc>, window_params = [{transform_indices = @transform_0, window_bounds = array<i64: 16, 128>}, {pipeline_mode = #tpu.pipeline_mode<synchronous>, transform_indices = @transform_1, window_bounds = array<i64: 128, 10>}, {pipeline_mode = #tpu.pipeline_mode<synchronous>, transform_indices = @transform_2, window_bounds = array<i64: 1, 10>}, {transform_indices = @transform_3, window_bounds = array<i64: 16, 10>}]} {
    %c0 = arith.constant 0 : index
    %c0_0 = arith.constant 0 : index
    %0 = vector.load %arg1[%c0, %c0_0] : memref<16x128xbf16, #tpu.memory_space<vmem>>, vector<16x128xbf16>
    %c0_1 = arith.constant 0 : index
    %c0_2 = arith.constant 0 : index
    %1 = vector.load %arg2[%c0_1, %c0_2] : memref<128x10xbf16, #tpu.memory_space<vmem>>, vector<128x10xbf16>
    %cst = arith.constant dense<0.000000e+00> : vector<16x10xf32>
    %2 = tpu.matmul %0, %1, %cst {dimension_numbers = #tpu.dot_dimension_numbers<[1], [0], [0], [1], [0, 0, 1, 1], [], []>} : vector<16x128xbf16>, vector<128x10xbf16>, vector<16x10xf32> -> vector<16x10xf32>
    %c0_3 = arith.constant 0 : index
    %c0_4 = arith.constant 0 : index
    %3 = vector.load %arg3[%c0_3, %c0_4] : memref<1x10xf32, #tpu.memory_space<vmem>>, vector<1x10xf32>
    %4 = vector.broadcast %3 : vector<1x10xf32> to vector<16x10xf32>
    %5 = arith.addf %2, %4 : vector<16x10xf32>
    %c0_5 = arith.constant 0 : index
    %c0_6 = arith.constant 0 : index
    %6 = vector.load %arg4[%c0_5, %c0_6] : memref<16x10xf32, #tpu.memory_space<vmem>>, vector<16x10xf32>
    tpu.vector_store %arg4[%c0_5, %c0_6], %5 {strides = array<i32>} : memref<16x10xf32, #tpu.memory_space<vmem>>, vector<16x10xf32>,
    return
  }
  func.func @transform_0(%arg0: i32) -> (i32, i32) {
    %c0_i32 = arith.constant 0 : i32
    %c0_i32_0 = arith.constant 0 : i32
    return %arg0, %c0_i32 : i32, i32
  }
  func.func @transform_1(%arg0: i32) -> (i32, i32) {
    %c0_i32 = arith.constant 0 : i32
    %c0_i32_0 = arith.constant 0 : i32
    %c0_i32_1 = arith.constant 0 : i32
    return %c0_i32, %c0_i32_0 : i32, i32
  }
  func.func @transform_2(%arg0: i32) -> (i32, i32) {
    %c0_i32 = arith.constant 0 : i32
    %c0_i32_0 = arith.constant 0 : i32
    %c0_i32_1 = arith.constant 0 : i32
    return %c0_i32, %c0_i32_0 : i32, i32
  }
  func.func @transform_3(%arg0: i32) -> (i32, i32) {
    %c0_i32 = arith.constant 0 : i32
    %c0_i32_0 = arith.constant 0 : i32
    return %arg0, %c0_i32 : i32, i32
  }
}

</mosaic_0001>

<bundles_post_ra>
// kernel: vidtr_forward.8
= control target key start
LH: loop header
LB: loop body
LE: loop exit
PB: predicated region body
PF: predicated region fallthrough
CT: control target
= control target key end

     0   :  { %s249_s1 = inlined_call_operand.vmem [shape: bf16[128,128], index: 1, kind: input, shape index: {}]   ;;  %s250_s2 = inlined_call_operand.vmem [shape: f32[1,128], index: 2, kind: input, shape index: {}]   ;;  %s251_s0 = inlined_call_operand.vmem [shape: bf16[32,128], index: 0, kind: input, shape index: {}]   ;;  %s252_s3 = inlined_call_operand.vmem [shape: f32[32,128], index: 3, kind: output, shape index: {}]  }
   0x1   :  { %v174_v0 = vld [vmem:[%s249_s1 + $0x38] sm:$0xff]  ;;  %v173_v1 = vld [vmem:[%s249_s1 + $0x30] sm:$0xff]  ;;  %v172_v2 = vld [vmem:[%s249_s1 + $0x28] sm:$0xff] }
   0x2   :  { %98 = vmatpush.bf16.msra.mxu0 %v174_v0  ;;  %175 = vmatpush.bf16.msra.mxu1 %v174_v0  ;;  %v171_v3 = vld [vmem:[%s249_s1 + $0x20] sm:$0xff]  ;;  %v170_v4 = vld [vmem:[%s249_s1 + $0x18] sm:$0xff]  ;;  %v169_v5 = vld [vmem:[%s249_s1 + $0x10] sm:$0xff] }
   0x3   :  { %v168_v6 = vld [vmem:[%s249_s1 + $0x8] sm:$0xff]  ;;  %v167_v7 = vld [vmem:[%s249_s1] sm:$0xff] }
   0x4   :  { %v165_v8 = vld [vmem:[%s251_s0] sm:$0xff]  ;;  %v166_v9 = vld [vmem:[%s251_s0 + $0x8] sm:$0xff] }
   0x5   :  { %v183_v10 = vld [vmem:[%s250_s2] ss:$0 sm:$0xff] }
   0x6   :  { %99 = vmatpush.bf16.msra.mxu0 %v173_v1  ;;  %176 = vmatpush.bf16.msra.mxu1 %v173_v1 }
   0xa   :  { %100 = vmatpush.bf16.msra.mxu0 %v172_v2  ;;  %177 = vmatpush.bf16.msra.mxu1 %v172_v2 }
   0xe   :  { %101 = vmatpush.bf16.msra.mxu0 %v171_v3  ;;  %178 = vmatpush.bf16.msra.mxu1 %v171_v3 }
  0x12   :  { %102 = vmatpush.bf16.msra.mxu0 %v170_v4  ;;  %179 = vmatpush.bf16.msra.mxu1 %v170_v4 }
  0x16   :  { %103 = vmatpush.bf16.msra.mxu0 %v169_v5  ;;  %180 = vmatpush.bf16.msra.mxu1 %v169_v5 }
  0x1a   :  { %104 = vmatpush.bf16.msra.mxu0 %v168_v6  ;;  %181 = vmatpush.bf16.msra.mxu1 %v168_v6 }
  0x1e   :  { %105 = vmatpush.bf16.msra.mxu0 %v167_v7  ;;  %182 = vmatpush.bf16.msra.mxu1 %v167_v7 }
  0x21   :  { %106 = vmatmul.bf16.vlgmr.msra.gmra.mxu0 %v165_v8  ;;  %111 = vmatmul.bf16.vlgmr.msra.gmra.mxu1 %v166_v9 }
  0x9e   :  { %v107_v11 = vpop.f32.mrf.mxu0  ;;  %v112_v12 = vpop.f32.mrf.mxu1 }
  0x9f   :  { %v108_v13 = vadd.f32 %v183_v10, %v107_v11  ;;  %v113_v14 = vadd.f32 %v183_v10, %v112_v12 }
  0xa1   :  { %117 = vst [vmem:[%s252_s3] sm:$0xff] %v108_v13 }
  0xa2   :  { %119 = vst [vmem:[%s252_s3 + $0x10] sm:$0xff] %v113_v14 }
  0xa6   :  { %v109_v15 = vpop.f32.mrf.mxu0  ;;  %v114_v16 = vpop.f32.mrf.mxu1 }
  0xa7   :  { %v110_v17 = vadd.f32 %v183_v10, %v109_v15  ;;  %v115_v18 = vadd.f32 %v183_v10, %v114_v16 }
  0xa9   :  { %118 = vst [vmem:[%s252_s3 + $0x8] sm:$0xff] %v110_v17 }
  0xaa   :  { %120 = vst [vmem:[%s252_s3 + $0x18] sm:$0xff] %v115_v18 }

// kernel: vidtr_forward.11
= control target key start
LH: loop header
LB: loop body
LE: loop exit
PB: predicated region body
PF: predicated region fallthrough
CT: control target
= control target key end

     0   :  { %v990_v35 = vmov 128.0   ;;  %s1486_s0 = inlined_call_operand.vmem [shape: f32[56,128], index: 0, kind: input, shape index: {}]   ;;  %s1487_s1 = inlined_call_operand.vmem [shape: f32[56,128], index: 1, kind: input, shape index: {}]   ;;  %s1488_s2 = inlined_call_operand.vmem [shape: f32[56,128], index: 2, kind: input, shape index: {}]   ;;  %s1489_s3 = inlined_call_operand.vmem [shape: f32[1,128], index: 3, kind: input, shape index: {}]   ;;  %s1490_s4 = inlined_call_operand.vmem [shape: f32[1,128], index: 4, kind: input, shape index: {}]   ;;  %s1491_s5 = inlined_call_operand.vmem [shape: bf16[128,256], index: 5, kind: input, shape index: {}]   ;;  %s1492_s7 = inlined_call_operand.vmem [shape: bf16[256,128], index: 7, kind: input, shape index: {}]   ;;  %s1493_s8 = inlined_call_operand.vmem [shape: f32[1,128], index: 8, kind: input, shape index: {}]   ;;  %s1494_s6 = inlined_call_operand.vmem [shape: f32[1,256], index: 6, kind: input, shape index: {}]   ;;  %s1495_s9 = inlined_call_operand.vmem [shape: f32[1,128], index: 9, kind: input, shape index: {}]   ;;  %s1496_s10 = inlined_call_operand.vmem [shape: f32[1,128], index: 10, kind: input, shape index: {}]   ;;  %s1497_s11 = inlined_call_operand.vmem [shape: f32[56,128], index: 11, kind: output, shape index: {}]  }
   0x1   :  { %v42_v0 = vld [vmem:[%s1486_s0 + $0x20] sm:$0xff]  ;;  %v40_v8 = vld [vmem:[%s1486_s0 + $0x10] sm:$0xff]  ;;  %v39_v13 = vld [vmem:[%s1486_s0 + $0x8] sm:$0xff]  ;;  %960 = vrcp.f32 %v990_v35 }
   0x2   :  { %v49_v1 = vld [vmem:[%s1487_s1 + $0x20] sm:$0xff]  ;;  %v47_v9 = vld [vmem:[%s1487_s1 + $0x10] sm:$0xff]  ;;  %v46_v14 = vld [vmem:[%s1487_s1 + $0x8] sm:$0xff] }
   0x3   :  { %v63_v2 = vld [vmem:[%s1488_s2 + $0x20] sm:$0xff]  ;;  %v56_v3 = vadd.f32 %v49_v1, %v42_v0  ;;  %v61_v10 = vld [vmem:[%s1488_s2 + $0x10] sm:$0xff]  ;;  %v54_v12 = vadd.f32 %v47_v9, %v40_v8  ;;  %v43_v16 = vld [vmem:[%s1486_s0 + $0x28] sm:$0xff]  ;;  %v53_v22 = vadd.f32 %v46_v14, %v39_v13 }
   0x4   :  { %v38_v4 = vld [vmem:[%s1486_s0] sm:$0xff]  ;;  %v50_v17 = vld [vmem:[%s1487_s1 + $0x28] sm:$0xff]  ;;  %v41_v20 = vld [vmem:[%s1486_s0 + $0x18] sm:$0xff] }
   0x5   :  { %v45_v5 = vld [vmem:[%s1487_s1] sm:$0xff]  ;;  %v70_v11 = vadd.f32 %v63_v2, %v56_v3  ;;  %v68_v18 = vadd.f32 %v61_v10, %v54_v12  ;;  %v57_v19 = vadd.f32 %v50_v17, %v43_v16  ;;  %v48_v21 = vld [vmem:[%s1487_s1 + $0x18] sm:$0xff]  ;;  %v64_v23 = vld [vmem:[%s1488_s2 + $0x28] sm:$0xff] }
   0x6   :  { %v59_v6 = vld [vmem:[%s1488_s2] sm:$0xff]  ;;  %v52_v7 = vadd.f32 %v45_v5, %v38_v4  ;;  %v60_v24 = vld [vmem:[%s1488_s2 + $0x8] sm:$0xff]  ;;  %v55_v25 = vadd.f32 %v48_v21, %v41_v20  ;;  %v62_v26 = vld [vmem:[%s1488_s2 + $0x18] sm:$0xff] }
   0x7   :  { %83 = vadd.xlane.f32.xlu2 %v70_v11  ;;  %79 = vadd.xlane.f32.xlu1 %v68_v18  ;;  %v71_v27 = vadd.f32 %v64_v23, %v57_v19  ;;  %v67_v28 = vadd.f32 %v60_v24, %v53_v22  ;;  %v44_v29 = vld [vmem:[%s1486_s0 + $0x30] sm:$0xff]  ;;  %v961_v36 = vpop.eup %960  ;;  %v854_v10 = vld [vmem:[%s1491_s5 + $0x78] sm:$0xf0]  ;;  %v844_v12 = vld [vmem:[%s1491_s5 + $0x60] sm:$0xf] }
   0x8   :  { %v66_v15 = vadd.f32 %v59_v6, %v52_v7  ;;  %v51_v30 = vld [vmem:[%s1487_s1 + $0x30] sm:$0xff]  ;;  %v69_v31 = vadd.f32 %v62_v26, %v55_v25  ;;  %v90_v37 = vmul.f32 128.0, %v961_v36  ;;  %vm94_vm0 = vweird.f32 %v961_v36  ;;  %v937_v7 = vld [vmem:[%s1491_s5 + $0x74] sm:$0xf0]  ;;  %v935_v13 = vld [vmem:[%s1491_s5 + $0x64] sm:$0xf0] }
   0x9   :  { %v58_v32 = vadd.f32 %v51_v30, %v44_v29  ;;  %v65_v33 = vld [vmem:[%s1488_s2 + $0x30] sm:$0xff]  ;;  %v934_v14 = vld [vmem:[%s1491_s5 + $0x64] sm:$0xf]  ;;  %v846_v16 = vld [vmem:[%s1491_s5 + $0x68] sm:$0xf0] }
   0xa   :  { %75 = vadd.xlane.f32.xlu0 %v66_v15  ;;  %v91_v38 = vsub.f32 1.0, %v90_v37  ;;  %v852_v6 = vld [vmem:[%s1491_s5 + $0x70] sm:$0xf]  ;;  %v936_v8 = vld [vmem:[%s1491_s5 + $0x74] sm:$0xf]  ;;  %v849_v17 = vor.u32 %v934_v14, %v846_v16 }
   0xb   :  { %v72_v34 = vadd.f32 %v65_v33, %v58_v32  ;;  %v853_v9 = vor.u32 %v937_v7, %v852_v6  ;;  %v933_v19 = vld [vmem:[%s1491_s5 + $0x54] sm:$0xf0]  ;;  %v932_v20 = vld [vmem:[%s1491_s5 + $0x54] sm:$0xf]  ;;  %v838_v22 = vld [vmem:[%s1491_s5 + $0x58] sm:$0xf0] }
   0xc   :  { %v92_v39 = vmul.f32 %v961_v36, %v91_v38  ;;  %v841_v23 = vor.u32 %v932_v20, %v838_v22  ;;  %v828_v24 = vld [vmem:[%s1491_s5 + $0x40] sm:$0xf]  ;;  %v931_v25 = vld [vmem:[%s1491_s5 + $0x44] sm:$0xf0]  ;;  %v930_v26 = vld [vmem:[%s1491_s5 + $0x44] sm:$0xf] }
   0xd   :  { %348 = vmatpush.bf16.msra.mxu0 %v853_v9  ;;  %v820_v30 = vld [vmem:[%s1491_s5 + $0x30] sm:$0xf]  ;;  %v928_v32 = vld [vmem:[%s1491_s5 + $0x34] sm:$0xf]  ;;  %v927_v37 = vld [vmem:[%s1491_s5 + $0x24] sm:$0xf0] }
   0xe   :  { %v93_v40 = vadd.f32 %v961_v36, %v92_v39  ;;  %v926_v38 = vld [vmem:[%s1491_s5 + $0x24] sm:$0xf] }
   0xf   :  { %85 = vadd.xlane.f32.xlu2 %v71_v27  ;;  %81 = vadd.xlane.f32.xlu1 %v69_v31 }
  0x10   :  { %v1114_v41 = vsel %vm94_vm0, %v961_v36, %v93_v40  ;;  %v812_v36 = vld [vmem:[%s1491_s5 + $0x20] sm:$0xf]  ;;  %v814_v40 = vld [vmem:[%s1491_s5 + $0x28] sm:$0xf0] }
  0x11   :  { %v813_v39 = vor.u32 %v927_v37, %v812_v36 }
  0x12   :  { %77 = vadd.xlane.f32.xlu0 %v67_v28 }
  0x17   :  { %87 = vadd.xlane.f32.xlu2 %v72_v34 }
  0x7a   :  { %v84_v42 = vpop.xlane.xlu2 %83  ;;  %v80_v46 = vpop.xlane.xlu1 %79 }
  0x7b   :  { %v100_v43 = vmul.f32 %v1114_v41, %v84_v42  ;;  %v98_v49 = vmul.f32 %v1114_v41, %v80_v46  ;;  %v817_v42 = vor.u32 %v926_v38, %v814_v40 }
  0x7d   :  { %v76_v44 = vpop.xlane.xlu0 %75  ;;  %v1118_v47 = vsub.f32 %v70_v11, %v100_v43  ;;  %v1127_v52 = vsub.f32 %v68_v18, %v98_v49  ;;  %v857_v11 = vor.u32 %v936_v8, %v854_v10  ;;  %v836_v18 = vld [vmem:[%s1491_s5 + $0x50] sm:$0xf]  ;;  %v806_v49 = vld [vmem:[%s1491_s5 + $0x18] sm:$0xf0] }
  0x7e   :  { %v96_v45 = vmul.f32 %v1114_v41, %v76_v44  ;;  %v837_v21 = vor.u32 %v933_v19, %v836_v18  ;;  %v804_v43 = vld [vmem:[%s1491_s5 + $0x10] sm:$0xf]  ;;  %v925_v44 = vld [vmem:[%s1491_s5 + $0x14] sm:$0xf0] }
  0x7f   :  { %v114_v50 = vmul.f32 %v1118_v47, %v1118_v47  ;;  %v112_v58 = vmul.f32 %v1127_v52, %v1127_v52  ;;  %376 = vmatpush.bf16.msra.mxu1 %v857_v11  ;;  %v805_v46 = vor.u32 %v925_v44, %v804_v43 }
  0x80   :  { %v1120_v48 = vsub.f32 %v66_v15, %v96_v45  ;;  %v845_v15 = vor.u32 %v935_v13, %v844_v12  ;;  %v924_v45 = vld [vmem:[%s1491_s5 + $0x14] sm:$0xf] }
  0x81   :  { %125 = vadd.xlane.f32.xlu2 %v114_v50 }
  0x82   :  { %v110_v51 = vmul.f32 %v1120_v48, %v1120_v48  ;;  %v86_v53 = vpop.xlane.xlu2 %85  ;;  %v82_v56 = vpop.xlane.xlu1 %81  ;;  %349 = vmatpush.bf16.msra.mxu0 %v845_v15 }
  0x83   :  { %v101_v59 = vmul.f32 %v1114_v41, %v86_v53  ;;  %v99_v60 = vmul.f32 %v1114_v41, %v82_v56  ;;  %377 = vmatpush.bf16.msra.mxu1 %v849_v17 }
  0x84   :  { %117 = vadd.xlane.f32.xlu0 %v110_v51  ;;  %v809_v51 = vor.u32 %v924_v45, %v806_v49 }
  0x85   :  { %v78_v54 = vpop.xlane.xlu0 %77  ;;  %v1138_v62 = vsub.f32 %v71_v27, %v101_v59  ;;  %v1140_v63 = vsub.f32 %v69_v31, %v99_v60  ;;  %v829_v27 = vor.u32 %v931_v25, %v828_v24  ;;  %v929_v31 = vld [vmem:[%s1491_s5 + $0x34] sm:$0xf0]  ;;  %v922_v59 = vld [vmem:[%s1491_s5 + $0x4] sm:$0xf]  ;;  %v798_v60 = vld [vmem:[%s1491_s5 + $0x8] sm:$0xf0] }
  0x86   :  { %v97_v55 = vmul.f32 %v1114_v41, %v78_v54  ;;  %350 = vmatpush.bf16.msra.mxu0 %v837_v21  ;;  %v821_v33 = vor.u32 %v929_v31, %v820_v30  ;;  %v796_v54 = vld [vmem:[%s1491_s5] sm:$0xf] }
  0x87   :  { %v115_v1 = vmul.f32 %v1138_v62, %v1138_v62  ;;  %v113_v2 = vmul.f32 %v1140_v63, %v1140_v63  ;;  %378 = vmatpush.bf16.msra.mxu1 %v841_v23 }
  0x88   :  { %v1130_v57 = vsub.f32 %v67_v28, %v97_v55  ;;  %v830_v28 = vld [vmem:[%s1491_s5 + $0x48] sm:$0xf0]  ;;  %v923_v55 = vld [vmem:[%s1491_s5 + $0x4] sm:$0xf0] }
  0x89   :  { %v833_v29 = vor.u32 %v930_v26, %v830_v28 }
  0x8a   :  { %v111_v61 = vmul.f32 %v1130_v57, %v1130_v57  ;;  %v88_v0 = vpop.xlane.xlu2 %87  ;;  %351 = vmatpush.bf16.msra.mxu0 %v829_v27 }
  0x8b   :  { %v102_v3 = vmul.f32 %v1114_v41, %v88_v0  ;;  %379 = vmatpush.bf16.msra.mxu1 %v833_v29 }
  0x8c   :  { %121 = vadd.xlane.f32.xlu0 %v112_v58  ;;  %119 = vadd.xlane.f32.xlu1 %v111_v61  ;;  %v797_v58 = vor.u32 %v923_v55, %v796_v54  ;;  %v801_v61 = vor.u32 %v922_v59, %v798_v60 }
  0x8d   :  { %v1147_v4 = vsub.f32 %v72_v34, %v102_v3  ;;  %v822_v34 = vld [vmem:[%s1491_s5 + $0x38] sm:$0xf0] }
  0x8e   :  { %v825_v35 = vor.u32 %v928_v32, %v822_v34  ;;  %352 = vmatpush.bf16.msra.mxu0 %v821_v33  ;;  %v1271_v33 = vld [vmem:[%s1489_s3] ss:$0 sm:$0xff] }
  0x8f   :  { %v116_v5 = vmul.f32 %v1147_v4, %v1147_v4 }
  0x90   :  { %380 = vmatpush.bf16.msra.mxu1 %v825_v35 }
  0x92   :  { %353 = vmatpush.bf16.msra.mxu0 %v813_v39 }
  0x94   :  { %127 = vadd.xlane.f32.xlu0 %v115_v1  ;;  %123 = vadd.xlane.f32.xlu1 %v113_v2 }
  0x95   :  { %381 = vmatpush.bf16.msra.mxu1 %v817_v42 }
  0x96   :  { %354 = vmatpush.bf16.msra.mxu0 %v805_v46 }
  0x99   :  { %382 = vmatpush.bf16.msra.mxu1 %v809_v51 }
  0x9a   :  { %355 = vmatpush.bf16.msra.mxu0 %v797_v58 }
  0x9c   :  { %129 = vadd.xlane.f32.xlu1 %v116_v5 }
  0x9d   :  { %383 = vmatpush.bf16.msra.mxu1 %v801_v61 }
  0xf4   :  { %v126_v10 = vpop.xlane.xlu2 %125 }
  0xf5   :  { %v135_v16 = vmul.f32 %v126_v10, %v1114_v41 }
  0xf7   :  { %v118_v50 = vpop.xlane.xlu0 %117  ;;  %v1262_v25 = vadd.f32 1e-05, %v135_v16 }
  0xf8   :  { %v131_v53 = vmul.f32 %v118_v50, %v1114_v41 }
  0xf9   :  { %vm191_vm15 = vweird.f32 %v1262_v25 }
  0xfa   :  { %v138_v56 = vadd.f32 1e-05, %v131_v53 }
  0xfc   :  { %962 = vrsqrt.f32 %v138_v56  ;;  %vm151_vm2 = vweird.f32 %v138_v56 }
  0xff   :  { %v120_v0 = vpop.xlane.xlu1 %119  ;;  %v122_v1 = vpop.xlane.xlu0 %121 }
 0x100   :  { %v132_v2 = vmul.f32 %v120_v0, %v1114_v41  ;;  %v133_v3 = vmul.f32 %v122_v1, %v1114_v41 }
 0x102   :  { %v963_v5 = vpop.eup %962  ;;  %v139_v6 = vadd.f32 1e-05, %v132_v2  ;;  %v1250_v7 = vadd.f32 1e-05, %v133_v3 }
 0x103   :  { %v146_v8 = vmul.f32 %v963_v5, %v138_v56  ;;  %vm152_vm1 = vweird.f32 %v963_v5 }
 0x104   :  { %964 = vrsqrt.f32 %v139_v6  ;;  %vm153_vm3 = vmor %vm151_vm2, %vm152_vm1  ;;  %vm161_vm5 = vweird.f32 %v139_v6  ;;  %vm171_vm9 = vweird.f32 %v1250_v7 }
 0x105   :  { %v147_v9 = vmul.f32 %v963_v5, %v146_v8  ;;  %966 = vrsqrt.f32 %v1250_v7 }
 0x107   :  { %v148_v11 = vmul.f32 0.5, %v147_v9  ;;  %v124_v12 = vpop.xlane.xlu1 %123  ;;  %v128_v13 = vpop.xlane.xlu0 %127 }
 0x108   :  { %v134_v14 = vmul.f32 %v124_v12, %v1114_v41  ;;  %v136_v15 = vmul.f32 %v128_v13, %v1114_v41 }
 0x109   :  { %v149_v17 = vsub.f32 1.5, %v148_v11 }
 0x10a   :  { %v965_v18 = vpop.eup %964  ;;  %v141_v19 = vadd.f32 1e-05, %v134_v14  ;;  %v1260_v24 = vadd.f32 1e-05, %v136_v15 }
 0x10b   :  { %v1256_v20 = vpop.eup %966  ;;  %v150_v21 = vmul.f32 %v963_v5, %v149_v17  ;;  %v156_v22 = vmul.f32 %v965_v18, %v139_v6  ;;  %vm162_vm4 = vweird.f32 %v965_v18 }
 0x10c   :  { %v166_v23 = vmul.f32 %v1256_v20, %v1250_v7  ;;  %968 = vrsqrt.f32 %v141_v19  ;;  %vm163_vm6 = vmor %vm161_vm5, %vm162_vm4  ;;  %vm181_vm7 = vweird.f32 %v141_v19  ;;  %vm172_vm10 = vweird.f32 %v1256_v20 }
 0x10d   :  { %v157_v26 = vmul.f32 %v965_v18, %v156_v22  ;;  %v154_v29 = vsel %vm153_vm3, %v963_v5, %v150_v21  ;;  %970 = vrsqrt.f32 %v1260_v24  ;;  %vm173_vm12 = vmor %vm171_vm9, %vm172_vm10  ;;  %vm201_vm13 = vweird.f32 %v1260_v24 }
 0x10e   :  { %v167_v28 = vmul.f32 %v1256_v20, %v166_v23  ;;  %972 = vrsqrt.f32 %v1262_v25  ;;  %v215_v32 = vmul.f32 %v154_v29, %v1120_v48  ;;  %v1278_v48 = vld [vmem:[%s1490_s4] ss:$0 sm:$0xff]  ;;  %v944_v23 = vld [vmem:[%s1492_s7 + $0x30] sm:$0xff] }
 0x10f   :  { %v158_v27 = vmul.f32 0.5, %v157_v26  ;;  %v130_v38 = vpop.xlane.xlu1 %129 }
 0x110   :  { %v168_v35 = vmul.f32 0.5, %v167_v28  ;;  %v225_v43 = vmul.f32 %v1271_v33, %v215_v32  ;;  %v137_v49 = vmul.f32 %v130_v38, %v1114_v41  ;;  %v951_v28 = vld [vmem:[%s1492_s7 + $0x68] sm:$0xff]  ;;  %v950_v32 = vld [vmem:[%s1492_s7 + $0x60] sm:$0xff] }
 0x111   :  { %v159_v30 = vsub.f32 1.5, %v158_v27 }
 0x112   :  { %v969_v31 = vpop.eup %968  ;;  %v169_v45 = vsub.f32 1.5, %v168_v35  ;;  %v1288_v54 = vadd.f32 %v1278_v48, %v225_v43  ;;  %v144_v59 = vadd.f32 1e-05, %v137_v49  ;;  %v941_v43 = vld [vmem:[%s1492_s7 + $0x18] sm:$0xff]  ;;  %v946_v49 = vld [vmem:[%s1492_s7 + $0x40] sm:$0xff] }
 0x113   :  { %v160_v34 = vmul.f32 %v965_v18, %v159_v30  ;;  %v176_v36 = vmul.f32 %v969_v31, %v141_v19  ;;  %v971_v40 = vpop.eup %970  ;;  %vm182_vm8 = vweird.f32 %v969_v31  ;;  %v945_v19 = vld [vmem:[%s1492_s7 + $0x38] sm:$0xff] }
 0x114   :  { %v1280_v44 = vpop.eup %972  ;;  %v170_v56 = vmul.f32 %v1256_v20, %v169_v45  ;;  %vm183_vm11 = vmor %vm181_vm7, %vm182_vm8  ;;  %974 = vrsqrt.f32 %v144_v59  ;;  %vm202_vm14 = vweird.f32 %v971_v40  ;;  %558 = vmatpush.bf16.msra.mxu2 %v945_v19  ;;  %vm211_vm3 = vweird.f32 %v144_v59  ;;  %v947_v45 = vld [vmem:[%s1492_s7 + $0x48] sm:$0xff] }
 0x115   :  { %v177_v37 = vmul.f32 %v969_v31, %v176_v36  ;;  %v164_v39 = vsel %vm163_vm6, %v965_v18, %v160_v34  ;;  %v186_v53 = vmul.f32 %v1280_v44, %v1262_v25  ;;  %vm192_vm0 = vweird.f32 %v1280_v44  ;;  %vm203_vm1 = vmor %vm201_vm13, %vm202_vm14 }
 0x116   :  { %v216_v42 = vmul.f32 %v164_v39, %v1130_v57  ;;  %v196_v57 = vmul.f32 %v971_v40, %v1260_v24  ;;  %v174_v2 = vsel %vm173_vm12, %v1256_v20, %v170_v56  ;;  %vm193_vm2 = vmor %vm191_vm15, %vm192_vm0  ;;  %v953_v20 = vld [vmem:[%s1492_s7 + $0x78] sm:$0xff]  ;;  %v952_v24 = vld [vmem:[%s1492_s7 + $0x70] sm:$0xff] }
 0x117   :  { %v178_v46 = vmul.f32 0.5, %v177_v37  ;;  %v187_v1 = vmul.f32 %v1280_v44, %v186_v53  ;;  %v217_v6 = vmul.f32 %v174_v2, %v1127_v52  ;;  %586 = vmatpush.bf16.msra.mxu3 %v953_v20 }
 0x118   :  { %v226_v50 = vmul.f32 %v1271_v33, %v216_v42  ;;  %v197_v61 = vmul.f32 %v971_v40, %v196_v57  ;;  %559 = vmatpush.bf16.msra.mxu2 %v944_v23 }
 0x119   :  { %v179_v51 = vsub.f32 1.5, %v178_v46  ;;  %v188_v7 = vmul.f32 0.5, %v187_v1  ;;  %v227_v11 = vmul.f32 %v1271_v33, %v217_v6  ;;  %v938_v46 = vld [vmem:[%s1492_s7] sm:$0xff] }
 0x11a   :  { %v1291_v55 = vadd.f32 %v1278_v48, %v226_v50  ;;  %v198_v5 = vmul.f32 0.5, %v197_v61  ;;  %v975_v10 = vpop.eup %974  ;;  %v262_v50 = vld [vmem:[%s1494_s6] sm:$0x3] }
 0x11b   :  { %v180_v58 = vmul.f32 %v969_v31, %v179_v51  ;;  %v189_v12 = vsub.f32 1.5, %v188_v7  ;;  %v206_v52 = vmul.f32 %v975_v10, %v144_v59  ;;  %v1311_v14 = vadd.f32 %v1278_v48, %v227_v11  ;;  %587 = vmatpush.bf16.msra.mxu3 %v952_v24 }
 0x11c   :  { %v242_v60 = vpack.c.bf16 %v1291_v55, %v1288_v54  ;;  %v199_v9 = vsub.f32 1.5, %v198_v5  ;;  %vm212_vm4 = vweird.f32 %v975_v10  ;;  %v264_v53 = vperm.slane %v262_v50, 0 }
 0x11d   :  { %v184_v0 = vsel %vm183_vm11, %v969_v31, %v180_v58  ;;  %v190_v15 = vmul.f32 %v1280_v44, %v189_v12  ;;  %v207_v17 = vmul.f32 %v975_v10, %v206_v52  ;;  %vm213_vm5 = vmor %vm211_vm3, %vm212_vm4  ;;  %v265_v56 = vperm.slane %v262_v50, 1 }
 0x11e   :  { %356 = vmatmul.bf16.vlgmr.msra.gmra.mxu0 %v242_v60  ;;  %384 = vmatmul.bf16.vlgmr.msra.gmra.mxu1 %v242_v60  ;;  %v218_v3 = vmul.f32 %v184_v0, %v1140_v63  ;;  %v200_v63 = vmul.f32 %v971_v40, %v199_v9 }
 0x11f   :  { %v194_v21 = vsel %vm193_vm2, %v1280_v44, %v190_v15  ;;  %v208_v25 = vmul.f32 0.5, %v207_v17  ;;  %588 = vmatpush.bf16.msra.mxu3 %v951_v28  ;;  %v949_v44 = vld [vmem:[%s1492_s7 + $0x58] sm:$0xff] }
 0x120   :  { %v228_v8 = vmul.f32 %v1271_v33, %v218_v3  ;;  %v204_v18 = vsel %vm203_vm1, %v971_v40, %v200_v63  ;;  %v219_v26 = vmul.f32 %v194_v21, %v1118_v47  ;;  %v942_v47 = vld [vmem:[%s1492_s7 + $0x20] sm:$0xff] }
 0x121   :  { %v220_v22 = vmul.f32 %v204_v18, %v1138_v62  ;;  %v943_v62 = vld [vmem:[%s1492_s7 + $0x28] sm:$0xff]  ;;  %v209_v29 = vsub.f32 1.5, %v208_v25 }
 0x122   :  { %v1306_v13 = vadd.f32 %v1278_v48, %v228_v8  ;;  %v229_v30 = vmul.f32 %v1271_v33, %v219_v26  ;;  %560 = vmatpush.bf16.msra.mxu2 %v943_v62 }
 0x123   :  { %v230_v27 = vmul.f32 %v1271_v33, %v220_v22  ;;  %v210_v34 = vmul.f32 %v975_v10, %v209_v29  ;;  %589 = vmatpush.bf16.msra.mxu3 %v950_v32 }
 0x124   :  { %v243_v16 = vpack.c.bf16 %v1306_v13, %v1311_v14  ;;  %v1349_v35 = vadd.f32 %v1278_v48, %v229_v30 }
 0x125   :  { %v1340_v31 = vadd.f32 %v1278_v48, %v230_v27  ;;  %v214_v37 = vsel %vm213_vm5, %v975_v10, %v210_v34 }
 0x126   :  { %561 = vmatpush.bf16.msra.mxu2 %v942_v47  ;;  %v221_v38 = vmul.f32 %v214_v37, %v1147_v4  ;;  %v940_v4 = vld [vmem:[%s1492_s7 + $0x10] sm:$0xff] }
 0x127   :  { %v244_v36 = vpack.c.bf16 %v1340_v31, %v1349_v35  ;;  %590 = vmatpush.bf16.msra.mxu3 %v949_v44 }
 0x128   :  { %v231_v39 = vmul.f32 %v1271_v33, %v221_v38  ;;  %v948_v33 = vld [vmem:[%s1492_s7 + $0x50] sm:$0xff] }
 0x12a   :  { %v1356_v40 = vadd.f32 %v1278_v48, %v231_v39  ;;  %562 = vmatpush.bf16.msra.mxu2 %v941_v43  ;;  %v939_v48 = vld [vmem:[%s1492_s7 + $0x8] sm:$0xff] }
 0x12b   :  { %591 = vmatpush.bf16.msra.mxu3 %v948_v33 }
 0x12c   :  { %v245_v42 = vpack.c.bf16 %v1356_v40, %v1356_v40 }
 0x12e   :  { %361 = vmatmul.bf16.gmra.mxu0 %v243_v16  ;;  %389 = vmatmul.bf16.gmra.mxu1 %v243_v16 }
 0x12f   :  { %563 = vmatpush.bf16.msra.mxu2 %v940_v4  ;;  %592 = vmatpush.bf16.msra.mxu3 %v947_v45 }
 0x133   :  { %564 = vmatpush.bf16.msra.mxu2 %v939_v48  ;;  %593 = vmatpush.bf16.msra.mxu3 %v946_v49  ;;  %v957_v49 = vld [vmem:[%s1493_s8] ss:$0 sm:$0xff] }
 0x137   :  { %565 = vmatpush.bf16.msra.mxu2 %v938_v46 }
 0x13e   :  { %366 = vmatmul.bf16.gmra.mxu0 %v244_v36  ;;  %394 = vmatmul.bf16.gmra.mxu1 %v244_v36 }
 0x14e   :  { %371 = vmatmul.bf16.gmra.mxu0 %v245_v42  ;;  %399 = vmatmul.bf16.gmra.mxu1 %v245_v42 }
 0x19b   :  { %v357_v51 = vpop.f32.mrf.mxu0  ;;  %v385_v57 = vpop.f32.mrf.mxu1 }
 0x19c   :  { %v358_v58 = vadd.f32 %v357_v51, %v264_v53  ;;  %v386_v59 = vadd.f32 %v385_v57, %v265_v56 }
 0x19e   :  { %v404_v2 = vmax.f32 %v358_v58, 0.0  ;;  %v405_v3 = vmax.f32 %v386_v59, 0.0 }
 0x1a3   :  { %v359_v60 = vpop.f32.mrf.mxu0  ;;  %v387_v61 = vpop.f32.mrf.mxu1 }
 0x1a4   :  { %v360_v0 = vadd.f32 %v359_v60, %v264_v53  ;;  %v388_v1 = vadd.f32 %v387_v61, %v265_v56 }
 0x1a6   :  { %v406_v5 = vmax.f32 %v360_v0, 0.0  ;;  %v407_v6 = vmax.f32 %v388_v1, 0.0 }
 0x1a8   :  { %v418_v7 = vpack.c.bf16 %v406_v5, %v404_v2  ;;  %v419_v8 = vpack.c.bf16 %v407_v6, %v405_v3 }
 0x1aa   :  { %566 = vmatmul.bf16.vlgmr.msra.gmra.mxu2 %v418_v7  ;;  %594 = vmatmul.bf16.vlgmr.msra.gmra.mxu3 %v419_v8 }
 0x1ab   :  { %v362_v9 = vpop.f32.mrf.mxu0  ;;  %v390_v10 = vpop.f32.mrf.mxu1 }
 0x1ac   :  { %v363_v11 = vadd.f32 %v362_v9, %v264_v53  ;;  %v391_v12 = vadd.f32 %v390_v10, %v265_v56 }
 0x1ae   :  { %v408_v17 = vmax.f32 %v363_v11, 0.0  ;;  %v409_v18 = vmax.f32 %v391_v12, 0.0 }
 0x1b3   :  { %v364_v63 = vpop.f32.mrf.mxu0  ;;  %v392_v52 = vpop.f32.mrf.mxu1 }
 0x1b4   :  { %v365_v15 = vadd.f32 %v364_v63, %v264_v53  ;;  %v393_v16 = vadd.f32 %v392_v52, %v265_v56 }
 0x1b6   :  { %v410_v19 = vmax.f32 %v365_v15, 0.0  ;;  %v411_v20 = vmax.f32 %v393_v16, 0.0 }
 0x1b8   :  { %v420_v21 = vpack.c.bf16 %v410_v19, %v408_v17  ;;  %v421_v22 = vpack.c.bf16 %v411_v20, %v409_v18 }
 0x1ba   :  { %571 = vmatmul.bf16.gmra.mxu2 %v420_v21  ;;  %599 = vmatmul.bf16.gmra.mxu3 %v421_v22 }
 0x1bb   :  { %v367_v23 = vpop.f32.mrf.mxu0  ;;  %v395_v24 = vpop.f32.mrf.mxu1 }
 0x1bc   :  { %v368_v25 = vadd.f32 %v367_v23, %v264_v53  ;;  %v396_v26 = vadd.f32 %v395_v24, %v265_v56 }
 0x1be   :  { %v412_v30 = vmax.f32 %v368_v25, 0.0  ;;  %v413_v47 = vmax.f32 %v396_v26, 0.0 }
 0x1c3   :  { %v369_v27 = vpop.f32.mrf.mxu0  ;;  %v397_v62 = vpop.f32.mrf.mxu1 }
 0x1c4   :  { %v370_v28 = vadd.f32 %v369_v27, %v264_v53  ;;  %v398_v29 = vadd.f32 %v397_v62, %v265_v56 }
 0x1c6   :  { %v414_v32 = vmax.f32 %v370_v28, 0.0  ;;  %v415_v34 = vmax.f32 %v398_v29, 0.0 }
 0x1c8   :  { %v422_v36 = vpack.c.bf16 %v414_v32, %v412_v30  ;;  %v423_v37 = vpack.c.bf16 %v415_v34, %v413_v47 }
 0x1ca   :  { %576 = vmatmul.bf16.gmra.mxu2 %v422_v36  ;;  %604 = vmatmul.bf16.gmra.mxu3 %v423_v37 }
 0x1cb   :  { %v372_v38 = vpop.f32.mrf.mxu0  ;;  %v400_v39 = vpop.f32.mrf.mxu1 }
 0x1cc   :  { %v373_v42 = vadd.f32 %v372_v38, %v264_v53  ;;  %v401_v43 = vadd.f32 %v400_v39, %v265_v56 }
 0x1ce   :  { %v416_v33 = vmax.f32 %v373_v42, 0.0  ;;  %v417_v48 = vmax.f32 %v401_v43, 0.0 }
 0x1d0   :  { %v424_v45 = vpack.c.bf16 %v416_v33, %v416_v33  ;;  %v425_v46 = vpack.c.bf16 %v417_v48, %v417_v48 }
 0x1d3   :  { %v374_v44 = vpop.f32.mrf.mxu0  ;;  %v402_v4 = vpop.f32.mrf.mxu1 }
 0x1da   :  { %581 = vmatmul.bf16.gmra.mxu2 %v424_v45  ;;  %609 = vmatmul.bf16.gmra.mxu3 %v425_v46 }
 0x22d   :  { %v567_v50 = vpop.f32.mrf.mxu2  ;;  %v595_v51 = vpop.f32.mrf.mxu3 }
 0x22e   :  { %v568_v57 = vadd.f32 %v957_v49, %v567_v50 }
 0x230   :  { %v596_v58 = vadd.f32 %v595_v51, %v568_v57 }
 0x232   :  { %v614_v59 = vadd.f32 %v596_v58, %v1288_v54 }
 0x234   :  { %623 = vadd.xlane.f32.xlu2 %v614_v59 }
 0x235   :  { %v569_v53 = vpop.f32.mrf.mxu2  ;;  %v597_v56 = vpop.f32.mrf.mxu3 }
 0x236   :  { %v570_v60 = vadd.f32 %v957_v49, %v569_v53 }
 0x238   :  { %v598_v61 = vadd.f32 %v597_v56, %v570_v60 }
 0x23a   :  { %v615_v0 = vadd.f32 %v598_v61, %v1291_v55 }
 0x23c   :  { %625 = vadd.xlane.f32.xlu0 %v615_v0 }
 0x23d   :  { %v572_v1 = vpop.f32.mrf.mxu2  ;;  %v600_v2 = vpop.f32.mrf.mxu3 }
 0x23e   :  { %v573_v3 = vadd.f32 %v957_v49, %v572_v1 }
 0x240   :  { %v601_v5 = vadd.f32 %v600_v2, %v573_v3 }
 0x242   :  { %v616_v6 = vadd.f32 %v601_v5, %v1311_v14 }
 0x244   :  { %627 = vadd.xlane.f32.xlu1 %v616_v6 }
 0x245   :  { %v574_v7 = vpop.f32.mrf.mxu2  ;;  %v602_v8 = vpop.f32.mrf.mxu3 }
 0x246   :  { %v575_v9 = vadd.f32 %v957_v49, %v574_v7 }
 0x248   :  { %v603_v10 = vadd.f32 %v602_v8, %v575_v9 }
 0x24a   :  { %v617_v54 = vadd.f32 %v603_v10, %v1306_v13 }
 0x24c   :  { %629 = vadd.xlane.f32.xlu2 %v617_v54 }
 0x24d   :  { %v577_v11 = vpop.f32.mrf.mxu2  ;;  %v605_v12 = vpop.f32.mrf.mxu3 }
 0x24e   :  { %v578_v63 = vadd.f32 %v957_v49, %v577_v11 }
 0x250   :  { %v606_v52 = vadd.f32 %v605_v12, %v578_v63  ;;  %v1439_v63 = vld [vmem:[%s1496_s10] ss:$0 sm:$0xff] }
 0x252   :  { %v618_v55 = vadd.f32 %v606_v52, %v1349_v35 }
 0x254   :  { %631 = vadd.xlane.f32.xlu0 %v618_v55 }
 0x255   :  { %v579_v15 = vpop.f32.mrf.mxu2  ;;  %v607_v16 = vpop.f32.mrf.mxu3 }
 0x256   :  { %v580_v17 = vadd.f32 %v957_v49, %v579_v15 }
 0x258   :  { %v608_v18 = vadd.f32 %v607_v16, %v580_v17 }
 0x25a   :  { %v619_v14 = vadd.f32 %v608_v18, %v1340_v31 }
 0x25c   :  { %633 = vadd.xlane.f32.xlu1 %v619_v14 }
 0x25d   :  { %v582_v19 = vpop.f32.mrf.mxu2  ;;  %v610_v20 = vpop.f32.mrf.mxu3 }
 0x25e   :  { %v583_v21 = vadd.f32 %v957_v49, %v582_v19 }
 0x260   :  { %v611_v22 = vadd.f32 %v610_v20, %v583_v21 }
 0x262   :  { %v620_v13 = vadd.f32 %v611_v22, %v1356_v40 }
 0x264   :  { %635 = vadd.xlane.f32.xlu2 %v620_v13 }
 0x265   :  { %v584_v23 = vpop.f32.mrf.mxu2  ;;  %v612_v24 = vpop.f32.mrf.mxu3 }
 0x2a7   :  { %v624_v25 = vpop.xlane.xlu2 %623 }
 0x2a8   :  { %v637_v35 = vmul.f32 %v624_v25, %v1114_v41 }
 0x2aa   :  { %v644_v26 = vsub.f32 %v614_v59, %v637_v35 }
 0x2ac   :  { %v651_v27 = vmul.f32 %v644_v26, %v644_v26 }
 0x2ae   :  { %658 = vadd.xlane.f32.xlu0 %v651_v27 }
 0x2af   :  { %v626_v62 = vpop.xlane.xlu0 %625 }
 0x2b0   :  { %v638_v28 = vmul.f32 %v626_v62, %v1114_v41 }
 0x2b2   :  { %v1399_v31 = vsub.f32 %v615_v0, %v638_v28 }
 0x2b4   :  { %v652_v29 = vmul.f32 %v1399_v31, %v1399_v31 }
 0x2b6   :  { %660 = vadd.xlane.f32.xlu1 %v652_v29 }
 0x2b7   :  { %v628_v30 = vpop.xlane.xlu1 %627 }
 0x2b8   :  { %v639_v40 = vmul.f32 %v628_v30, %v1114_v41 }
 0x2ba   :  { %v1404_v47 = vsub.f32 %v616_v6, %v639_v40 }
 0x2bc   :  { %v653_v32 = vmul.f32 %v1404_v47, %v1404_v47 }
 0x2be   :  { %662 = vadd.xlane.f32.xlu2 %v653_v32 }
 0x2bf   :  { %v630_v34 = vpop.xlane.xlu2 %629 }
 0x2c0   :  { %v640_v36 = vmul.f32 %v630_v34, %v1114_v41 }
 0x2c2   :  { %v1409_v37 = vsub.f32 %v617_v54, %v640_v36  ;;  %v1434_v54 = vld [vmem:[%s1495_s9] ss:$0 sm:$0xff] }
 0x2c4   :  { %v654_v38 = vmul.f32 %v1409_v37, %v1409_v37 }
 0x2c6   :  { %664 = vadd.xlane.f32.xlu0 %v654_v38 }
 0x2c7   :  { %v632_v39 = vpop.xlane.xlu0 %631 }
 0x2c8   :  { %v641_v42 = vmul.f32 %v632_v39, %v1114_v41 }
 0x2ca   :  { %v1414_v43 = vsub.f32 %v618_v55, %v641_v42 }
 0x2cc   :  { %v655_v44 = vmul.f32 %v1414_v43, %v1414_v43 }
 0x2ce   :  { %666 = vadd.xlane.f32.xlu1 %v655_v44 }
 0x2cf   :  { %v634_v4 = vpop.xlane.xlu1 %633 }
 0x2d0   :  { %v642_v33 = vmul.f32 %v634_v4, %v1114_v41 }
 0x2d2   :  { %v1419_v48 = vsub.f32 %v619_v14, %v642_v33 }
 0x2d4   :  { %v656_v45 = vmul.f32 %v1419_v48, %v1419_v48 }
 0x2d6   :  { %668 = vadd.xlane.f32.xlu2 %v656_v45 }
 0x2d7   :  { %v636_v46 = vpop.xlane.xlu2 %635 }
 0x2d8   :  { %v643_v49 = vmul.f32 %v636_v46, %v1114_v41 }
 0x2da   :  { %v1424_v50 = vsub.f32 %v620_v13, %v643_v49 }
 0x2dc   :  { %v657_v51 = vmul.f32 %v1424_v50, %v1424_v50 }
 0x2de   :  { %670 = vadd.xlane.f32.xlu0 %v657_v51 }
 0x321   :  { %v659_v57 = vpop.xlane.xlu0 %658 }
 0x322   :  { %v672_v58 = vmul.f32 %v659_v57, %v1114_v41 }
 0x324   :  { %v679_v59 = vadd.f32 1e-05, %v672_v58 }
 0x326   :  { %976 = vrsqrt.f32 %v679_v59  ;;  %vm692_vm7 = vweird.f32 %v679_v59 }
 0x329   :  { %v661_v53 = vpop.xlane.xlu1 %660 }
 0x32a   :  { %v673_v56 = vmul.f32 %v661_v53, %v1114_v41 }
 0x32c   :  { %v977_v60 = vpop.eup %976  ;;  %v680_v61 = vadd.f32 1e-05, %v673_v56 }
 0x32d   :  { %v687_v0 = vmul.f32 %v977_v60, %v679_v59  ;;  %vm693_vm6 = vweird.f32 %v977_v60 }
 0x32e   :  { %978 = vrsqrt.f32 %v680_v61  ;;  %vm694_vm8 = vmor %vm692_vm7, %vm693_vm6  ;;  %vm702_vm10 = vweird.f32 %v680_v61 }
 0x32f   :  { %v688_v1 = vmul.f32 %v977_v60, %v687_v0 }
 0x331   :  { %v689_v2 = vmul.f32 0.5, %v688_v1  ;;  %v663_v3 = vpop.xlane.xlu2 %662 }
 0x332   :  { %v674_v5 = vmul.f32 %v663_v3, %v1114_v41 }
 0x333   :  { %v690_v6 = vsub.f32 1.5, %v689_v2 }
 0x334   :  { %v979_v7 = vpop.eup %978  ;;  %v681_v8 = vadd.f32 1e-05, %v674_v5 }
 0x335   :  { %v691_v9 = vmul.f32 %v977_v60, %v690_v6  ;;  %v697_v10 = vmul.f32 %v979_v7, %v680_v61  ;;  %vm703_vm9 = vweird.f32 %v979_v7 }
 0x336   :  { %980 = vrsqrt.f32 %v681_v8  ;;  %vm704_vm11 = vmor %vm702_vm10, %vm703_vm9  ;;  %vm712_vm13 = vweird.f32 %v681_v8 }
 0x337   :  { %v695_v11 = vsel %vm694_vm8, %v977_v60, %v691_v9  ;;  %v698_v12 = vmul.f32 %v979_v7, %v697_v10 }
 0x338   :  { %v756_v52 = vmul.f32 %v695_v11, %v644_v26 }
 0x339   :  { %v699_v55 = vmul.f32 0.5, %v698_v12  ;;  %v665_v15 = vpop.xlane.xlu0 %664 }
 0x33a   :  { %v766_v16 = vmul.f32 %v1434_v54, %v756_v52  ;;  %v675_v17 = vmul.f32 %v665_v15, %v1114_v41 }
 0x33b   :  { %v700_v18 = vsub.f32 1.5, %v699_v55 }
 0x33c   :  { %v981_v14 = vpop.eup %980  ;;  %v776_v19 = vadd.f32 %v1439_v63, %v766_v16  ;;  %v682_v20 = vadd.f32 1e-05, %v675_v17 }
 0x33d   :  { %v701_v21 = vmul.f32 %v979_v7, %v700_v18  ;;  %v707_v22 = vmul.f32 %v981_v14, %v681_v8  ;;  %vm713_vm12 = vweird.f32 %v981_v14 }
 0x33e   :  { %783 = vst [vmem:[%s1497_s11] sm:$0xff] %v776_v19  ;;  %982 = vrsqrt.f32 %v682_v20  ;;  %vm714_vm14 = vmor %vm712_vm13, %vm713_vm12  ;;  %vm722_vm0 = vweird.f32 %v682_v20 }
 0x33f   :  { %v705_v13 = vsel %vm704_vm11, %v979_v7, %v701_v21  ;;  %v708_v23 = vmul.f32 %v981_v14, %v707_v22 }
 0x340   :  { %v757_v24 = vmul.f32 %v705_v13, %v1399_v31 }
 0x341   :  { %v709_v25 = vmul.f32 0.5, %v708_v23  ;;  %v667_v35 = vpop.xlane.xlu1 %666 }
 0x342   :  { %v767_v26 = vmul.f32 %v1434_v54, %v757_v24  ;;  %v676_v27 = vmul.f32 %v667_v35, %v1114_v41 }
 0x343   :  { %v710_v62 = vsub.f32 1.5, %v709_v25 }
 0x344   :  { %v983_v28 = vpop.eup %982  ;;  %v777_v29 = vadd.f32 %v1439_v63, %v767_v26  ;;  %v683_v30 = vadd.f32 1e-05, %v676_v27 }
 0x345   :  { %v711_v40 = vmul.f32 %v981_v14, %v710_v62  ;;  %v717_v32 = vmul.f32 %v983_v28, %v682_v20  ;;  %vm723_vm15 = vweird.f32 %v983_v28 }
 0x346   :  { %784 = vst [vmem:[%s1497_s11 + $0x8] sm:$0xff] %v777_v29  ;;  %984 = vrsqrt.f32 %v683_v30  ;;  %vm724_vm1 = vmor %vm722_vm0, %vm723_vm15  ;;  %vm732_vm3 = vweird.f32 %v683_v30 }
 0x347   :  { %v715_v31 = vsel %vm714_vm14, %v981_v14, %v711_v40  ;;  %v718_v34 = vmul.f32 %v983_v28, %v717_v32 }
 0x348   :  { %v758_v36 = vmul.f32 %v715_v31, %v1404_v47 }
 0x349   :  { %v719_v38 = vmul.f32 0.5, %v718_v34  ;;  %v669_v39 = vpop.xlane.xlu2 %668 }
 0x34a   :  { %v768_v42 = vmul.f32 %v1434_v54, %v758_v36  ;;  %v677_v44 = vmul.f32 %v669_v39, %v1114_v41 }
 0x34b   :  { %v720_v4 = vsub.f32 1.5, %v719_v38 }
 0x34c   :  { %v985_v33 = vpop.eup %984  ;;  %v778_v45 = vadd.f32 %v1439_v63, %v768_v42  ;;  %v684_v46 = vadd.f32 1e-05, %v677_v44 }
 0x34d   :  { %v721_v49 = vmul.f32 %v983_v28, %v720_v4  ;;  %v727_v51 = vmul.f32 %v985_v33, %v683_v30  ;;  %vm733_vm2 = vweird.f32 %v985_v33 }
 0x34e   :  { %785 = vst [vmem:[%s1497_s11 + $0x10] sm:$0xff] %v778_v45  ;;  %986 = vrsqrt.f32 %v684_v46  ;;  %vm734_vm4 = vmor %vm732_vm3, %vm733_vm2  ;;  %vm742_vm6 = vweird.f32 %v684_v46 }
 0x34f   :  { %v725_v47 = vsel %vm724_vm1, %v983_v28, %v721_v49  ;;  %v728_v57 = vmul.f32 %v985_v33, %v727_v51 }
 0x350   :  { %v759_v58 = vmul.f32 %v725_v47, %v1409_v37 }
 0x351   :  { %v729_v59 = vmul.f32 0.5, %v728_v57  ;;  %v671_v53 = vpop.xlane.xlu0 %670 }
 0x352   :  { %v769_v56 = vmul.f32 %v1434_v54, %v759_v58  ;;  %v678_v60 = vmul.f32 %v671_v53, %v1114_v41 }
 0x353   :  { %v730_v61 = vsub.f32 1.5, %v729_v59 }
 0x354   :  { %v987_v0 = vpop.eup %986  ;;  %v779_v1 = vadd.f32 %v1439_v63, %v769_v56  ;;  %v685_v2 = vadd.f32 1e-05, %v678_v60 }
 0x355   :  { %v731_v3 = vmul.f32 %v985_v33, %v730_v61  ;;  %v737_v5 = vmul.f32 %v987_v0, %v684_v46  ;;  %vm743_vm5 = vweird.f32 %v987_v0 }
 0x356   :  { %786 = vst [vmem:[%s1497_s11 + $0x18] sm:$0xff] %v779_v1  ;;  %988 = vrsqrt.f32 %v685_v2  ;;  %vm744_vm7 = vmor %vm742_vm6, %vm743_vm5  ;;  %vm752_vm9 = vweird.f32 %v685_v2 }
 0x357   :  { %v735_v37 = vsel %vm734_vm4, %v985_v33, %v731_v3  ;;  %v738_v6 = vmul.f32 %v987_v0, %v737_v5 }
 0x358   :  { %v760_v7 = vmul.f32 %v735_v37, %v1414_v43 }
 0x359   :  { %v739_v41 = vmul.f32 0.5, %v738_v6 }
 0x35a   :  { %v770_v8 = vmul.f32 %v1434_v54, %v760_v7 }
 0x35b   :  { %v740_v9 = vsub.f32 1.5, %v739_v41 }
 0x35c   :  { %v989_v10 = vpop.eup %988  ;;  %v780_v11 = vadd.f32 %v1439_v63, %v770_v8 }
 0x35d   :  { %v741_v12 = vmul.f32 %v987_v0, %v740_v9  ;;  %v747_v52 = vmul.f32 %v989_v10, %v685_v2  ;;  %vm753_vm8 = vweird.f32 %v989_v10 }
 0x35e   :  { %787 = vst [vmem:[%s1497_s11 + $0x20] sm:$0xff] %v780_v11  ;;  %vm754_vm10 = vmor %vm752_vm9, %vm753_vm8 }
 0x35f   :  { %v745_v55 = vsel %vm744_vm7, %v987_v0, %v741_v12  ;;  %v748_v15 = vmul.f32 %v989_v10, %v747_v52 }
 0x360   :  { %v761_v43 = vmul.f32 %v745_v55, %v1419_v48 }
 0x361   :  { %v749_v16 = vmul.f32 0.5, %v748_v15 }
 0x362   :  { %v771_v17 = vmul.f32 %v1434_v54, %v761_v43 }
 0x363   :  { %v750_v18 = vsub.f32 1.5, %v749_v16 }
 0x364   :  { %v781_v14 = vadd.f32 %v1439_v63, %v771_v17 }
 0x365   :  { %v751_v19 = vmul.f32 %v989_v10, %v750_v18 }
 0x366   :  { %788 = vst [vmem:[%s1497_s11 + $0x28] sm:$0xff] %v781_v14 }
 0x367   :  { %v755_v20 = vsel %vm754_vm10, %v989_v10, %v751_v19 }
 0x368   :  { %v762_v21 = vmul.f32 %v755_v20, %v1424_v50 }
 0x36a   :  { %v772_v22 = vmul.f32 %v1434_v54, %v762_v21 }
 0x36c   :  { %v782_v48 = vadd.f32 %v1439_v63, %v772_v22 }
 0x36e   :  { %789 = vst [vmem:[%s1497_s11 + $0x30] sm:$0xff] %v782_v48 }

// kernel: vidtr_forward.15
= control target key start
LH: loop header
LB: loop body
LE: loop exit
PB: predicated region body
PF: predicated region fallthrough
CT: control target
= control target key end

     0   :  { %vm104_vm0 = vcmask 80896   ;;  %s213_s1 = inlined_call_operand.vmem [shape: bf16[128,10], index: 1, kind: input, shape index: {}]   ;;  %s214_s2 = inlined_call_operand.vmem [shape: f32[1,10], index: 2, kind: input, shape index: {}]   ;;  %s215_s0 = inlined_call_operand.vmem [shape: bf16[16,128], index: 0, kind: input, shape index: {}]   ;;  %s216_s3 = inlined_call_operand.vmem [shape: f32[16,10], index: 3, kind: output, shape index: {}]  }
   0x1   :  { %v155_v0 = vld [vmem:[%s213_s1 + $0x38] sm:$0xff]  ;;  %v154_v1 = vld [vmem:[%s213_s1 + $0x30] sm:$0xff]  ;;  %v153_v2 = vld [vmem:[%s213_s1 + $0x28] sm:$0xff] }
   0x2   :  { %90 = vmatpush.bf16.msra.mxu0 %v155_v0  ;;  %v152_v3 = vld [vmem:[%s213_s1 + $0x20] sm:$0xff]  ;;  %v151_v4 = vld [vmem:[%s213_s1 + $0x18] sm:$0xff]  ;;  %v150_v5 = vld [vmem:[%s213_s1 + $0x10] sm:$0xff] }
   0x3   :  { %v149_v6 = vld [vmem:[%s213_s1 + $0x8] sm:$0xff]  ;;  %v148_v7 = vld [vmem:[%s213_s1] sm:$0xff] }
   0x4   :  { %v147_v8 = vld [vmem:[%s215_s0] sm:$0xff] }
   0x5   :  { %v156_v9 = vld [vmem:[%s214_s2] ss:$0 sm:$0xff] }
   0x6   :  { %91 = vmatpush.bf16.msra.mxu0 %v154_v1 }
   0xa   :  { %92 = vmatpush.bf16.msra.mxu0 %v153_v2 }
   0xe   :  { %93 = vmatpush.bf16.msra.mxu0 %v152_v3 }
  0x12   :  { %94 = vmatpush.bf16.msra.mxu0 %v151_v4 }
  0x16   :  { %95 = vmatpush.bf16.msra.mxu0 %v150_v5 }
  0x1a   :  { %96 = vmatpush.bf16.msra.mxu0 %v149_v6 }
  0x1e   :  { %97 = vmatpush.bf16.msra.mxu0 %v148_v7 }
  0x21   :  { %98 = vmatmul.bf16.vlgmr.msra.gmra.mxu0 %v147_v8 }
  0x9e   :  { %v99_v10 = vpop.f32.mrf.mxu0 }
  0x9f   :  { %v100_v11 = vadd.f32 %v156_v9, %v99_v10 }
  0xa1   :  { %105 = vst.msk [vmem:[%s216_s3] sm:$0xff] %vm104_vm0, %v100_v11 }
  0xa6   :  { %v101_v12 = vpop.f32.mrf.mxu0 }
  0xa7   :  { %v102_v13 = vadd.f32 %v156_v9, %v101_v12 }
  0xa9   :  { %106 = vst.msk [vmem:[%s216_s3 + $0x8] sm:$0xff] %vm104_vm0, %v102_v13 }

// kernel: vidtr_forward.10
= control target key start
LH: loop header
LB: loop body
LE: loop exit
PB: predicated region body
PF: predicated region fallthrough
CT: control target
= control target key end

     0   :  { %s2863_s13 = smov 0   ;;  %s2865_s14 = smov 0   ;;  %s3663_s0 = inlined_call_operand.vmem [shape: bf16[160,128], index: 0, kind: input, shape index: {}, may-alias: {0,1}]   ;;  %s3664_s1 = inlined_call_operand.vmem [shape: bf16[160,128], index: 1, kind: input, shape index: {}, may-alias: {0,1}]   ;;  %s3665_s2 = inlined_call_operand.vmem [shape: bf16[4,128,32], index: 2, kind: input, shape index: {}]   ;;  %s3666_s3 = inlined_call_operand.vmem [shape: bf16[4,128,32], index: 3, kind: input, shape index: {}]   ;;  %s3667_s4 = inlined_call_operand.vmem [shape: bf16[4,128,32], index: 4, kind: input, shape index: {}]   ;;  %s3668_s5 = inlined_call_operand.vmem [shape: bf16[4,32,128], index: 5, kind: input, shape index: {}]   ;;  %s3669_s6 = inlined_call_operand.vmem [shape: f32[4,1,32], index: 6, kind: input, shape index: {}]   ;;  %s3670_s7 = inlined_call_operand.vmem [shape: f32[4,1,32], index: 7, kind: input, shape index: {}]   ;;  %s3671_s8 = inlined_call_operand.vmem [shape: f32[4,1,32], index: 8, kind: input, shape index: {}]   ;;  %s3672_s9 = inlined_call_operand.vmem [shape: f32[1,128], index: 9, kind: input, shape index: {}]   ;;  %s3673_s10 = inlined_call_operand.vmem [shape: f32[160,128], index: 10, kind: output, shape index: {}]  }
   0x1   :  { %s2867_s15 = smov 0  }
   0x2 LB: > { %s29_s16 = sadd.s32 1, %s2802_s14  ;;  %p2373_p0 = scmp.ge.s32.totalorder %s2806_s15, 1  ;;  %s2806_s15 = sphi %s2867_s15, %s20_s15   ;;  %s2802_s14 = sphi %s2865_s14, %s3675_s14   ;;  %s2798_s13 = sphi %s2863_s13, %s3674_s13  }
   0x3   : > { %p30_p1 = scmp.ge.s32.totalorder %s29_s16, 4  ;;  %p400_p2 = scmp.lt.s32.totalorder %s2806_s15, 5 }
   0x5   : > { %s3677_s16 = smov (%p30_p1, %s29_s16), 0  ;;  %p401_p3 = pnand %p2373_p0, %p400_p2 }
   0x6   : > { %p484_p4 = scmp.lt.s32.totalorder (!%p401_p3), %s2798_s13, 3  ;;  %p2596_p5 = scmp.ne.s32.totalorder (!%p401_p3), %s2798_s13, 0 }
   0x7   : > { %404 = sbr.rel (%p401_p3) target bundleno = 1274 (0x4fa), region = 60 }
   0xc   : > { %s2885_s17 = scalar_select %p484_p4, %s2798_s13, 3  ;;  %v2609_v9 = vld [vmem:[%s3663_s0 + $0x18] sm:$0xff]  ;;  %v2606_v11 = vld [vmem:[%s3663_s0] sm:$0xff]  ;;  %v2607_v17 = vld [vmem:[%s3663_s0 + $0x8] sm:$0xff]  ;;  %vm1151_vm0 = vcmask 261120   ;;  %vm1465_vm2 = vcmask 130048  }
   0xd   : > { %v2610_v15 = vld [vmem:[%s3663_s0 + $0x20] sm:$0xff]  ;;  %v2611_v20 = vld [vmem:[%s3663_s0 + $0x28] sm:$0xff]  ;;  %v2608_v21 = vld [vmem:[%s3663_s0 + $0x10] sm:$0xff] }
   0xe   : > { %s2888_s18 = sshll.u32 %s2885_s17, 6  ;;  %s506_s21 = scalar_lea.vmem %s3669_s6, %s2885_s17  ;;  %v2612_v22 = vld [vmem:[%s3663_s0 + $0x30] sm:$0xff]  ;;  %v2613_v25 = vld [vmem:[%s3663_s0 + $0x38] sm:$0xff]  ;;  %v2615_v35 = vld [vmem:[%s3663_s0 + $0x48] sm:$0xff] }
   0xf   : > { %s2898_s24 = scalar_lea.vmem %s3665_s2, %s2888_s18  ;;  %s509_s27 = scalar_lea.vmem %s3670_s7, %s2885_s17  ;;  %v2956_v23 = vld [vmem:[%s506_s21] ss:$0 sm:$0xff] }
  0x10   : > { %s512_s30 = scalar_lea.vmem %s3671_s8, %s2885_s17  ;;  %v2633_v0 = vld [vmem:[%s2898_s24 + $0x38] sm:$0xff]  ;;  %v2632_v1 = vld [vmem:[%s2898_s24 + $0x30] sm:$0xff]  ;;  %v2631_v2 = vld [vmem:[%s2898_s24 + $0x28] sm:$0xff]  ;;  %s2919_s19 = scalar_lea.vmem %s3666_s3, %s2888_s18 }
  0x11   : > { %2652 = vmatpush.bf16.msra.mxu1 %v2633_v0  ;;  %688 = vmatpush.bf16.msra.mxu0 %v2633_v0  ;;  %v2630_v3 = vld [vmem:[%s2898_s24 + $0x20] sm:$0xff]  ;;  %v2629_v4 = vld [vmem:[%s2898_s24 + $0x18] sm:$0xff]  ;;  %v2628_v5 = vld [vmem:[%s2898_s24 + $0x10] sm:$0xff]  ;;  %s2605_s11 = sshll.u32 %s2885_s17, 4 }
  0x12   : > { %2653 = vmatpush.bf16.msra.mxu2 %v2633_v0  ;;  %2654 = vmatpush.bf16.msra.mxu3 %v2633_v0  ;;  %v2627_v6 = vld [vmem:[%s2898_s24 + $0x8] sm:$0xff]  ;;  %v2626_v7 = vld [vmem:[%s2898_s24] sm:$0xff]  ;;  %v2641_v8 = vld [vmem:[%s2919_s19 + $0x38] sm:$0xff]  ;;  %s498_s24 = scalar_lea.vmem %s3667_s4, %s2888_s18  ;;  %s503_s22 = scalar_lea.vmem %s3668_s5, %s2605_s11 }
  0x13   : > { %v2640_v10 = vld [vmem:[%s2919_s19 + $0x30] sm:$0xff]  ;;  %v2639_v12 = vld [vmem:[%s2919_s19 + $0x28] sm:$0xff]  ;;  %v2638_v13 = vld [vmem:[%s2919_s19 + $0x20] sm:$0xff] }
  0x14   : > { %v2637_v14 = vld [vmem:[%s2919_s19 + $0x18] sm:$0xff]  ;;  %v2636_v16 = vld [vmem:[%s2919_s19 + $0x10] sm:$0xff]  ;;  %v2635_v18 = vld [vmem:[%s2919_s19 + $0x8] sm:$0xff] }
  0x15   : > { %2655 = vmatpush.bf16.msra.mxu1 %v2632_v1  ;;  %689 = vmatpush.bf16.msra.mxu0 %v2632_v1  ;;  %v2634_v19 = vld [vmem:[%s2919_s19] sm:$0xff] }
  0x16   : > { %2656 = vmatpush.bf16.msra.mxu2 %v2632_v1  ;;  %2657 = vmatpush.bf16.msra.mxu3 %v2632_v1  ;;  %v2614_v38 = vld [vmem:[%s3663_s0 + $0x40] sm:$0xff] }
  0x17   : > { %v2988_v45 = vld [vmem:[%s509_s27] ss:$0 sm:$0xff] }
  0x19   : > { %2658 = vmatpush.bf16.msra.mxu1 %v2631_v2  ;;  %690 = vmatpush.bf16.msra.mxu0 %v2631_v2 }
  0x1a   : > { %2659 = vmatpush.bf16.msra.mxu2 %v2631_v2  ;;  %2660 = vmatpush.bf16.msra.mxu3 %v2631_v2 }
  0x1d   : > { %2661 = vmatpush.bf16.msra.mxu1 %v2630_v3  ;;  %691 = vmatpush.bf16.msra.mxu0 %v2630_v3 }
  0x1e   : > { %2662 = vmatpush.bf16.msra.mxu2 %v2630_v3  ;;  %2663 = vmatpush.bf16.msra.mxu3 %v2630_v3 }
  0x21   : > { %2664 = vmatpush.bf16.msra.mxu1 %v2629_v4  ;;  %692 = vmatpush.bf16.msra.mxu0 %v2629_v4 }
  0x22   : > { %2665 = vmatpush.bf16.msra.mxu2 %v2629_v4  ;;  %2666 = vmatpush.bf16.msra.mxu3 %v2629_v4 }
  0x25   : > { %2667 = vmatpush.bf16.msra.mxu1 %v2628_v5  ;;  %693 = vmatpush.bf16.msra.mxu0 %v2628_v5 }
  0x26   : > { %2668 = vmatpush.bf16.msra.mxu2 %v2628_v5  ;;  %2669 = vmatpush.bf16.msra.mxu3 %v2628_v5 }
  0x29   : > { %2670 = vmatpush.bf16.msra.mxu1 %v2627_v6  ;;  %694 = vmatpush.bf16.msra.mxu0 %v2627_v6 }
  0x2a   : > { %2671 = vmatpush.bf16.msra.mxu2 %v2627_v6  ;;  %2672 = vmatpush.bf16.msra.mxu3 %v2627_v6 }
  0x2d   : > { %2673 = vmatpush.bf16.msra.mxu1 %v2626_v7  ;;  %695 = vmatpush.bf16.msra.mxu0 %v2626_v7 }
  0x2e   : > { %2674 = vmatpush.bf16.msra.mxu2 %v2626_v7  ;;  %2675 = vmatpush.bf16.msra.mxu3 %v2626_v7 }
  0x30   : > { %711 = vmatmul.bf16.vlgmr.msra.gmra.mxu1 %v2609_v9  ;;  %696 = vmatmul.bf16.vlgmr.msra.gmra.mxu0 %v2606_v11 }
  0x31   : > { %815 = vmatpush.bf16.msrb.mxu1 %v2641_v8  ;;  %726 = vmatmul.bf16.vlgmr.msra.gmra.mxu2 %v2612_v22 }
  0x32   : > { %741 = vmatmul.bf16.vlgmr.msra.gmra.mxu3 %v2615_v35 }
  0x35   : > { %816 = vmatpush.bf16.msrb.mxu1 %v2640_v10 }
  0x39   : > { %817 = vmatpush.bf16.msrb.mxu1 %v2639_v12 }
  0x3d   : > { %818 = vmatpush.bf16.msrb.mxu1 %v2638_v13 }
  0x40   : > { %716 = vmatmul.bf16.gmra.mxu1 %v2610_v15  ;;  %701 = vmatmul.bf16.gmra.mxu0 %v2607_v17 }
  0x41   : > { %819 = vmatpush.bf16.msrb.mxu1 %v2637_v14  ;;  %731 = vmatmul.bf16.gmra.mxu2 %v2613_v25 }
  0x45   : > { %820 = vmatpush.bf16.msrb.mxu1 %v2636_v16 }
  0x49   : > { %821 = vmatpush.bf16.msrb.mxu1 %v2635_v18 }
  0x4d   : > { %822 = vmatpush.bf16.msrb.mxu1 %v2634_v19 }
  0x50   : > { %721 = vmatmul.bf16.gmra.mxu1 %v2611_v20  ;;  %706 = vmatmul.bf16.gmra.mxu0 %v2608_v21 }
  0x51   : > { %736 = vmatmul.bf16.gmra.mxu2 %v2614_v38 }
  0x60   : > { %823 = vmatmul.bf16.vlgmr.msrb.gmra.mxu1 %v2606_v11 }
  0x70   : > { %828 = vmatmul.bf16.gmra.mxu1 %v2607_v17 }
  0x80   : > { %833 = vmatmul.bf16.gmra.mxu1 %v2608_v21 }
  0x90   : > { %838 = vmatmul.bf16.gmra.mxu1 %v2609_v9 }
  0xa0   : > { %843 = vmatmul.bf16.gmra.mxu1 %v2610_v15 }
  0xad   : > { %v712_v24 = vpop.f32.mrf.mxu1  ;;  %v697_v41 = vpop.f32.mrf.mxu0 }
  0xae   : > { %v713_v26 = vadd.f32 %v2956_v23, %v712_v24  ;;  %v698_v48 = vadd.f32 %v2956_v23, %v697_v41 }
  0xb0   : > { %848 = vmatmul.bf16.gmra.mxu1 %v2611_v20  ;;  %v1067_v27 = vmul.f32 0.17677669, %v713_v26  ;;  %v1061_v53 = vmul.f32 0.17677669, %v698_v48 }
  0xb2   : > { %v1087_v30 = vpack.c.bf16 %v1067_v27, %v1067_v27  ;;  %v1081_v59 = vpack.c.bf16 %v1061_v53, %v1061_v53 }
  0xb4   : > { %v2963_v33 = vunpack.c.l.b16 %v1087_v30  ;;  %v1143_v0 = vunpack.c.l.b16 %v1081_v59 }
  0xb5   : > { %v714_v28 = vpop.f32.mrf.mxu1  ;;  %v699_v43 = vpop.f32.mrf.mxu0 }
  0xb6   : > { %v715_v29 = vadd.f32 %v2956_v23, %v714_v28  ;;  %v700_v49 = vadd.f32 %v2956_v23, %v699_v43 }
  0xb8   : > { %v1068_v31 = vmul.f32 0.17677669, %v715_v29  ;;  %v1062_v55 = vmul.f32 0.17677669, %v700_v49 }
  0xba   : > { %v1088_v32 = vpack.c.bf16 %v1068_v31, %v1068_v31  ;;  %v1082_v60 = vpack.c.bf16 %v1062_v55, %v1062_v55 }
  0xbc   : > { %v2965_v34 = vunpack.c.l.b16 %v1088_v32  ;;  %v1144_v1 = vunpack.c.l.b16 %v1082_v60 }
  0xbd   : > { %v2970_v36 = vpop.f32.mrf.mxu1  ;;  %v702_v46 = vpop.f32.mrf.mxu0 }
  0xbe   : > { %v1236_v37 = vpack.c.b16 %v2965_v34, %v2963_v33  ;;  %v703_v3 = vadd.f32 %v2956_v23, %v702_v46  ;;  %v1145_v5 = vpack.c.b16 %v1144_v1, %v1143_v0 }
  0xc0   : > { %853 = vmatmul.bf16.gmra.mxu1 %v2612_v22  ;;  %v1063_v9 = vmul.f32 0.17677669, %v703_v3 }
  0xc2   : > { %v1083_v14 = vpack.c.bf16 %v1063_v9, %v1063_v9 }
  0xc4   : > { %v1174_v19 = vunpack.c.l.b16 %v1083_v14 }
  0xc5   : > { %v2977_v39 = vpop.f32.mrf.mxu1  ;;  %v704_v58 = vpop.f32.mrf.mxu0 }
  0xc6   : > { %v705_v4 = vadd.f32 %v2956_v23, %v704_v58 }
  0xc8   : > { %v1064_v11 = vmul.f32 0.17677669, %v705_v4 }
  0xca   : > { %v1084_v16 = vpack.c.bf16 %v1064_v11, %v1064_v11  ;;  %v727_v11 = vpop.f32.mrf.mxu2 }
  0xcc   : > { %v1175_v20 = vunpack.c.l.b16 %v1084_v16 }
  0xcd   : > { %v2979_v40 = vpop.f32.mrf.mxu1  ;;  %v707_v8 = vpop.f32.mrf.mxu0 }
  0xce   : > { %v708_v26 = vadd.f32 %v2956_v23, %v707_v8 }
  0xd0   : > { %858 = vmatmul.bf16.gmra.mxu1 %v2613_v25  ;;  %v1176_v25 = vpack.c.b16 %v1175_v20, %v1174_v19  ;;  %v1065_v30 = vmul.f32 0.17677669, %v708_v26 }
  0xd2   : > { %v1085_v41 = vpack.c.bf16 %v1065_v30, %v1065_v30  ;;  %v729_v19 = vpop.f32.mrf.mxu2 }
  0xd4   : > { %v1204_v48 = vunpack.c.l.b16 %v1085_v41 }
  0xd5   : > { %v2981_v42 = vpop.f32.mrf.mxu1  ;;  %v709_v22 = vpop.f32.mrf.mxu0 }
  0xd6   : > { %v710_v27 = vadd.f32 %v2956_v23, %v709_v22  ;;  %v725_v34 = vadd.f32 %v2956_v23, %v2981_v42 }
  0xd8   : > { %v1066_v32 = vmul.f32 0.17677669, %v710_v27  ;;  %v1072_v20 = vmul.f32 0.17677669, %v725_v34 }
  0xda   : > { %v1092_v26 = vpack.c.bf16 %v1072_v20, %v1072_v20 }
  0xdc   : > { %v1295_v30 = vunpack.c.l.b16 %v1092_v26 }
  0xdd   : > { %v824_v44 = vpop.f32.mrf.mxu1 }
  0xde   : > { %v825_v47 = vadd.f32 %v2988_v45, %v824_v44  ;;  %v1086_v44 = vpack.c.bf16 %v1066_v32, %v1066_v32 }
  0xe0   : > { %863 = vmatmul.bf16.gmra.mxu1 %v2614_v38  ;;  %v1101_v51 = vpack.c.bf16 %v825_v47, %v825_v47  ;;  %v1205_v49 = vunpack.c.l.b16 %v1086_v44 }
  0xe2   : > { %v1148_v56 = vunpack.c.l.b16 %v1101_v51 }
  0xe5   : > { %v826_v50 = vpop.f32.mrf.mxu1 }
  0xe6   : > { %v827_v52 = vadd.f32 %v2988_v45, %v826_v50 }
  0xe8   : > { %v1102_v54 = vpack.c.bf16 %v827_v52, %v827_v52  ;;  %v1206_v52 = vpack.c.b16 %v1205_v49, %v1204_v48 }
  0xea   : > { %v1149_v57 = vunpack.c.l.b16 %v1102_v54 }
  0xec   : > { %v1150_v61 = vpack.c.b16 %v1149_v57, %v1148_v56 }
  0xed   : > { %v829_v62 = vpop.f32.mrf.mxu1 }
  0xee   : > { %v1156_v63 = vsel %vm1151_vm0, %v1150_v61, 0  ;;  %v830_v2 = vadd.f32 %v2988_v45, %v829_v62 }
  0xef   : > { %1165 = vmatpush.bf16.xpose.msrb.mxu3 %v1156_v63  ;;  %v720_v63 = vadd.f32 %v2956_v23, %v2977_v39 }
  0xf0   : > { %868 = vmatmul.bf16.gmra.mxu1 %v2615_v35  ;;  %v1103_v6 = vpack.c.bf16 %v830_v2, %v830_v2  ;;  %v718_v2 = vadd.f32 %v2956_v23, %v2970_v36 }
  0xf1   : > { %v1070_v4 = vmul.f32 0.17677669, %v720_v63 }
  0xf2   : > { %v1179_v12 = vunpack.c.l.b16 %v1103_v6 }
  0xf3   : > { %v1090_v9 = vpack.c.bf16 %v1070_v4, %v1070_v4 }
  0xf5   : > { %v831_v7 = vpop.f32.mrf.mxu1  ;;  %v1265_v36 = vunpack.c.l.b16 %v1090_v9 }
  0xf6   : > { %v832_v10 = vadd.f32 %v2988_v45, %v831_v7  ;;  %2558 = vmatmul.msk.bf16.vlgmr.msrb.gmra.mxu3 %vm1151_vm0, %v1145_v5  ;;  %v1069_v7 = vmul.f32 0.17677669, %v718_v2 }
  0xf8   : > { %v1104_v13 = vpack.c.bf16 %v832_v10, %v832_v10 }
  0xfa   : > { %v1180_v15 = vunpack.c.l.b16 %v1104_v13 }
  0xfc   : > { %v1181_v17 = vpack.c.b16 %v1180_v15, %v1179_v12  ;;  %v1089_v12 = vpack.c.bf16 %v1069_v7, %v1069_v7 }
  0xfd   : > { %v834_v18 = vpop.f32.mrf.mxu1 }
  0xfe   : > { %v1186_v21 = vsel %vm1151_vm0, %v1181_v17, 0  ;;  %v835_v24 = vadd.f32 %v2988_v45, %v834_v18  ;;  %v1264_v15 = vunpack.c.l.b16 %v1089_v12  ;;  %v723_v17 = vadd.f32 %v2956_v23, %v2979_v40 }
  0xff   : > { %1195 = vmatpush.bf16.xpose.msra.mxu3 %v1186_v21 }
 0x100   : > { %v1105_v28 = vpack.c.bf16 %v835_v24, %v835_v24  ;;  %v1266_v33 = vpack.c.b16 %v1265_v36, %v1264_v15  ;;  %v1071_v24 = vmul.f32 0.17677669, %v723_v17 }
 0x102   : > { %v1209_v35 = vunpack.c.l.b16 %v1105_v28 }
 0x105   : > { %v836_v29 = vpop.f32.mrf.mxu1 }
 0x106   : > { %v837_v31 = vadd.f32 %v2988_v45, %v836_v29  ;;  %2559 = vmatmul.msk.bf16.vlgmr.msra.gmra.mxu3 %vm1151_vm0, %v1176_v25  ;;  %v1091_v29 = vpack.c.bf16 %v1071_v24, %v1071_v24 }
 0x108   : > { %v1106_v38 = vpack.c.bf16 %v837_v31, %v837_v31  ;;  %v732_v31 = vpop.f32.mrf.mxu2  ;;  %v1294_v32 = vunpack.c.l.b16 %v1091_v29 }
 0x10a   : > { %v1210_v43 = vunpack.c.l.b16 %v1106_v38  ;;  %v730_v38 = vadd.f32 %v2956_v23, %v729_v19  ;;  %v1296_v41 = vpack.c.b16 %v1295_v30, %v1294_v32 }
 0x10c   : > { %v1211_v46 = vpack.c.b16 %v1210_v43, %v1209_v35  ;;  %v728_v35 = vadd.f32 %v2956_v23, %v727_v11  ;;  %v1074_v48 = vmul.f32 0.17677669, %v730_v38 }
 0x10d   : > { %v839_v47 = vpop.f32.mrf.mxu1 }
 0x10e   : > { %v1216_v50 = vsel %vm1151_vm0, %v1211_v46, 0  ;;  %v840_v51 = vadd.f32 %v2988_v45, %v839_v47  ;;  %v1073_v46 = vmul.f32 0.17677669, %v728_v35 }
 0x10f   : > { %1225 = vmatpush.bf16.xpose.msrb.mxu3 %v1216_v50 }
 0x110   : > { %v1107_v53 = vpack.c.bf16 %v840_v51, %v840_v51  ;;  %v1093_v51 = vpack.c.bf16 %v1073_v46, %v1073_v46 }
 0x112   : > { %v1239_v56 = vunpack.c.l.b16 %v1107_v53  ;;  %v1094_v53 = vpack.c.bf16 %v1074_v48, %v1074_v48 }
 0x115   : > { %v841_v54 = vpop.f32.mrf.mxu1 }
 0x116   : > { %v842_v55 = vadd.f32 %v2988_v45, %v841_v54  ;;  %2560 = vmatmul.msk.bf16.vlgmr.msrb.gmra.mxu3 %vm1151_vm0, %v1206_v52  ;;  %v734_v54 = vpop.f32.mrf.mxu2 }
 0x117   : > { %v735_v63 = vadd.f32 %v2956_v23, %v734_v54 }
 0x118   : > { %v1108_v57 = vpack.c.bf16 %v842_v55, %v842_v55 }
 0x11a   : > { %v1240_v58 = vunpack.c.l.b16 %v1108_v57  ;;  %v1324_v57 = vunpack.c.l.b16 %v1093_v51 }
 0x11c   : > { %v1241_v59 = vpack.c.b16 %v1240_v58, %v1239_v56  ;;  %v1325_v58 = vunpack.c.l.b16 %v1094_v53 }
 0x11d   : > { %v844_v60 = vpop.f32.mrf.mxu1 }
 0x11e   : > { %v1246_v61 = vsel %vm1151_vm0, %v1241_v59, 0  ;;  %v845_v62 = vadd.f32 %v2988_v45, %v844_v60  ;;  %v737_v2 = vpop.f32.mrf.mxu2 }
 0x11f   : > { %1255 = vmatpush.bf16.xpose.msra.mxu3 %v1246_v61  ;;  %v1326_v61 = vpack.c.b16 %v1325_v58, %v1324_v57  ;;  %v738_v34 = vadd.f32 %v2956_v23, %v737_v2 }
 0x120   : > { %v1109_v0 = vpack.c.bf16 %v845_v62, %v845_v62  ;;  %v733_v62 = vadd.f32 %v2956_v23, %v732_v31  ;;  %v1442_v31 = vlaneseq }
 0x122   : > { %v1269_v5 = vunpack.c.l.b16 %v1109_v0 }
 0x125   : > { %v846_v1 = vpop.f32.mrf.mxu1 }
 0x126   : > { %v847_v3 = vadd.f32 %v2988_v45, %v846_v1  ;;  %2561 = vmatmul.msk.bf16.vlgmr.msra.gmra.mxu3 %vm1151_vm0, %v1236_v37 }
 0x128   : > { %v1110_v6 = vpack.c.bf16 %v847_v3, %v847_v3  ;;  %v1075_v3 = vmul.f32 0.17677669, %v733_v62 }
 0x12a   : > { %v1270_v8 = vunpack.c.l.b16 %v1110_v6 }
 0x12c   : > { %v1271_v10 = vpack.c.b16 %v1270_v8, %v1269_v5  ;;  %v1076_v5 = vmul.f32 0.17677669, %v735_v63  ;;  %v1095_v8 = vpack.c.bf16 %v1075_v3, %v1075_v3 }
 0x12d   : > { %v849_v39 = vpop.f32.mrf.mxu1 }
 0x12e   : > { %v1276_v13 = vsel %vm1151_vm0, %v1271_v10, 0  ;;  %v850_v14 = vadd.f32 %v2988_v45, %v849_v39  ;;  %v1096_v10 = vpack.c.bf16 %v1076_v5, %v1076_v5  ;;  %v1354_v12 = vunpack.c.l.b16 %v1095_v8 }
 0x12f   : > { %1285 = vmatpush.bf16.xpose.msrb.mxu3 %v1276_v13 }
 0x130   : > { %v1111_v37 = vpack.c.bf16 %v850_v14, %v850_v14  ;;  %v1355_v13 = vunpack.c.l.b16 %v1096_v10  ;;  %v739_v14 = vpop.f32.mrf.mxu2 }
 0x132   : > { %v1299_v21 = vunpack.c.l.b16 %v1111_v37  ;;  %v740_v37 = vadd.f32 %v2956_v23, %v739_v14  ;;  %v2649_v14 = vld [vmem:[%s498_s24 + $0x38] sm:$0xff] }
 0x133   : > { %1002 = vmatpush.bf16.msrb.mxu2 %v2649_v14 }
 0x134   : > { %v1078_v20 = vmul.f32 0.17677669, %v740_v37 }
 0x135   : > { %v851_v16 = vpop.f32.mrf.mxu1 }
 0x136   : > { %v852_v18 = vadd.f32 %v2988_v45, %v851_v16  ;;  %2562 = vmatmul.msk.bf16.vlgmr.msrb.gmra.mxu3 %vm1151_vm0, %v1266_v33  ;;  %v1356_v33 = vpack.c.b16 %v1355_v13, %v1354_v12 }
 0x138   : > { %v1112_v22 = vpack.c.bf16 %v852_v18, %v852_v18  ;;  %v1077_v18 = vmul.f32 0.17677669, %v738_v34  ;;  %v2647_v34 = vld [vmem:[%s498_s24 + $0x28] sm:$0xff] }
 0x13a   : > { %v1300_v25 = vunpack.c.l.b16 %v1112_v22 }
 0x13c   : > { %v1301_v27 = vpack.c.b16 %v1300_v25, %v1299_v21  ;;  %v742_v21 = vpop.f32.mrf.mxu3  ;;  %v1097_v25 = vpack.c.bf16 %v1077_v18, %v1077_v18 }
 0x13d   : > { %v854_v28 = vpop.f32.mrf.mxu1 }
 0x13e   : > { %v1306_v42 = vsel %vm1151_vm0, %v1301_v27, 0  ;;  %v855_v40 = vadd.f32 %v2988_v45, %v854_v28  ;;  %v1098_v27 = vpack.c.bf16 %v1078_v20, %v1078_v20  ;;  %v2644_v20 = vld [vmem:[%s498_s24 + $0x10] sm:$0xff] }
 0x13f   : > { %1315 = vmatpush.bf16.xpose.msra.mxu3 %v1306_v42  ;;  %v1384_v42 = vunpack.c.l.b16 %v1097_v25 }
 0x140   : > { %v1113_v43 = vpack.c.bf16 %v855_v40, %v855_v40  ;;  %v1385_v30 = vunpack.c.l.b16 %v1098_v27 }
 0x142   : > { %v1329_v49 = vunpack.c.l.b16 %v1113_v43  ;;  %v1386_v38 = vpack.c.b16 %v1385_v30, %v1384_v42  ;;  %v3050_v43 = vand.u32 127, %v1442_v31  ;;  %v2618_v42 = vld [vmem:[%s3664_s1 + $0x10] sm:$0xff] }
 0x144   : > { %v744_v35 = vpop.f32.mrf.mxu3  ;;  %vm1444_vm1 = vcmp.lt.s32.totalorder %v3050_v43, 5 }
 0x145   : > { %v856_v44 = vpop.f32.mrf.mxu1  ;;  %v745_v46 = vadd.f32 %v2956_v23, %v744_v35 }
 0x146   : > { %v857_v47 = vadd.f32 %v2988_v45, %v856_v44  ;;  %2563 = vmatmul.msk.bf16.vlgmr.msra.gmra.mxu3 %vm1151_vm0, %v1296_v41  ;;  %v743_v41 = vadd.f32 %v2956_v23, %v742_v21 }
 0x147   : > { %v1080_v51 = vmul.f32 0.17677669, %v745_v46  ;;  %v2619_v46 = vld [vmem:[%s3664_s1 + $0x18] sm:$0xff] }
 0x148   : > { %v1114_v50 = vpack.c.bf16 %v857_v47, %v857_v47 }
 0x14a   : > { %v1330_v52 = vunpack.c.l.b16 %v1114_v50 }
 0x14c   : > { %v1331_v55 = vpack.c.b16 %v1330_v52, %v1329_v49  ;;  %v1079_v49 = vmul.f32 0.17677669, %v743_v41 }
 0x14d   : > { %v859_v56 = vpop.f32.mrf.mxu1 }
 0x14e   : > { %v1336_v59 = vsel %vm1151_vm0, %v1331_v55, 0  ;;  %v860_v60 = vadd.f32 %v2988_v45, %v859_v56  ;;  %v1099_v56 = vpack.c.bf16 %v1079_v49, %v1079_v49 }
 0x14f   : > { %1345 = vmatpush.bf16.xpose.msrb.mxu3 %v1336_v59 }
 0x150   : > { %v1115_v0 = vpack.c.bf16 %v860_v60, %v860_v60  ;;  %v1414_v59 = vunpack.c.l.b16 %v1099_v56 }
 0x152   : > { %v1359_v6 = vunpack.c.l.b16 %v1115_v0 }
 0x155   : > { %v861_v1 = vpop.f32.mrf.mxu1 }
 0x156   : > { %v862_v4 = vadd.f32 %v2988_v45, %v861_v1  ;;  %2564 = vmatmul.msk.bf16.vlgmr.msrb.gmra.mxu3 %vm1151_vm0, %v1326_v61 }
 0x158   : > { %v1116_v7 = vpack.c.bf16 %v862_v4, %v862_v4 }
 0x15a   : > { %v1360_v9 = vunpack.c.l.b16 %v1116_v7 }
 0x15c   : > { %v1361_v39 = vpack.c.b16 %v1360_v9, %v1359_v6 }
 0x15d   : > { %v864_v11 = vpop.f32.mrf.mxu1 }
 0x15e   : > { %v1366_v36 = vsel %vm1151_vm0, %v1361_v39, 0  ;;  %v865_v15 = vadd.f32 %v2988_v45, %v864_v11 }
 0x15f   : > { %1375 = vmatpush.bf16.xpose.msra.mxu3 %v1366_v36 }
 0x160   : > { %v1117_v16 = vpack.c.bf16 %v865_v15, %v865_v15 }
 0x162   : > { %v1389_v22 = vunpack.c.l.b16 %v1117_v16  ;;  %v2646_v16 = vld [vmem:[%s498_s24 + $0x20] sm:$0xff] }
 0x165   : > { %v866_v17 = vpop.f32.mrf.mxu1 }
 0x166   : > { %v867_v19 = vadd.f32 %v2988_v45, %v866_v17  ;;  %2565 = vmatmul.msk.bf16.vlgmr.msra.gmra.mxu3 %vm1151_vm0, %v1356_v33  ;;  %v2648_v33 = vld [vmem:[%s498_s24 + $0x30] sm:$0xff]  ;;  %v2645_v17 = vld [vmem:[%s498_s24 + $0x18] sm:$0xff] }
 0x167   : > { %1003 = vmatpush.bf16.msrb.mxu2 %v2648_v33 }
 0x168   : > { %v1118_v24 = vpack.c.bf16 %v867_v19, %v867_v19 }
 0x16a   : > { %v1390_v26 = vunpack.c.l.b16 %v1118_v24 }
 0x16b   : > { %1004 = vmatpush.bf16.msrb.mxu2 %v2647_v34 }
 0x16c   : > { %v1391_v28 = vpack.c.b16 %v1390_v26, %v1389_v22  ;;  %v2643_v22 = vld [vmem:[%s498_s24 + $0x8] sm:$0xff]  ;;  %v2642_v26 = vld [vmem:[%s498_s24] sm:$0xff] }
 0x16d   : > { %v869_v29 = vpop.f32.mrf.mxu1 }
 0x16e   : > { %v1396_v40 = vsel %vm1151_vm0, %v1391_v28, 0  ;;  %v870_v32 = vadd.f32 %v2988_v45, %v869_v29  ;;  %v2616_v28 = vld [vmem:[%s3664_s1] sm:$0xff]  ;;  %v2617_v29 = vld [vmem:[%s3664_s1 + $0x8] sm:$0xff] }
 0x16f   : > { %1405 = vmatpush.bf16.xpose.msrb.mxu3 %v1396_v40  ;;  %1005 = vmatpush.bf16.msrb.mxu2 %v2646_v16 }
 0x170   : > { %v1119_v44 = vpack.c.bf16 %v870_v32, %v870_v32 }
 0x172   : > { %v1419_v50 = vunpack.c.l.b16 %v1119_v44 }
 0x173   : > { %1006 = vmatpush.bf16.msrb.mxu2 %v2645_v17 }
 0x175   : > { %v871_v47 = vpop.f32.mrf.mxu1 }
 0x176   : > { %v872_v48 = vadd.f32 %v2988_v45, %v871_v47  ;;  %2566 = vmatmul.msk.bf16.vlgmr.msrb.gmra.mxu3 %vm1151_vm0, %v1386_v38  ;;  %v1100_v45 = vpack.c.bf16 %v1080_v51, %v1080_v51 }
 0x177   : > { %1007 = vmatpush.bf16.msrb.mxu2 %v2644_v20 }
 0x178   : > { %v1120_v52 = vpack.c.bf16 %v872_v48, %v872_v48  ;;  %v1415_v60 = vunpack.c.l.b16 %v1100_v45 }
 0x179   : > { %v1167_v53 = vpop.f32.mrf.mxu3 }
 0x17a   : > { %v1420_v54 = vunpack.c.l.b16 %v1120_v52  ;;  %v3058_v55 = vsel %vm1444_vm1, %v1167_v53, -1e+30  ;;  %v1416_v0 = vpack.c.b16 %v1415_v60, %v1414_v59  ;;  %v2620_v60 = vld [vmem:[%s3664_s1 + $0x20] sm:$0xff] }
 0x17b   : > { %v1466_v23 = vsel %vm1465_vm2, %v3058_v55, -inf  ;;  %1008 = vmatpush.bf16.msrb.mxu2 %v2643_v22 }
 0x17c   : > { %v1421_v57 = vpack.c.b16 %v1420_v54, %v1419_v50  ;;  %1467 = vmax.xlane.f32.xlu0 %v1466_v23 }
 0x17e   : > { %v1426_v58 = vsel %vm1151_vm0, %v1421_v57, 0 }
 0x17f   : > { %1435 = vmatpush.bf16.xpose.msra.mxu3 %v1426_v58  ;;  %1009 = vmatpush.bf16.msrb.mxu2 %v2642_v26 }
 0x181   : > { %v1169_v61 = vpop.f32.mrf.mxu3 }
 0x182   : > { %v3065_v62 = vsel %vm1444_vm1, %v1169_v61, -1e+30  ;;  %1010 = vmatmul.bf16.vlgmr.msrb.gmra.mxu2 %v2616_v28 }
 0x183   : > { %v1469_v63 = vsel %vm1465_vm2, %v3065_v62, -inf }
 0x184   : > { %1470 = vmax.xlane.f32.xlu0 %v1469_v63 }
 0x186   : > { %2567 = vmatmul.msk.bf16.vlgmr.msra.gmra.mxu3 %vm1151_vm0, %v1416_v0 }
 0x189   : > { %v1197_v1 = vpop.f32.mrf.mxu3 }
 0x18a   : > { %v3072_v2 = vsel %vm1444_vm1, %v1197_v1, -1e+30 }
 0x18b   : > { %v1472_v3 = vsel %vm1465_vm2, %v3072_v2, -inf }
 0x18c   : > { %1473 = vmax.xlane.f32.xlu1 %v1472_v3 }
 0x191   : > { %v1199_v4 = vpop.f32.mrf.mxu3 }
 0x192   : > { %v3078_v5 = vsel %vm1444_vm1, %v1199_v4, -1e+30  ;;  %1015 = vmatmul.bf16.gmra.mxu2 %v2617_v29 }
 0x193   : > { %v1475_v6 = vsel %vm1465_vm2, %v3078_v5, -inf }
 0x194   : > { %1476 = vmax.xlane.f32.xlu1 %v1475_v6 }
 0x199   : > { %v1227_v7 = vpop.f32.mrf.mxu3 }
 0x19a   : > { %v3084_v8 = vsel %vm1444_vm1, %v1227_v7, -1e+30 }
 0x19b   : > { %v1478_v9 = vsel %vm1465_vm2, %v3084_v8, -inf }
 0x19c   : > { %1479 = vmax.xlane.f32.xlu2 %v1478_v9 }
 0x1a1   : > { %v1229_v10 = vpop.f32.mrf.mxu3 }
 0x1a2   : > { %v3090_v39 = vsel %vm1444_vm1, %v1229_v10, -1e+30  ;;  %1020 = vmatmul.bf16.gmra.mxu2 %v2618_v42  ;;  %v3216_v42 = vld [vmem:[%s512_s30] ss:$0 sm:$0xff] }
 0x1a3   : > { %v1481_v11 = vsel %vm1465_vm2, %v3090_v39, -inf }
 0x1a4   : > { %1482 = vmax.xlane.f32.xlu2 %v1481_v11 }
 0x1a9   : > { %v1257_v12 = vpop.f32.mrf.mxu3 }
 0x1aa   : > { %v3100_v13 = vsel %vm1444_vm1, %v1257_v12, -1e+30 }
 0x1ab   : > { %v1484_v36 = vsel %vm1465_vm2, %v3100_v13, -inf }
 0x1ac   : > { %1485 = vmax.xlane.f32.xlu2 %v1484_v36 }
 0x1b1   : > { %v1259_v15 = vpop.f32.mrf.mxu3 }
 0x1b2   : > { %1025 = vmatmul.bf16.gmra.mxu2 %v2619_v46  ;;  %v3136_v48 = vsel %vm1444_vm1, %v1259_v15, -1e+30 }
 0x1b3   : > { %v1487_v53 = vsel %vm1465_vm2, %v3136_v48, -inf }
 0x1b9   : > { %v1287_v37 = vpop.f32.mrf.mxu3 }
 0x1c1   : > { %v1289_v18 = vpop.f32.mrf.mxu3 }
 0x1c2   : > { %v3106_v19 = vsel %vm1444_vm1, %v1289_v18, -1e+30  ;;  %1030 = vmatmul.bf16.gmra.mxu2 %v2620_v60 }
 0x1c3   : > { %v1493_v21 = vsel %vm1465_vm2, %v3106_v19, -inf }
 0x1c4   : > { %1494 = vmax.xlane.f32.xlu2 %v1493_v21 }
 0x1c9   : > { %v1317_v24 = vpop.f32.mrf.mxu3 }
 0x1ca   : > { %v3112_v25 = vsel %vm1444_vm1, %v1317_v24, -1e+30 }
 0x1cb   : > { %v1496_v27 = vsel %vm1465_vm2, %v3112_v25, -inf }
 0x1cc   : > { %1497 = vmax.xlane.f32.xlu2 %v1496_v27 }
 0x1d1   : > { %v1319_v56 = vpop.f32.mrf.mxu3 }
 0x1ef   : > { %v1468_v30 = vpop.xlane.xlu0 %1467 }
 0x1f0   : > { %v1526_v40 = vsub.f32 %v3058_v55, %v1468_v30  ;;  %v3147_v55 = vsel %vm1444_vm1, %v1287_v37, -1e+30 }
 0x1f1   : > { %v1490_v59 = vsel %vm1465_vm2, %v3147_v55, -inf }
 0x1f2   : > { %v1546_v31 = vmul.f32 1.442695, %v1526_v40 }
 0x1f4   : > { %2703 = vpow2.f32 %v1546_v31 }
 0x1f7   : > { %v1471_v32 = vpop.xlane.xlu0 %1470 }
 0x1f8   : > { %v1527_v35 = vsub.f32 %v3065_v62, %v1471_v32  ;;  %v3161_v62 = vsel %vm1444_vm1, %v1319_v56, -1e+30  ;;  %v2622_v56 = vld [vmem:[%s3664_s1 + $0x30] sm:$0xff] }
 0x1f9   : > { %v1499_v4 = vsel %vm1465_vm2, %v3161_v62, -inf }
 0x1fa   : > { %v3127_v38 = vpop.eup %2703  ;;  %v1548_v41 = vmul.f32 1.442695, %v1527_v35 }
 0x1fb   : > { %v1586_v44 = vsel %vm1465_vm2, %v3127_v38, 0.0 }
 0x1fc   : > { %2705 = vpow2.f32 %v1548_v41  ;;  %1587 = vadd.xlane.f32.xlu0 %v1586_v44  ;;  %v2621_v41 = vld [vmem:[%s3664_s1 + $0x28] sm:$0xff] }
 0x1fd   : > { %1035 = vmatmul.bf16.gmra.mxu2 %v2621_v41 }
 0x1ff   : > { %v1474_v47 = vpop.xlane.xlu1 %1473 }
 0x200   : > { %v1528_v49 = vsub.f32 %v3072_v2, %v1474_v47  ;;  %v1347_v2 = vpop.f32.mrf.mxu3 }
 0x202   : > { %v3139_v50 = vpop.eup %2705  ;;  %v1550_v51 = vmul.f32 1.442695, %v1528_v49 }
 0x203   : > { %v1589_v52 = vsel %vm1465_vm2, %v3139_v50, 0.0 }
 0x204   : > { %2707 = vpow2.f32 %v1550_v51  ;;  %1590 = vadd.xlane.f32.xlu1 %v1589_v52  ;;  %1488 = vmax.xlane.f32.xlu0 %v1487_v53 }
 0x207   : > { %v1477_v54 = vpop.xlane.xlu1 %1476 }
 0x208   : > { %v1529_v23 = vsub.f32 %v3078_v5, %v1477_v54  ;;  %v3172_v5 = vsel %vm1444_vm1, %v1347_v2, -1e+30  ;;  %v1349_v12 = vpop.f32.mrf.mxu3 }
 0x209   : > { %v3183_v36 = vsel %vm1444_vm1, %v1349_v12, -1e+30 }
 0x20a   : > { %v3150_v45 = vpop.eup %2707  ;;  %v1552_v57 = vmul.f32 1.442695, %v1529_v23  ;;  %v1505_v15 = vsel %vm1465_vm2, %v3183_v36, -inf }
 0x20b   : > { %v1592_v58 = vsel %vm1465_vm2, %v3150_v45, 0.0 }
 0x20c   : > { %2709 = vpow2.f32 %v1552_v57  ;;  %1593 = vadd.xlane.f32.xlu0 %v1592_v58  ;;  %1491 = vmax.xlane.f32.xlu1 %v1490_v59 }
 0x20d   : > { %1040 = vmatmul.bf16.gmra.mxu2 %v2622_v56 }
 0x20f   : > { %v1480_v61 = vpop.xlane.xlu2 %1479 }
 0x210   : > { %v1530_v63 = vsub.f32 %v3084_v8, %v1480_v61  ;;  %v1502_v8 = vsel %vm1465_vm2, %v3172_v5, -inf }
 0x212   : > { %v3164_v0 = vpop.eup %2709  ;;  %v1554_v1 = vmul.f32 1.442695, %v1530_v63 }
 0x213   : > { %v1595_v3 = vsel %vm1465_vm2, %v3164_v0, 0.0 }
 0x214   : > { %2711 = vpow2.f32 %v1554_v1  ;;  %1596 = vadd.xlane.f32.xlu1 %v1595_v3  ;;  %1500 = vmax.xlane.f32.xlu0 %v1499_v4 }
 0x217   : > { %v1483_v6 = vpop.xlane.xlu2 %1482 }
 0x218   : > { %v1531_v7 = vsub.f32 %v3090_v39, %v1483_v6 }
 0x21a   : > { %v3177_v9 = vpop.eup %2711  ;;  %v1556_v10 = vmul.f32 1.442695, %v1531_v7 }
 0x21b   : > { %v1598_v11 = vsel %vm1465_vm2, %v3177_v9, 0.0 }
 0x21c   : > { %2713 = vpow2.f32 %v1556_v10  ;;  %1599 = vadd.xlane.f32.xlu1 %v1598_v11  ;;  %1503 = vmax.xlane.f32.xlu0 %v1502_v8 }
 0x21f   : > { %v1486_v14 = vpop.xlane.xlu2 %1485 }
 0x220   : > { %v1532_v39 = vsub.f32 %v3100_v13, %v1486_v14  ;;  %v3196_v13 = vpop.f32.mrf.mxu3 }
 0x222   : > { %v3188_v33 = vpop.eup %2713  ;;  %v1558_v34 = vmul.f32 1.442695, %v1532_v39 }
 0x223   : > { %v1601_v37 = vsel %vm1465_vm2, %v3188_v33, 0.0 }
 0x224   : > { %2715 = vpow2.f32 %v1558_v34  ;;  %1602 = vadd.xlane.f32.xlu2 %v1601_v37  ;;  %1506 = vmax.xlane.f32.xlu1 %v1505_v15 }
 0x228   : > { %v3199_v22 = vpop.f32.mrf.mxu3 }
 0x22a   : > { %v3192_v16 = vpop.eup %2715 }
 0x22b   : > { %v1604_v17 = vsel %vm1465_vm2, %v3192_v16, 0.0 }
 0x22c   : > { %1605 = vadd.xlane.f32.xlu2 %v1604_v17 }
 0x230   : > { %v1407_v27 = vpop.f32.mrf.mxu3 }
 0x231   : > { %v3207_v28 = vsel %vm1444_vm1, %v1407_v27, -1e+30 }
 0x232   : > { %v1514_v29 = vsel %vm1465_vm2, %v3207_v28, -inf }
 0x237   : > { %v1495_v18 = vpop.xlane.xlu2 %1494 }
 0x238   : > { %v1535_v20 = vsub.f32 %v3106_v19, %v1495_v18  ;;  %v1011_v19 = vpop.f32.mrf.mxu2  ;;  %v1409_v41 = vpop.f32.mrf.mxu3 }
 0x239   : > { %v1012_v30 = vadd.f32 %v3216_v42, %v1011_v19 }
 0x23a   : > { %v1564_v21 = vmul.f32 1.442695, %v1535_v20 }
 0x23b   : > { %v1121_v32 = vpack.c.bf16 %v1012_v30, %v1012_v30 }
 0x23c   : > { %2717 = vpow2.f32 %v1564_v21 }
 0x23d   : > { %v1713_v44 = vunpack.c.l.b16 %v1121_v32  ;;  %v3242_v32 = vsel %vm1444_vm1, %v3196_v13, -1e+30 }
 0x23f   : > { %v1498_v30 = vpop.xlane.xlu2 %1497 }
 0x240   : > { %v1013_v40 = vpop.f32.mrf.mxu2 }
 0x241   : > { %v1014_v31 = vadd.f32 %v3216_v42, %v1013_v40 }
 0x242   : > { %v3201_v24 = vpop.eup %2717 }
 0x243   : > { %v1613_v26 = vsel %vm1465_vm2, %v3201_v24, 0.0  ;;  %v1122_v35 = vpack.c.bf16 %v1014_v31, %v1014_v31 }
 0x244   : > { %1614 = vadd.xlane.f32.xlu2 %v1613_v26 }
 0x245   : > { %v1714_v46 = vunpack.c.l.b16 %v1122_v35 }
 0x247   : > { %v1715_v47 = vpack.c.b16 %v1714_v46, %v1713_v44  ;;  %v1536_v44 = vsub.f32 %v3112_v25, %v1498_v30 }
 0x248   : > { %v1016_v49 = vpop.f32.mrf.mxu2 }
 0x249   : > { %1727 = vmatpush.bf16.msrb.mxu3 %v1715_v47  ;;  %v1017_v51 = vadd.f32 %v3216_v42, %v1016_v49  ;;  %v1566_v13 = vmul.f32 1.442695, %v1536_v44 }
 0x24b   : > { %v1123_v54 = vpack.c.bf16 %v1017_v51, %v1017_v51 }
 0x24c   : > { %1515 = vmax.xlane.f32.xlu2 %v1514_v29 }
 0x24d   : > { %v1741_v58 = vunpack.c.l.b16 %v1123_v54 }
 0x250   : > { %v1018_v52 = vpop.f32.mrf.mxu2 }
 0x251   : > { %v1019_v53 = vadd.f32 %v3216_v42, %v1018_v52  ;;  %v1508_v52 = vsel %vm1465_vm2, %v3242_v32, -inf }
 0x253   : > { %v1124_v23 = vpack.c.bf16 %v1019_v53, %v1019_v53 }
 0x255   : > { %v1742_v59 = vunpack.c.l.b16 %v1124_v23 }
 0x257   : > { %v1743_v60 = vpack.c.b16 %v1742_v59, %v1741_v58  ;;  %v3263_v59 = vsel %vm1444_vm1, %v1409_v41, -1e+30 }
 0x258   : > { %v1021_v61 = vpop.f32.mrf.mxu2 }
 0x259   : > { %1755 = vmatpush.bf16.msra.mxu3 %v1743_v60  ;;  %v1022_v7 = vadd.f32 %v3216_v42, %v1021_v61 }
 0x25b   : > { %v1125_v10 = vpack.c.bf16 %v1022_v7, %v1022_v7 }
 0x25d   : > { %v1769_v37 = vunpack.c.l.b16 %v1125_v10 }
 0x260   : > { %v1023_v8 = vpop.f32.mrf.mxu2 }
 0x261   : > { %v1024_v11 = vadd.f32 %v3216_v42, %v1023_v8 }
 0x263   : > { %v1126_v17 = vpack.c.bf16 %v1024_v11, %v1024_v11 }
 0x265   : > { %v1770_v20 = vunpack.c.l.b16 %v1126_v17 }
 0x267   : > { %v1771_v19 = vpack.c.b16 %v1770_v20, %v1769_v37 }
 0x268   : > { %v1026_v53 = vpop.f32.mrf.mxu2 }
 0x269   : > { %1783 = vmatpush.bf16.msrb.mxu0 %v1771_v19  ;;  %v1027_v54 = vadd.f32 %v3216_v42, %v1026_v53 }
 0x26f   : > { %v1588_v57 = vpop.xlane.xlu0 %1587 }
 0x270   : > { %2719 = vrcp.f32 %v1588_v57 }
 0x276   : > { %v2720_v2 = vpop.eup %2719 }
 0x277   : > { %v1591_v63 = vpop.xlane.xlu1 %1590  ;;  %v1489_v1 = vpop.xlane.xlu0 %1488  ;;  %v1666_v6 = vmul.f32 %v2720_v2, %v3127_v38 }
 0x278   : > { %2721 = vrcp.f32 %v1591_v63  ;;  %v1533_v3 = vsub.f32 %v3136_v48, %v1489_v1  ;;  %v1437_v1 = vpop.f32.mrf.mxu3 }
 0x279   : > { %v1686_v14 = vpack.c.bf16 %v1666_v6, %v1666_v6  ;;  %v1517_v6 = vsel %vm1465_vm2, %v3263_v59, -inf  ;;  %v3280_v17 = vsel %vm1444_vm1, %v1437_v1, -1e+30 }
 0x27a   : > { %v1560_v4 = vmul.f32 1.442695, %v1533_v3 }
 0x27b   : > { %v1708_v26 = vunpack.c.l.b16 %v1686_v14 }
 0x27c   : > { %2723 = vpow2.f32 %v1560_v4  ;;  %v1028_v4 = vpop.f32.mrf.mxu2 }
 0x27d   : > { %v1029_v7 = vadd.f32 %v3216_v42, %v1028_v4 }
 0x27e   : > { %v2722_v12 = vpop.eup %2721 }
 0x27f   : > { %v1667_v39 = vmul.f32 %v2722_v12, %v3139_v50  ;;  %v1594_v15 = vpop.xlane.xlu0 %1593  ;;  %v1492_v34 = vpop.xlane.xlu1 %1491  ;;  %v1128_v11 = vpack.c.bf16 %v1029_v7, %v1029_v7 }
 0x280   : > { %v1534_v48 = vsub.f32 %v3147_v55, %v1492_v34  ;;  %2725 = vrcp.f32 %v1594_v15  ;;  %v1439_v19 = vpop.f32.mrf.mxu3 }
 0x281   : > { %v1687_v18 = vpack.c.bf16 %v1667_v39, %v1667_v39  ;;  %v1798_v37 = vunpack.c.l.b16 %v1128_v11 }
 0x282   : > { %v3234_v38 = vpop.eup %2723  ;;  %v1562_v21 = vmul.f32 1.442695, %v1534_v48 }
 0x283   : > { %v1709_v27 = vunpack.c.l.b16 %v1687_v18  ;;  %v1607_v29 = vsel %vm1465_vm2, %v3234_v38, 0.0 }
 0x284   : > { %2727 = vpow2.f32 %v1562_v21  ;;  %1608 = vadd.xlane.f32.xlu0 %v1607_v29  ;;  %v1031_v29 = vpop.f32.mrf.mxu2 }
 0x285   : > { %v1710_v50 = vpack.c.b16 %v1709_v27, %v1708_v26  ;;  %v1032_v30 = vadd.f32 %v3216_v42, %v1031_v29 }
 0x286   : > { %v2726_v31 = vpop.eup %2725 }
 0x287   : > { %2568 = vmatmul.msk.bf16.vlgmr.msrb.gmra.mxu3 %vm1465_vm2, %v1710_v50  ;;  %v1597_v55 = vpop.xlane.xlu1 %1596  ;;  %v1501_v40 = vpop.xlane.xlu0 %1500  ;;  %v1668_v49 = vmul.f32 %v2726_v31, %v3150_v45  ;;  %v3258_v45 = vsel %vm1444_vm1, %v3199_v22, -1e+30  ;;  %v1129_v41 = vpack.c.bf16 %v1032_v30, %v1032_v30 }
 0x288   : > { %2729 = vrcp.f32 %v1597_v55  ;;  %v1537_v35 = vsub.f32 %v3161_v62, %v1501_v40  ;;  %v1511_v22 = vsel %vm1465_vm2, %v3258_v45, -inf  ;;  %v3295_v40 = vsel %vm1444_vm1, %v1439_v19, -1e+30 }
 0x289   : > { %v1688_v25 = vpack.c.bf16 %v1668_v49, %v1668_v49  ;;  %v1825_v53 = vunpack.c.l.b16 %v1129_v41 }
 0x28a   : > { %v3246_v46 = vpop.eup %2727  ;;  %v1568_v47 = vmul.f32 1.442695, %v1537_v35 }
 0x28b   : > { %v1610_v51 = vsel %vm1465_vm2, %v3246_v46, 0.0  ;;  %v1736_v2 = vunpack.c.l.b16 %v1688_v25  ;;  %v2623_v25 = vld [vmem:[%s3664_s1 + $0x38] sm:$0xff] }
 0x28c   : > { %2731 = vpow2.f32 %v1568_v47  ;;  %1611 = vadd.xlane.f32.xlu1 %v1610_v51  ;;  %1509 = vmax.xlane.f32.xlu0 %v1508_v52  ;;  %v1523_v51 = vsel %vm1465_vm2, %v3295_v40, -inf  ;;  %v1033_v52 = vpop.f32.mrf.mxu2 }
 0x28d   : > { %2733 = vpow2.f32 %v1566_v13  ;;  %1045 = vmatmul.bf16.gmra.mxu2 %v2623_v25 }
 0x28e   : > { %v2730_v62 = vpop.eup %2729 }
 0x28f   : > { %v1669_v23 = vmul.f32 %v2730_v62, %v3164_v0  ;;  %v1600_v56 = vpop.xlane.xlu1 %1599  ;;  %v1504_v57 = vpop.xlane.xlu0 %1503  ;;  %v1127_v0 = vpack.c.bf16 %v1027_v54, %v1027_v54 }
 0x290   : > { %v1538_v58 = vsub.f32 %v3172_v5, %v1504_v57  ;;  %2735 = vrcp.f32 %v1600_v56  ;;  %v2624_v57 = vld [vmem:[%s3664_s1 + $0x40] sm:$0xff] }
 0x291   : > { %v1689_v60 = vpack.c.bf16 %v1669_v23, %v1669_v23  ;;  %v1797_v10 = vunpack.c.l.b16 %v1127_v0 }
 0x292   : > { %v3265_v61 = vpop.eup %2731  ;;  %v1570_v63 = vmul.f32 1.442695, %v1538_v58 }
 0x293   : > { %v1737_v3 = vunpack.c.l.b16 %v1689_v60  ;;  %v1619_v5 = vsel %vm1465_vm2, %v3265_v61, 0.0  ;;  %v3274_v12 = vpop.eup %2733  ;;  %v1799_v20 = vpack.c.b16 %v1798_v37, %v1797_v10 }
 0x294   : > { %2737 = vpow2.f32 %v1570_v63  ;;  %1512 = vmax.xlane.f32.xlu1 %v1511_v22  ;;  %1620 = vadd.xlane.f32.xlu2 %v1619_v5  ;;  %v1616_v26 = vsel %vm1465_vm2, %v3274_v12, 0.0 }
 0x295   : > { %v1738_v8 = vpack.c.b16 %v1737_v3, %v1736_v2  ;;  %1518 = vmax.xlane.f32.xlu0 %v1517_v6  ;;  %1811 = vmatpush.bf16.msra.mxu1 %v1799_v20  ;;  %v2625_v2 = vld [vmem:[%s3664_s1 + $0x48] sm:$0xff]  ;;  %v1036_v3 = vpop.f32.mrf.mxu2 }
 0x296   : > { %v2736_v15 = vpop.eup %2735  ;;  %v1037_v5 = vadd.f32 %v3216_v42, %v1036_v3 }
 0x297   : > { %2569 = vmatmul.msk.bf16.vlgmr.msra.gmra.mxu3 %vm1465_vm2, %v1738_v8  ;;  %v1603_v14 = vpop.xlane.xlu2 %1602  ;;  %v1507_v39 = vpop.xlane.xlu1 %1506  ;;  %v1670_v21 = vmul.f32 %v2736_v15, %v3177_v9 }
 0x298   : > { %2739 = vrcp.f32 %v1603_v14  ;;  %v1539_v34 = vsub.f32 %v3183_v36, %v1507_v39  ;;  %v1520_v36 = vsel %vm1465_vm2, %v3280_v17, -inf  ;;  %v1131_v4 = vpack.c.bf16 %v1037_v5, %v1037_v5 }
 0x299   : > { %v1690_v9 = vpack.c.bf16 %v1670_v21, %v1670_v21 }
 0x29a   : > { %v3282_v48 = vpop.eup %2737  ;;  %v1572_v18 = vmul.f32 1.442695, %v1539_v34  ;;  %v1853_v7 = vunpack.c.l.b16 %v1131_v4 }
 0x29b   : > { %v1622_v27 = vsel %vm1465_vm2, %v3282_v48, 0.0  ;;  %v1764_v44 = vunpack.c.l.b16 %v1690_v9 }
 0x29c   : > { %2741 = vpow2.f32 %v1572_v18  ;;  %1617 = vadd.xlane.f32.xlu1 %v1616_v26  ;;  %1623 = vadd.xlane.f32.xlu2 %v1622_v27 }
 0x29d   : > { %1521 = vmax.xlane.f32.xlu0 %v1520_v36  ;;  %1050 = vmatmul.bf16.gmra.mxu2 %v2624_v57  ;;  %v1038_v22 = vpop.f32.mrf.mxu2 }
 0x29e   : > { %v2740_v50 = vpop.eup %2739 }
 0x29f   : > { %v1671_v55 = vmul.f32 %v2740_v50, %v3188_v33  ;;  %v1034_v33 = vadd.f32 %v3216_v42, %v1033_v52  ;;  %v1606_v23 = vpop.xlane.xlu2 %1605 }
 0x2a1   : > { %v1691_v31 = vpack.c.bf16 %v1671_v55, %v1671_v55  ;;  %v1130_v13 = vpack.c.bf16 %v1034_v33, %v1034_v33 }
 0x2a2   : > { %v3297_v35 = vpop.eup %2741 }
 0x2a3   : > { %v1765_v47 = vunpack.c.l.b16 %v1691_v31  ;;  %v1625_v49 = vsel %vm1465_vm2, %v3297_v35, 0.0  ;;  %v1826_v62 = vunpack.c.l.b16 %v1130_v13 }
 0x2a4   : > { %1524 = vmax.xlane.f32.xlu1 %v1523_v51 }
 0x2a5   : > { %1626 = vadd.xlane.f32.xlu0 %v1625_v49  ;;  %v1766_v43 = vpack.c.b16 %v1765_v47, %v1764_v44  ;;  %v1827_v54 = vpack.c.b16 %v1826_v62, %v1825_v53  ;;  %v1041_v6 = vpop.f32.mrf.mxu2 }
 0x2a6   : > { %v1042_v37 = vadd.f32 %v3216_v42, %v1041_v6 }
 0x2a7   : > { %2570 = vmatmul.msk.bf16.vlgmr.msrb.gmra.mxu0 %vm1465_vm2, %v1766_v43  ;;  %1839 = vmatpush.bf16.msra.mxu2 %v1827_v54 }
 0x2a8   : > { %v1133_v36 = vpack.c.bf16 %v1042_v37, %v1042_v37 }
 0x2ad   : > { %1055 = vmatmul.bf16.gmra.mxu2 %v2625_v2  ;;  %v1043_v34 = vpop.f32.mrf.mxu2 }
 0x2ae   : > { %v1044_v18 = vadd.f32 %v3216_v42, %v1043_v34 }
 0x2b0   : > { %v1134_v19 = vpack.c.bf16 %v1044_v18, %v1044_v18 }
 0x2b2   : > { %v1882_v55 = vunpack.c.l.b16 %v1134_v19 }
 0x2b7   : > { %v1615_v56 = vpop.xlane.xlu2 %1614 }
 0x2bf   : > { %v1516_v58 = vpop.xlane.xlu2 %1515 }
 0x2c0   : > { %v1542_v60 = vsub.f32 %v3207_v28, %v1516_v58  ;;  %v1039_v28 = vadd.f32 %v3216_v42, %v1038_v22  ;;  %v2651_v58 = vld [vmem:[%s503_s22 + $0x8] sm:$0xff] }
 0x2c2   : > { %v1578_v63 = vmul.f32 1.442695, %v1542_v60  ;;  %v1132_v8 = vpack.c.bf16 %v1039_v28, %v1039_v28  ;;  %v2650_v60 = vld [vmem:[%s503_s22] sm:$0xff] }
 0x2c4   : > { %2743 = vpow2.f32 %v1578_v63  ;;  %v1854_v11 = vunpack.c.l.b16 %v1132_v8 }
 0x2c5   : > { %2745 = vrcp.f32 %v1606_v23 }
 0x2c6   : > { %v1855_v39 = vpack.c.b16 %v1854_v11, %v1853_v7 }
 0x2c8   : > { %1867 = vmatpush.bf16.msrb.mxu3 %v1855_v39 }
 0x2ca   : > { %v3312_v0 = vpop.eup %2743 }
 0x2cb   : > { %v1634_v1 = vsel %vm1465_vm2, %v3312_v0, 0.0  ;;  %v2746_v14 = vpop.eup %2745 }
 0x2cc   : > { %1635 = vadd.xlane.f32.xlu0 %v1634_v1  ;;  %v1672_v15 = vmul.f32 %v2746_v14, %v3192_v16  ;;  %v1881_v16 = vunpack.c.l.b16 %v1133_v36 }
 0x2ce   : > { %v1692_v21 = vpack.c.bf16 %v1672_v15, %v1672_v15  ;;  %v1883_v49 = vpack.c.b16 %v1882_v55, %v1881_v16 }
 0x2d0   : > { %v1792_v41 = vunpack.c.l.b16 %v1692_v21  ;;  %1895 = vmatpush.bf16.msra.mxu0 %v1883_v49 }
 0x2d4   : > { %2048 = vmatpush.bf16.msrb.mxu0 %v2651_v58 }
 0x2d8   : > { %2049 = vmatpush.bf16.msrb.mxu0 %v2650_v60 }
 0x2f7   : > { %v1609_v10 = vpop.xlane.xlu0 %1608 }
 0x2f8   : > { %2747 = vrcp.f32 %v1609_v10 }
 0x2f9   : > { %2749 = vrcp.f32 %v1615_v56 }
 0x2fe   : > { %v2748_v20 = vpop.eup %2747 }
 0x2ff   : > { %v1673_v26 = vmul.f32 %v2748_v20, %v3234_v38  ;;  %v1612_v27 = vpop.xlane.xlu1 %1611  ;;  %v1510_v29 = vpop.xlane.xlu0 %1509 }
 0x300   : > { %v2750_v50 = vpop.eup %2749  ;;  %2751 = vrcp.f32 %v1612_v27  ;;  %v1540_v30 = vsub.f32 %v3242_v32, %v1510_v29 }
 0x301   : > { %v1693_v9 = vpack.c.bf16 %v1673_v26, %v1673_v26  ;;  %v1675_v44 = vmul.f32 %v2750_v50, %v3201_v24 }
 0x302   : > { %v1574_v31 = vmul.f32 1.442695, %v1540_v30 }
 0x303   : > { %v1793_v47 = vunpack.c.l.b16 %v1693_v9  ;;  %v1695_v52 = vpack.c.bf16 %v1675_v44, %v1675_v44 }
 0x304   : > { %2753 = vpow2.f32 %v1574_v31 }
 0x305   : > { %v1794_v38 = vpack.c.b16 %v1793_v47, %v1792_v41 }
 0x306   : > { %v2752_v51 = vpop.eup %2751 }
 0x307   : > { %v1674_v33 = vmul.f32 %v2752_v51, %v3246_v46  ;;  %2571 = vmatmul.msk.bf16.vlgmr.msra.gmra.mxu1 %vm1465_vm2, %v1794_v38  ;;  %v1513_v32 = vpop.xlane.xlu1 %1512  ;;  %v1621_v43 = vpop.xlane.xlu2 %1620  ;;  %v1821_v46 = vunpack.c.l.b16 %v1695_v52 }
 0x308   : > { %v1541_v53 = vsub.f32 %v3258_v45, %v1513_v32  ;;  %v1519_v13 = vpop.xlane.xlu0 %1518  ;;  %2755 = vrcp.f32 %v1621_v43 }
 0x309   : > { %v1694_v62 = vpack.c.bf16 %v1674_v33, %v1674_v33  ;;  %v1543_v24 = vsub.f32 %v3263_v59, %v1519_v13 }
 0x30a   : > { %v3332_v54 = vpop.eup %2753  ;;  %v1576_v25 = vmul.f32 1.442695, %v1541_v53  ;;  %v1729_v9 = vpop.f32.mrf.mxu3 }
 0x30b   : > { %v1820_v23 = vunpack.c.l.b16 %v1694_v62  ;;  %v1580_v56 = vmul.f32 1.442695, %v1543_v24  ;;  %v1628_v57 = vsel %vm1465_vm2, %v3332_v54, 0.0 }
 0x30c   : > { %2757 = vpow2.f32 %v1576_v25  ;;  %1629 = vadd.xlane.f32.xlu1 %v1628_v57 }
 0x30d   : > { %v1822_v45 = vpack.c.b16 %v1821_v46, %v1820_v23  ;;  %2759 = vpow2.f32 %v1580_v56 }
 0x30e   : > { %v2756_v63 = vpop.eup %2755 }
 0x30f   : > { %2572 = vmatmul.msk.bf16.vlgmr.msra.gmra.mxu2 %vm1465_vm2, %v1822_v45  ;;  %v1618_v59 = vpop.xlane.xlu1 %1617  ;;  %v1624_v1 = vpop.xlane.xlu2 %1623  ;;  %v1677_v4 = vmul.f32 %v2756_v63, %v3265_v61 }
 0x310   : > { %2761 = vrcp.f32 %v1618_v59  ;;  %v1522_v2 = vpop.xlane.xlu0 %1521  ;;  %v1046_v41 = vpop.f32.mrf.mxu2 }
 0x311   : > { %v1544_v3 = vsub.f32 %v3280_v17, %v1522_v2  ;;  %2763 = vrcp.f32 %v1624_v1  ;;  %v1697_v17 = vpack.c.bf16 %v1677_v4, %v1677_v4 }
 0x312   : > { %v3341_v22 = vpop.eup %2757  ;;  %v1731_v55 = vpop.f32.mrf.mxu3 }
 0x313   : > { %v3343_v5 = vpop.eup %2759  ;;  %v1582_v28 = vmul.f32 1.442695, %v1544_v3  ;;  %v1631_v6 = vsel %vm1465_vm2, %v3341_v22, 0.0  ;;  %v1849_v18 = vunpack.c.l.b16 %v1697_v17  ;;  %v1986_v31 = vpack.c.bf16 %v1731_v55, %v1729_v9 }
 0x314   : > { %1632 = vadd.xlane.f32.xlu2 %v1631_v6  ;;  %v1637_v7 = vsel %vm1465_vm2, %v3343_v5, 0.0 }
 0x315   : > { %2765 = vpow2.f32 %v1582_v28  ;;  %1638 = vadd.xlane.f32.xlu1 %v1637_v7 }
 0x316   : > { %v2762_v8 = vpop.eup %2761 }
 0x317   : > { %v1676_v10 = vmul.f32 %v2762_v8, %v3274_v12  ;;  %v1525_v11 = vpop.xlane.xlu1 %1524  ;;  %v2764_v39 = vpop.eup %2763 }
 0x318   : > { %v1627_v14 = vpop.xlane.xlu0 %1626  ;;  %v1545_v61 = vsub.f32 %v3295_v40, %v1525_v11  ;;  %v1678_v21 = vmul.f32 %v2764_v39, %v3282_v48  ;;  %v1048_v49 = vpop.f32.mrf.mxu2 }
 0x319   : > { %v1696_v15 = vpack.c.bf16 %v1676_v10, %v1676_v10  ;;  %2767 = vrcp.f32 %v1627_v14  ;;  %v1049_v38 = vadd.f32 %v3216_v42, %v1048_v49 }
 0x31a   : > { %v1584_v34 = vmul.f32 1.442695, %v1545_v61  ;;  %v1698_v40 = vpack.c.bf16 %v1678_v21, %v1678_v21  ;;  %v1757_v44 = vpop.f32.mrf.mxu3 }
 0x31b   : > { %v3352_v37 = vpop.eup %2765  ;;  %v1848_v20 = vunpack.c.l.b16 %v1696_v15  ;;  %v1136_v33 = vpack.c.bf16 %v1049_v38, %v1049_v38 }
 0x31c   : > { %2769 = vpow2.f32 %v1584_v34  ;;  %v1640_v26 = vsel %vm1465_vm2, %v3352_v37, 0.0  ;;  %v1876_v30 = vunpack.c.l.b16 %v1698_v40 }
 0x31d   : > { %v1850_v27 = vpack.c.b16 %v1849_v18, %v1848_v20  ;;  %1641 = vadd.xlane.f32.xlu2 %v1640_v26  ;;  %v1910_v32 = vunpack.c.l.b16 %v1136_v33 }
 0x31f   : > { %v2768_v12 = vpop.eup %2767  ;;  %2573 = vmatmul.msk.bf16.vlgmr.msrb.gmra.mxu3 %vm1465_vm2, %v1850_v27 }
 0x320   : > { %v1679_v29 = vmul.f32 %v2768_v12, %v3297_v35  ;;  %v1047_v35 = vadd.f32 %v3216_v42, %v1046_v41  ;;  %v1051_v13 = vpop.f32.mrf.mxu2 }
 0x321   : > { %v1052_v24 = vadd.f32 %v3216_v42, %v1051_v13 }
 0x322   : > { %v3359_v36 = vpop.eup %2769  ;;  %v1699_v19 = vpack.c.bf16 %v1679_v29, %v1679_v29  ;;  %v1135_v47 = vpack.c.bf16 %v1047_v35, %v1047_v35  ;;  %v1759_v51 = vpop.f32.mrf.mxu3 }
 0x323   : > { %v1643_v50 = vsel %vm1465_vm2, %v3359_v36, 0.0  ;;  %v1987_v43 = vpack.c.bf16 %v1759_v51, %v1757_v44  ;;  %v1137_v25 = vpack.c.bf16 %v1052_v24, %v1052_v24 }
 0x324   : > { %v1877_v48 = vunpack.c.l.b16 %v1699_v19  ;;  %1644 = vadd.xlane.f32.xlu0 %v1643_v50  ;;  %v1909_v52 = vunpack.c.l.b16 %v1135_v47  ;;  %v1785_v62 = vpop.f32.mrf.mxu0 }
 0x325   : > { %v1937_v57 = vunpack.c.l.b16 %v1137_v25 }
 0x326   : > { %v1878_v16 = vpack.c.b16 %v1877_v48, %v1876_v30  ;;  %v1911_v53 = vpack.c.b16 %v1910_v32, %v1909_v52 }
 0x328   : > { %2574 = vmatmul.msk.bf16.vlgmr.msra.gmra.mxu0 %vm1465_vm2, %v1878_v16  ;;  %1923 = vmatpush.bf16.msrb.mxu1 %v1911_v53  ;;  %v1053_v46 = vpop.f32.mrf.mxu2 }
 0x329   : > { %v1054_v23 = vadd.f32 %v3216_v42, %v1053_v46 }
 0x32b   : > { %v1138_v45 = vpack.c.bf16 %v1054_v23, %v1054_v23 }
 0x32c   : > { %v1787_v56 = vpop.f32.mrf.mxu0 }
 0x32d   : > { %v1938_v58 = vunpack.c.l.b16 %v1138_v45  ;;  %v1988_v59 = vpack.c.bf16 %v1787_v56, %v1785_v62 }
 0x32f   : > { %v1939_v60 = vpack.c.b16 %v1938_v58, %v1937_v57 }
 0x330   : > { %v1056_v63 = vpop.f32.mrf.mxu2 }
 0x331   : > { %1951 = vmatpush.bf16.msrb.mxu2 %v1939_v60  ;;  %v1057_v1 = vadd.f32 %v3216_v42, %v1056_v63 }
 0x333   : > { %v1139_v2 = vpack.c.bf16 %v1057_v1, %v1057_v1 }
 0x335   : > { %v1965_v28 = vunpack.c.l.b16 %v1139_v2 }
 0x338   : > { %2586 = vmatmul.msk.bf16.vlgmr.msrb.gmra.mxu0 %vm1151_vm0, %v1986_v31  ;;  %v1058_v3 = vpop.f32.mrf.mxu2 }
 0x339   : > { %v1059_v4 = vadd.f32 %v3216_v42, %v1058_v3 }
 0x33b   : > { %v1140_v6 = vpack.c.bf16 %v1059_v4, %v1059_v4 }
 0x33d   : > { %v1966_v7 = vunpack.c.l.b16 %v1140_v6 }
 0x33f   : > { %v1967_v8 = vpack.c.b16 %v1966_v7, %v1965_v28  ;;  %v1636_v10 = vpop.xlane.xlu0 %1635 }
 0x341   : > { %1979 = vmatpush.bf16.msra.mxu3 %v1967_v8 }
 0x348   : > { %2587 = vmatmul.msk.bf16.gmra.mxu0 %vm1151_vm0, %v1987_v43 }
 0x358   : > { %2588 = vmatmul.msk.bf16.gmra.mxu0 %vm1151_vm0, %v1988_v59 }
 0x37f   : > { %v1630_v17 = vpop.xlane.xlu1 %1629 }
 0x380   : > { %2771 = vrcp.f32 %v1630_v17 }
 0x381   : > { %2773 = vrcp.f32 %v1636_v10 }
 0x384   : > { %v1813_v11 = vpop.f32.mrf.mxu1 }
 0x386   : > { %v2772_v61 = vpop.eup %2771 }
 0x387   : > { %v1633_v14 = vpop.xlane.xlu2 %1632  ;;  %v2774_v15 = vpop.eup %2773  ;;  %v1680_v34 = vmul.f32 %v2772_v61, %v3332_v54 }
 0x388   : > { %2775 = vrcp.f32 %v1633_v14  ;;  %v1639_v39 = vpop.xlane.xlu1 %1638  ;;  %v1682_v42 = vmul.f32 %v2774_v15, %v3312_v0 }
 0x389   : > { %2777 = vrcp.f32 %v1639_v39  ;;  %v1700_v27 = vpack.c.bf16 %v1680_v34, %v1680_v34 }
 0x38a   : > { %v1702_v40 = vpack.c.bf16 %v1682_v42, %v1682_v42 }
 0x38b   : > { %v1904_v54 = vunpack.c.l.b16 %v1700_v27 }
 0x38c   : > { %v1815_v18 = vpop.f32.mrf.mxu1  ;;  %v1932_v0 = vunpack.c.l.b16 %v1702_v40 }
 0x38d   : > { %v1989_v20 = vpack.c.bf16 %v1815_v18, %v1813_v11 }
 0x38e   : > { %v2776_v21 = vpop.eup %2775 }
 0x38f   : > { %v2778_v26 = vpop.eup %2777  ;;  %v1681_v12 = vmul.f32 %v2776_v21, %v3341_v22  ;;  %2589 = vmatmul.msk.bf16.gmra.mxu0 %vm1151_vm0, %v1989_v20 }
 0x390   : > { %v1683_v29 = vmul.f32 %v2778_v26, %v3343_v5  ;;  %v1642_v19 = vpop.xlane.xlu2 %1641 }
 0x391   : > { %v1701_v50 = vpack.c.bf16 %v1681_v12, %v1681_v12  ;;  %2779 = vrcp.f32 %v1642_v19 }
 0x392   : > { %v1703_v30 = vpack.c.bf16 %v1683_v29, %v1683_v29  ;;  %v1841_v48 = vpop.f32.mrf.mxu2 }
 0x393   : > { %v1905_v9 = vunpack.c.l.b16 %v1701_v50 }
 0x394   : > { %v1933_v16 = vunpack.c.l.b16 %v1703_v30 }
 0x395   : > { %v1906_v55 = vpack.c.b16 %v1905_v9, %v1904_v54 }
 0x396   : > { %v1934_v31 = vpack.c.b16 %v1933_v16, %v1932_v0 }
 0x397   : > { %v1645_v41 = vpop.xlane.xlu0 %1644  ;;  %2575 = vmatmul.msk.bf16.vlgmr.msrb.gmra.mxu1 %vm1465_vm2, %v1906_v55  ;;  %v2780_v22 = vpop.eup %2779 }
 0x398   : > { %2781 = vrcp.f32 %v1645_v41  ;;  %2576 = vmatmul.msk.bf16.vlgmr.msrb.gmra.mxu2 %vm1465_vm2, %v1934_v31  ;;  %v1684_v5 = vmul.f32 %v2780_v22, %v3352_v37 }
 0x39a   : > { %v1843_v44 = vpop.f32.mrf.mxu2  ;;  %v1704_v49 = vpack.c.bf16 %v1684_v5, %v1684_v5 }
 0x39b   : > { %v1990_v35 = vpack.c.bf16 %v1843_v44, %v1841_v48 }
 0x39c   : > { %v1960_v33 = vunpack.c.l.b16 %v1704_v49 }
 0x39e   : > { %v2782_v47 = vpop.eup %2781 }
 0x39f   : > { %v1685_v38 = vmul.f32 %v2782_v47, %v3359_v36  ;;  %2590 = vmatmul.msk.bf16.gmra.mxu0 %vm1151_vm0, %v1990_v35 }
 0x3a1   : > { %v1705_v51 = vpack.c.bf16 %v1685_v38, %v1685_v38 }
 0x3a2   : > { %v1869_v52 = vpop.f32.mrf.mxu3 }
 0x3a3   : > { %v1961_v32 = vunpack.c.l.b16 %v1705_v51 }
 0x3a5   : > { %v1962_v43 = vpack.c.b16 %v1961_v32, %v1960_v33  ;;  %v1897_v53 = vpop.f32.mrf.mxu0 }
 0x3a7   : > { %2577 = vmatmul.msk.bf16.vlgmr.msra.gmra.mxu3 %vm1465_vm2, %v1962_v43 }
 0x3aa   : > { %v1871_v13 = vpop.f32.mrf.mxu3 }
 0x3ab   : > { %v1991_v62 = vpack.c.bf16 %v1871_v13, %v1869_v52 }
 0x3ad   : > { %v1899_v24 = vpop.f32.mrf.mxu0 }
 0x3ae   : > { %v1992_v25 = vpack.c.bf16 %v1899_v24, %v1897_v53 }
 0x3af   : > { %2591 = vmatmul.msk.bf16.gmra.mxu0 %vm1151_vm0, %v1991_v62 }
 0x3b5   : > { %v3385_v37 = vpop.f32.mrf.mxu0 }
 0x3bd   : > { %v3387_v46 = vpop.f32.mrf.mxu0 }
 0x3bf   : > { %2592 = vmatmul.msk.bf16.gmra.mxu0 %vm1151_vm0, %v1992_v25 }
 0x3c5   : > { %v3390_v36 = vpop.f32.mrf.mxu0 }
 0x3cd   : > { %v3392_v23 = vpop.f32.mrf.mxu0 }
 0x3d5   : > { %v3394_v56 = vpop.f32.mrf.mxu0 }
 0x3dd   : > { %v3396_v57 = vpop.f32.mrf.mxu0 }
 0x40c   : > { %v3398_v45 = vpop.f32.mrf.mxu0 }
 0x414   : > { %v1925_v58 = vpop.f32.mrf.mxu1  ;;  %v3400_v59 = vpop.f32.mrf.mxu0 }
 0x41b   : > { %v1953_v2 = vpop.f32.mrf.mxu2 }
 0x41c   : > { %v1927_v60 = vpop.f32.mrf.mxu1  ;;  %v3402_v63 = vpop.f32.mrf.mxu0 }
 0x41d   : > { %v1993_v1 = vpack.c.bf16 %v1927_v60, %v1925_v58 }
 0x41f   : > { %2593 = vmatmul.msk.bf16.gmra.mxu0 %vm1151_vm0, %v1993_v1 }
 0x423   : > { %v1955_v4 = vpop.f32.mrf.mxu2 }
 0x424   : > { %v3405_v3 = vpop.f32.mrf.mxu0  ;;  %v1994_v6 = vpack.c.bf16 %v1955_v4, %v1953_v2 }
 0x42a   : > { %v1981_v7 = vpop.f32.mrf.mxu3 }
 0x42c   : > { %v3407_v28 = vpop.f32.mrf.mxu0 }
 0x42f   : > { %2594 = vmatmul.msk.bf16.gmra.mxu0 %vm1151_vm0, %v1994_v6 }
 0x432   : > { %v1983_v17 = vpop.f32.mrf.mxu3 }
 0x433   : > { %v1995_v11 = vpack.c.bf16 %v1983_v17, %v1981_v7 }
 0x434   : > { %v3410_v8 = vpop.f32.mrf.mxu0 }
 0x43c   : > { %v3412_v10 = vpop.f32.mrf.mxu0 }
 0x43f   : > { %2595 = vmatmul.msk.bf16.gmra.mxu0 %vm1151_vm0, %v1995_v11 }
 0x444   : > { %v3415_v14 = vpop.f32.mrf.mxu0 }
 0x49c   : > { %v3417_v61 = vpop.f32.mrf.mxu0 }
 0x4a4   : > { %v3419_v39 = vpop.f32.mrf.mxu0 }
 0x4ac   : > { %v3421_v15 = vpop.f32.mrf.mxu0 }
 0x4b4   : > { %v3423_v34 = vpop.f32.mrf.mxu0 }
 0x4bc   : > { %v3425_v42 = vpop.f32.mrf.mxu0 }
 0x4c0   : > { %2104 = sbr.rel (%p2596_p5) target bundleno = 1244 (0x4dc), region = 64 }
 0x4c4   : > { %v3427_v18 = vpop.f32.mrf.mxu0 }
 0x4c5   : > { %v2783_v20 = vld [vmem:[%s3672_s9] ss:$0 sm:$0xff] }
 0x4c6   : > { %v2109_v21 = vadd.f32 %v2783_v20, %v3385_v37  ;;  %v2110_v26 = vadd.f32 %v2783_v20, %v3387_v46  ;;  %v2111_v27 = vadd.f32 %v2783_v20, %v3390_v36  ;;  %v2112_v12 = vadd.f32 %v2783_v20, %v3392_v23 }
 0x4c7   : > { %v2113_v40 = vadd.f32 %v2783_v20, %v3394_v56  ;;  %v2114_v29 = vadd.f32 %v2783_v20, %v3396_v57  ;;  %v2115_v19 = vadd.f32 %v2783_v20, %v3398_v45  ;;  %v2116_v50 = vadd.f32 %v2783_v20, %v3400_v59 }
 0x4c8   : > { %2129 = vst [vmem:[%s3673_s10] sm:$0xff] %v2109_v21  ;;  %v2117_v30 = vadd.f32 %v2783_v20, %v3402_v63  ;;  %v2118_v48 = vadd.f32 %v2783_v20, %v3405_v3  ;;  %v2119_v54 = vadd.f32 %v2783_v20, %v3407_v28  ;;  %v2120_v9 = vadd.f32 %v2783_v20, %v3410_v8 }
 0x4c9   : > { %2130 = vst [vmem:[%s3673_s10 + $0x8] sm:$0xff] %v2110_v26  ;;  %v2121_v0 = vadd.f32 %v2783_v20, %v3412_v10  ;;  %v2122_v16 = vadd.f32 %v2783_v20, %v3415_v14  ;;  %v2123_v55 = vadd.f32 %v2783_v20, %v3417_v61  ;;  %v2124_v31 = vadd.f32 %v2783_v20, %v3419_v39 }
 0x4ca   : > { %2131 = vst [vmem:[%s3673_s10 + $0x10] sm:$0xff] %v2111_v27  ;;  %v2125_v41 = vadd.f32 %v2783_v20, %v3421_v15  ;;  %v2126_v22 = vadd.f32 %v2783_v20, %v3423_v34  ;;  %v2127_v44 = vadd.f32 %v2783_v20, %v3425_v42  ;;  %v2128_v5 = vadd.f32 %v2783_v20, %v3427_v18 }
 0x4cb   : > { %2132 = vst [vmem:[%s3673_s10 + $0x18] sm:$0xff] %v2112_v12 }
 0x4cc   : > { %2133 = vst [vmem:[%s3673_s10 + $0x20] sm:$0xff] %v2113_v40 }
 0x4cd   : > { %2134 = vst [vmem:[%s3673_s10 + $0x28] sm:$0xff] %v2114_v29 }
 0x4ce   : > { %2135 = vst [vmem:[%s3673_s10 + $0x30] sm:$0xff] %v2115_v19 }
 0x4cf   : > { %2136 = vst [vmem:[%s3673_s10 + $0x38] sm:$0xff] %v2116_v50 }
 0x4d0   : > { %2137 = vst [vmem:[%s3673_s10 + $0x40] sm:$0xff] %v2117_v30 }
 0x4d1   : > { %2138 = vst [vmem:[%s3673_s10 + $0x48] sm:$0xff] %v2118_v48 }
 0x4d2   : > { %2139 = vst [vmem:[%s3673_s10 + $0x50] sm:$0xff] %v2119_v54 }
 0x4d3   : > { %2140 = vst [vmem:[%s3673_s10 + $0x58] sm:$0xff] %v2120_v9 }
 0x4d4   : > { %2141 = vst [vmem:[%s3673_s10 + $0x60] sm:$0xff] %v2121_v0 }
 0x4d5   : > { %2142 = vst [vmem:[%s3673_s10 + $0x68] sm:$0xff] %v2122_v16 }
 0x4d6   : > { %2143 = vst [vmem:[%s3673_s10 + $0x70] sm:$0xff] %v2123_v55 }
 0x4d7   : > { %2144 = vst [vmem:[%s3673_s10 + $0x78] sm:$0xff] %v2124_v31 }
 0x4d8   : > { %2145 = vst [vmem:[%s3673_s10 + $0x80] sm:$0xff] %v2125_v41 }
 0x4d9   : > { %2146 = vst [vmem:[%s3673_s10 + $0x88] sm:$0xff] %v2126_v22 }
 0x4da   : > { %2147 = vst [vmem:[%s3673_s10 + $0x90] sm:$0xff] %v2127_v44 }
 0x4db   : > { %2148 = vst [vmem:[%s3673_s10 + $0x98] sm:$0xff] %v2128_v5 }
 0x4dc PF: > { %p2597_p6 = scmp.le.s32.totalorder %s2798_s13, 0 }
 0x4de   : > { %2152 = sbr.rel (%p2597_p6) target bundleno = 1274 (0x4fa), region = 68 }
 0x4e3   : > { %v2153_v35 = vld [vmem:[%s3673_s10] sm:$0xff]  ;;  %v2154_v47 = vld [vmem:[%s3673_s10 + $0x8] sm:$0xff]  ;;  %v2155_v49 = vld [vmem:[%s3673_s10 + $0x10] sm:$0xff] }
 0x4e4   : > { %v2173_v38 = vadd.f32 %v2153_v35, %v3385_v37  ;;  %v2174_v51 = vadd.f32 %v2154_v47, %v3387_v46  ;;  %v2175_v52 = vadd.f32 %v2155_v49, %v3390_v36  ;;  %v2156_v33 = vld [vmem:[%s3673_s10 + $0x18] sm:$0xff]  ;;  %v2157_v32 = vld [vmem:[%s3673_s10 + $0x20] sm:$0xff]  ;;  %v2158_v43 = vld [vmem:[%s3673_s10 + $0x28] sm:$0xff] }
 0x4e5   : > { %v2176_v53 = vadd.f32 %v2156_v33, %v3392_v23  ;;  %v2159_v13 = vld [vmem:[%s3673_s10 + $0x30] sm:$0xff]  ;;  %v2177_v62 = vadd.f32 %v2157_v32, %v3394_v56  ;;  %v2160_v24 = vld [vmem:[%s3673_s10 + $0x38] sm:$0xff]  ;;  %v2178_v37 = vadd.f32 %v2158_v43, %v3396_v57  ;;  %v2161_v25 = vld [vmem:[%s3673_s10 + $0x40] sm:$0xff] }
 0x4e6   : > { %2193 = vst [vmem:[%s3673_s10] sm:$0xff] %v2173_v38  ;;  %v2179_v46 = vadd.f32 %v2159_v13, %v3398_v45  ;;  %v2162_v36 = vld [vmem:[%s3673_s10 + $0x48] sm:$0xff]  ;;  %v2180_v23 = vadd.f32 %v2160_v24, %v3400_v59  ;;  %v2163_v56 = vld [vmem:[%s3673_s10 + $0x50] sm:$0xff]  ;;  %v2181_v57 = vadd.f32 %v2161_v25, %v3402_v63  ;;  %v2164_v45 = vld [vmem:[%s3673_s10 + $0x58] sm:$0xff] }
 0x4e7   : > { %2194 = vst [vmem:[%s3673_s10 + $0x8] sm:$0xff] %v2174_v51  ;;  %v2182_v58 = vadd.f32 %v2162_v36, %v3405_v3  ;;  %v2165_v59 = vld [vmem:[%s3673_s10 + $0x60] sm:$0xff]  ;;  %v2183_v60 = vadd.f32 %v2163_v56, %v3407_v28  ;;  %v2166_v63 = vld [vmem:[%s3673_s10 + $0x68] sm:$0xff]  ;;  %v2184_v1 = vadd.f32 %v2164_v45, %v3410_v8  ;;  %v2167_v2 = vld [vmem:[%s3673_s10 + $0x70] sm:$0xff] }
 0x4e8   : > { %2195 = vst [vmem:[%s3673_s10 + $0x10] sm:$0xff] %v2175_v52  ;;  %v2185_v3 = vadd.f32 %v2165_v59, %v3412_v10  ;;  %v2168_v4 = vld [vmem:[%s3673_s10 + $0x78] sm:$0xff]  ;;  %v2186_v28 = vadd.f32 %v2166_v63, %v3415_v14  ;;  %v2169_v6 = vld [vmem:[%s3673_s10 + $0x80] sm:$0xff]  ;;  %v2187_v7 = vadd.f32 %v2167_v2, %v3417_v61  ;;  %v2170_v8 = vld [vmem:[%s3673_s10 + $0x88] sm:$0xff] }
 0x4e9   : > { %2196 = vst [vmem:[%s3673_s10 + $0x18] sm:$0xff] %v2176_v53  ;;  %v2188_v17 = vadd.f32 %v2168_v4, %v3419_v39  ;;  %v2171_v10 = vld [vmem:[%s3673_s10 + $0x90] sm:$0xff]  ;;  %v2189_v11 = vadd.f32 %v2169_v6, %v3421_v15  ;;  %v2172_v14 = vld [vmem:[%s3673_s10 + $0x98] sm:$0xff]  ;;  %v2190_v61 = vadd.f32 %v2170_v8, %v3423_v34 }
 0x4ea   : > { %2197 = vst [vmem:[%s3673_s10 + $0x20] sm:$0xff] %v2177_v62  ;;  %v2191_v39 = vadd.f32 %v2171_v10, %v3425_v42  ;;  %v2192_v15 = vadd.f32 %v2172_v14, %v3427_v18 }
 0x4eb   : > { %2198 = vst [vmem:[%s3673_s10 + $0x28] sm:$0xff] %v2178_v37 }
 0x4ec   : > { %2199 = vst [vmem:[%s3673_s10 + $0x30] sm:$0xff] %v2179_v46 }
 0x4ed   : > { %2200 = vst [vmem:[%s3673_s10 + $0x38] sm:$0xff] %v2180_v23 }
 0x4ee   : > { %2201 = vst [vmem:[%s3673_s10 + $0x40] sm:$0xff] %v2181_v57 }
 0x4ef   : > { %2202 = vst [vmem:[%s3673_s10 + $0x48] sm:$0xff] %v2182_v58 }
 0x4f0   : > { %2203 = vst [vmem:[%s3673_s10 + $0x50] sm:$0xff] %v2183_v60 }
 0x4f1   : > { %2204 = vst [vmem:[%s3673_s10 + $0x58] sm:$0xff] %v2184_v1 }
 0x4f2   : > { %2205 = vst [vmem:[%s3673_s10 + $0x60] sm:$0xff] %v2185_v3 }
 0x4f3   : > { %2206 = vst [vmem:[%s3673_s10 + $0x68] sm:$0xff] %v2186_v28 }
 0x4f4   : > { %2207 = vst [vmem:[%s3673_s10 + $0x70] sm:$0xff] %v2187_v7 }
 0x4f5   : > { %2208 = vst [vmem:[%s3673_s10 + $0x78] sm:$0xff] %v2188_v17 }
 0x4f6   : > { %2209 = vst [vmem:[%s3673_s10 + $0x80] sm:$0xff] %v2189_v11 }
 0x4f7   : > { %2210 = vst [vmem:[%s3673_s10 + $0x88] sm:$0xff] %v2190_v61 }
 0x4f8   : > { %2211 = vst [vmem:[%s3673_s10 + $0x90] sm:$0xff] %v2191_v39 }
 0x4f9   : > { %2212 = vst [vmem:[%s3673_s10 + $0x98] sm:$0xff] %v2192_v15 }
 0x4fa PF: > { %s20_s15 = sadd.s32 1, %s2806_s15   ;;  %s3674_s13 = smov %s2802_s14 }
 0x4fb   : > { %p17_p7 = scmp.ge.s32.totalorder %s20_s15, 6   ;;  %s3675_s14 = smov %s3677_s16 }
 0x4fd   :  { %19 = sbr.rel (!%p17_p7) target bundleno = 2 (0x2), region = 122 }

</bundles_post_ra>
